<compile_context>
chip_gen: v7x
topology: tpu7x:2x2x1
jax: 0.10.0
libtpu: 0.0.40
codegen_flags: <defaults>
</compile_context>

<pallas_src>
import numpy as np
import jax
import jax.numpy as jnp
from jax.experimental import pallas as pl
from jax.experimental.pallas import tpu as pltpu

# ----------------------------- configuration --------------------------------
DIMS = 32      # embedding dim  (PyTorch default 512, shrunk)
HIDDEN = 32    # hidden_size    (PyTorch default 512, shrunk)
VOCAB = 3      # len(target_vocab) = {'<sos>', '<eos>', '<pad>'}
MAX_TGT = 8    # decoding steps (PyTorch default 500, shrunk)
SRC_LEN = 8    # encoder sequence length of `context`
BATCH = 2


# ------------------------------- kernel -------------------------------------
def decoder_kernel(ctx_ref, ctxq_ref, emb_ref, tgt0_ref,
                   w0_inp_ref, w0_al_ref, whh0_ref, b0_ref,
                   wih1_ref, whh1_ref, b1_ref,
                   wl_ref, bl_ref,
                   h10_ref, c10_ref, h20_ref, c20_ref,
                   out_ref):
    """Entire T-step greedy decode in one kernel invocation (no grid)."""
    H, V, T = HIDDEN, VOCAB, MAX_TGT

    ctx = ctx_ref[...]          # (B, S, 2H)
    ctx_q = ctxq_ref[...]       # (B, S, H)  = ctx[:, :, :H] + ctx[:, :, H:]
    emb = emb_ref[...]          # (V, D)
    w0_inp = w0_inp_ref[...]    # (D, 4H)    input half of wih0^T
    w0_al = w0_al_ref[...]      # (2H, 4H)   alignment half of wih0^T
    whh0 = whh0_ref[...]        # (H, 4H)
    b0 = b0_ref[...]            # (1, 4H)
    wih1 = wih1_ref[...]        # (H, 4H)
    whh1 = whh1_ref[...]        # (H, 4H)
    b1 = b1_ref[...]            # (1, 4H)
    wl = wl_ref[...]            # (H, V)
    bl = bl_ref[...]            # (1, V)

    def attention(q):
        # scores[b,s] = sum_h' ctx[b,s,h'] * cat((q, q))[b,h']  (folded via ctx_q)
        scores = jnp.sum(ctx_q * q[:, None, :], axis=2)          # (B, S)
        m = jnp.max(scores, axis=1, keepdims=True)
        e = jnp.exp(scores - m)
        # NOTE: pl.reciprocal(approx=True) would push this divide to the EUP, but
        # the greedy argmax feedback path is discretely sensitive to ~1e-4 level
        # perturbations, so the exact divide is kept for a tight reference match.
        w = e / jnp.sum(e, axis=1, keepdims=True)                # softmax over S
        return jnp.sum(w[:, :, None] * ctx, axis=1)              # (B, 2H)

    def lstm_cell(pre, h_prev, c_prev, whh, b):
        gates = pre + jnp.dot(h_prev, whh, preferred_element_type=jnp.float32) + b
        i = jax.nn.sigmoid(gates[:, 0:H])
        f = jax.nn.sigmoid(gates[:, H:2 * H])
        g = jnp.tanh(gates[:, 2 * H:3 * H])
        o = jax.nn.sigmoid(gates[:, 3 * H:4 * H])
        c = f * c_prev + i * g
        h = o * jnp.tanh(c)
        return h, c

    def decode_step(step, inp, h1, c1, h2, c2):
        alignment = attention(h2)                                 # query = prev h2
        # TODO(synk): nn.Dropout(p=0.5) modeled as identity (eval mode).
        pre0 = (jnp.dot(inp, w0_inp, preferred_element_type=jnp.float32)
                + jnp.dot(alignment, w0_al, preferred_element_type=jnp.float32))
        h1, c1 = lstm_cell(pre0, h1, c1, whh0, b0)
        pre1 = jnp.dot(h1, wih1, preferred_element_type=jnp.float32)
        h2, c2 = lstm_cell(pre1, h2, c2, whh1, b1)
        logits = jnp.dot(h2, wl, preferred_element_type=jnp.float32) + bl  # (B, V)
        mo = jnp.max(logits, axis=1, keepdims=True)
        lse = jnp.log(jnp.sum(jnp.exp(logits - mo), axis=1, keepdims=True)) + mo
        out_ref[step] = logits - lse                              # LogSoftmax(dim=2)
        return logits, h1, c1, h2, c2

    # ---- step 0: ground-truth embedding, random initial h/c states ----
    prev, h1, c1, h2, c2 = decode_step(
        0, tgt0_ref[...], h10_ref[...], c10_ref[...], h20_ref[...], c20_ref[...])

    # ---- steps 1..T-1: greedy argmax of previous raw logits (== argmax of its
    #      softmax), fully unrolled straight-line code ----
    for step in range(1, T):
        iota_v = jax.lax.broadcasted_iota(jnp.int32, prev.shape, 1)
        maxv = jnp.max(prev, axis=1, keepdims=True)
        idx = jnp.min(jnp.where(prev == maxv, iota_v, V), axis=1, keepdims=True)  # (B,1)
        # embedding "gather" via VPU selects over the V=3 rows (no MXU one-hot dot)
        inp = emb[V - 1][None, :]
        for v in range(V - 2, -1, -1):
            inp = jnp.where(idx == v, emb[v][None, :], inp)       # (B, D)
        prev, h1, c1, h2, c2 = decode_step(step, inp, h1, c1, h2, c2)


# ------------------------------- wrapper -------------------------------------
def decoder_forward(context, target_, params, init_states):
    B, S, twoH = context.shape
    T, D, H, V = MAX_TGT, DIMS, HIDDEN, VOCAB

    emb = params["emb"]
    # Only the step-0 ground-truth embedding is ever consumed -> pass just (B, D).
    tgt0 = emb[target_[:, 0]]                               # (B, D)
    # Fold cat((q, q)) against the context once, in the wrapper (free plumbing).
    ctx_q = context[:, :, :H] + context[:, :, H:]           # (B, S, H)
    # Split wih0^T so the kernel needs no runtime concatenate of [inp, alignment].
    w0_inp = params["wih0T"][:D]                            # (D, 4H)
    w0_al = params["wih0T"][D:]                             # (2H, 4H)

    h10, c10, h20, c20 = init_states

    inputs = (context, ctx_q, emb, tgt0,
              w0_inp, w0_al, params["whh0T"], params["b0"],
              params["wih1T"], params["whh1T"], params["b1"],
              params["wlT"], params["bl"],
              h10, c10, h20, c20)

    out = pl.pallas_call(
        decoder_kernel,
        out_shape=jax.ShapeDtypeStruct((T, B, V), jnp.float32),
        in_specs=[pl.BlockSpec(memory_space=pltpu.MemorySpace.VMEM) for _ in inputs],
        out_specs=pl.BlockSpec(memory_space=pltpu.MemorySpace.VMEM),
    )(*inputs)

    final_out = jnp.transpose(out, (1, 0, 2))               # (B, T, V) like PyTorch
    return final_out, target_


# --------------------------- parameter init ----------------------------------
def init_params(key):
    D, H, V = DIMS, HIDDEN, VOCAB
    ks = jax.random.split(key, 11)
    s = 0.1
    emb = jax.random.normal(ks[0], (V, D), jnp.float32) * s
    wih0 = jax.random.normal(ks[1], (4 * H, D + 2 * H), jnp.float32) * s
    whh0 = jax.random.normal(ks[2], (4 * H, H), jnp.float32) * s
    bih0 = jax.random.normal(ks[3], (4 * H,), jnp.float32) * s
    bhh0 = jax.random.normal(ks[4], (4 * H,), jnp.float32) * s
    wih1 = jax.random.normal(ks[5], (4 * H, H), jnp.float32) * s
    whh1 = jax.random.normal(ks[6], (4 * H, H), jnp.float32) * s
    bih1 = jax.random.normal(ks[7], (4 * H,), jnp.float32) * s
    bhh1 = jax.random.normal(ks[8], (4 * H,), jnp.float32) * s
    wl = jax.random.normal(ks[9], (V, H), jnp.float32) * s
    bl = jax.random.normal(ks[10], (V,), jnp.float32) * s
    return {
        "emb": emb,
        "wih0T": wih0.T, "whh0T": whh0.T, "b0": (bih0 + bhh0).reshape(1, 4 * H),
        "wih1T": wih1.T, "whh1T": whh1.T, "b1": (bih1 + bhh1).reshape(1, 4 * H),
        "wlT": wl.T, "bl": bl.reshape(1, V),
    }


# ---------------------- pure-JAX reference (for checking) --------------------
def decoder_reference(context, target_, params, init_states):
    emb = params["emb"]
    target_seq = emb[target_]
    h1, c1, h2, c2 = init_states
    H = HIDDEN
    outs = []
    prev = None
    for step in range(MAX_TGT):
        if step == 0:
            inp = target_seq[:, 0]
        else:
            idx = jnp.argmax(jax.nn.softmax(prev, axis=1), axis=1)
            inp = emb[idx]
        mod_q = jnp.concatenate([h2, h2], axis=1)
        scores = jnp.sum(context * mod_q[:, None, :], axis=2)
        w = jax.nn.softmax(scores, axis=1)
        alignment = jnp.sum(w[:, :, None] * context, axis=1)

        x1 = jnp.concatenate([inp, alignment], axis=1)
        g = x1 @ params["wih0T"] + h1 @ params["whh0T"] + params["b0"]
        i1, f1 = jax.nn.sigmoid(g[:, :H]), jax.nn.sigmoid(g[:, H:2 * H])
        gg, o1 = jnp.tanh(g[:, 2 * H:3 * H]), jax.nn.sigmoid(g[:, 3 * H:])
        c1 = f1 * c1 + i1 * gg
        h1 = o1 * jnp.tanh(c1)

        g = h1 @ params["wih1T"] + h2 @ params["whh1T"] + params["b1"]
        i2, f2 = jax.nn.sigmoid(g[:, :H]), jax.nn.sigmoid(g[:, H:2 * H])
        gg, o2 = jnp.tanh(g[:, 2 * H:3 * H]), jax.nn.sigmoid(g[:, 3 * H:])
        c2 = f2 * c2 + i2 * gg
        h2 = o2 * jnp.tanh(c2)

        prev = h2 @ params["wlT"] + params["bl"]
        outs.append(prev[:, None, :])
    out = jnp.concatenate(outs, axis=1)
    return jax.nn.log_softmax(out, axis=2), target_


# --------------------------------- main ---------------------------------------
if __name__ == "__main__":
    key = jax.random.PRNGKey(0)
    kp, kc, kt, kh = jax.random.split(key, 4)

    params = init_params(kp)
    context = jax.random.normal(kc, (BATCH, SRC_LEN, 2 * HIDDEN), jnp.float32)
    target_ = jax.random.randint(kt, (BATCH, MAX_TGT), 0, VOCAB, dtype=jnp.int32)
    hk = jax.random.split(kh, 4)
    init_states = tuple(
        jax.random.uniform(hk[i], (BATCH, HIDDEN), jnp.float32) for i in range(4)
    )

    fwd = jax.jit(decoder_forward)
    final_out, tgt = fwd(context, target_, params, init_states)
    final_out = jax.block_until_ready(final_out)

    assert final_out.shape == (BATCH, MAX_TGT, VOCAB)
    assert bool(jnp.all(jnp.isfinite(final_out)))

    ref_out, _ = decoder_reference(context, target_, params, init_states)
    np.testing.assert_allclose(np.asarray(final_out), np.asarray(ref_out),
                               rtol=1e-2, atol=1e-2)

    print("KERNEL_OK")
</pallas_src>

<mosaic_0001>
module attributes {stable_mosaic.version = 11 : i64} {
  func.func @decoder_kernel(%arg0: memref<2x8x64xf32, #tpu.memory_space<vmem>>, %arg1: memref<2x8x32xf32, #tpu.memory_space<vmem>>, %arg2: memref<3x32xf32, #tpu.memory_space<vmem>>, %arg3: memref<2x32xf32, #tpu.memory_space<vmem>>, %arg4: memref<32x128xf32, #tpu.memory_space<vmem>>, %arg5: memref<64x128xf32, #tpu.memory_space<vmem>>, %arg6: memref<32x128xf32, #tpu.memory_space<vmem>>, %arg7: memref<1x128xf32, #tpu.memory_space<vmem>>, %arg8: memref<32x128xf32, #tpu.memory_space<vmem>>, %arg9: memref<32x128xf32, #tpu.memory_space<vmem>>, %arg10: memref<1x128xf32, #tpu.memory_space<vmem>>, %arg11: memref<32x3xf32, #tpu.memory_space<vmem>>, %arg12: memref<1x3xf32, #tpu.memory_space<vmem>>, %arg13: memref<2x32xf32, #tpu.memory_space<vmem>>, %arg14: memref<2x32xf32, #tpu.memory_space<vmem>>, %arg15: memref<2x32xf32, #tpu.memory_space<vmem>>, %arg16: memref<2x32xf32, #tpu.memory_space<vmem>>, %arg17: memref<8x2x3xf32, #tpu.memory_space<vmem>>) attributes {dimension_semantics = [], scalar_prefetch = 0 : i64, scratch_operands = 0 : i64, tpu.core_type = #tpu.core_type<tc>} {
    %c0 = arith.constant 0 : index
    %c0_0 = arith.constant 0 : index
    %c0_1 = arith.constant 0 : index
    %0 = vector.load %arg0[%c0, %c0_0, %c0_1] : memref<2x8x64xf32, #tpu.memory_space<vmem>>, vector<2x8x64xf32>
    %c0_2 = arith.constant 0 : index
    %c0_3 = arith.constant 0 : index
    %c0_4 = arith.constant 0 : index
    %1 = vector.load %arg1[%c0_2, %c0_3, %c0_4] : memref<2x8x32xf32, #tpu.memory_space<vmem>>, vector<2x8x32xf32>
    %c0_5 = arith.constant 0 : index
    %c0_6 = arith.constant 0 : index
    %2 = vector.load %arg2[%c0_5, %c0_6] : memref<3x32xf32, #tpu.memory_space<vmem>>, vector<3x32xf32>
    %c0_7 = arith.constant 0 : index
    %c0_8 = arith.constant 0 : index
    %3 = vector.load %arg4[%c0_7, %c0_8] : memref<32x128xf32, #tpu.memory_space<vmem>>, vector<32x128xf32>
    %c0_9 = arith.constant 0 : index
    %c0_10 = arith.constant 0 : index
    %4 = vector.load %arg5[%c0_9, %c0_10] : memref<64x128xf32, #tpu.memory_space<vmem>>, vector<64x128xf32>
    %c0_11 = arith.constant 0 : index
    %c0_12 = arith.constant 0 : index
    %5 = vector.load %arg6[%c0_11, %c0_12] : memref<32x128xf32, #tpu.memory_space<vmem>>, vector<32x128xf32>
    %c0_13 = arith.constant 0 : index
    %c0_14 = arith.constant 0 : index
    %6 = vector.load %arg7[%c0_13, %c0_14] : memref<1x128xf32, #tpu.memory_space<vmem>>, vector<1x128xf32>
    %c0_15 = arith.constant 0 : index
    %c0_16 = arith.constant 0 : index
    %7 = vector.load %arg8[%c0_15, %c0_16] : memref<32x128xf32, #tpu.memory_space<vmem>>, vector<32x128xf32>
    %c0_17 = arith.constant 0 : index
    %c0_18 = arith.constant 0 : index
    %8 = vector.load %arg9[%c0_17, %c0_18] : memref<32x128xf32, #tpu.memory_space<vmem>>, vector<32x128xf32>
    %c0_19 = arith.constant 0 : index
    %c0_20 = arith.constant 0 : index
    %9 = vector.load %arg10[%c0_19, %c0_20] : memref<1x128xf32, #tpu.memory_space<vmem>>, vector<1x128xf32>
    %c0_21 = arith.constant 0 : index
    %c0_22 = arith.constant 0 : index
    %10 = vector.load %arg11[%c0_21, %c0_22] : memref<32x3xf32, #tpu.memory_space<vmem>>, vector<32x3xf32>
    %c0_23 = arith.constant 0 : index
    %c0_24 = arith.constant 0 : index
    %11 = vector.load %arg12[%c0_23, %c0_24] : memref<1x3xf32, #tpu.memory_space<vmem>>, vector<1x3xf32>
    %c0_25 = arith.constant 0 : index
    %c0_26 = arith.constant 0 : index
    %12 = vector.load %arg3[%c0_25, %c0_26] : memref<2x32xf32, #tpu.memory_space<vmem>>, vector<2x32xf32>
    %c0_27 = arith.constant 0 : index
    %c0_28 = arith.constant 0 : index
    %13 = vector.load %arg13[%c0_27, %c0_28] : memref<2x32xf32, #tpu.memory_space<vmem>>, vector<2x32xf32>
    %c0_29 = arith.constant 0 : index
    %c0_30 = arith.constant 0 : index
    %14 = vector.load %arg14[%c0_29, %c0_30] : memref<2x32xf32, #tpu.memory_space<vmem>>, vector<2x32xf32>
    %c0_31 = arith.constant 0 : index
    %c0_32 = arith.constant 0 : index
    %15 = vector.load %arg15[%c0_31, %c0_32] : memref<2x32xf32, #tpu.memory_space<vmem>>, vector<2x32xf32>
    %c0_33 = arith.constant 0 : index
    %c0_34 = arith.constant 0 : index
    %16 = vector.load %arg16[%c0_33, %c0_34] : memref<2x32xf32, #tpu.memory_space<vmem>>, vector<2x32xf32>
    %17 = vector.shape_cast %15 : vector<2x32xf32> to vector<2x1x32xf32>
    %18 = vector.broadcast %17 : vector<2x1x32xf32> to vector<2x8x32xf32>
    %19 = arith.mulf %1, %18 : vector<2x8x32xf32>
    %cst = arith.constant dense<0.000000e+00> : vector<2x8xf32>
    %20 = vector.multi_reduction <add>, %19, %cst [2] : vector<2x8x32xf32> to vector<2x8xf32>
    %cst_35 = arith.constant dense<0xFF800000> : vector<2xf32>
    %21 = vector.multi_reduction <maximumf>, %20, %cst_35 [1] : vector<2x8xf32> to vector<2xf32>
    %22 = vector.shape_cast %21 : vector<2xf32> to vector<2x1xf32>
    %23 = vector.broadcast %22 : vector<2x1xf32> to vector<2x8xf32>
    %24 = arith.subf %20, %23 : vector<2x8xf32>
    %25 = math.exp %24 : vector<2x8xf32>
    %cst_36 = arith.constant dense<0.000000e+00> : vector<2xf32>
    %26 = vector.multi_reduction <add>, %25, %cst_36 [1] : vector<2x8xf32> to vector<2xf32>
    %27 = vector.shape_cast %26 : vector<2xf32> to vector<2x1xf32>
    %28 = vector.broadcast %27 : vector<2x1xf32> to vector<2x8xf32>
    %29 = arith.divf %25, %28 : vector<2x8xf32>
    %30 = vector.shape_cast %29 : vector<2x8xf32> to vector<2x8x1xf32>
    %31 = vector.broadcast %30 : vector<2x8x1xf32> to vector<2x8x64xf32>
    %32 = arith.mulf %31, %0 : vector<2x8x64xf32>
    %cst_37 = arith.constant dense<0.000000e+00> : vector<2x64xf32>
    %33 = vector.multi_reduction <add>, %32, %cst_37 [1] : vector<2x8x64xf32> to vector<2x64xf32>
    %cst_38 = arith.constant dense<0.000000e+00> : vector<2x128xf32>
    %34 = tpu.matmul %12, %3, %cst_38 {dimension_numbers = #tpu.dot_dimension_numbers<[1], [0], [0], [1], [0, 0, 1, 1], [], []>} : vector<2x32xf32>, vector<32x128xf32>, vector<2x128xf32> -> vector<2x128xf32>
    %cst_39 = arith.constant dense<0.000000e+00> : vector<2x128xf32>
    %35 = tpu.matmul %33, %4, %cst_39 {dimension_numbers = #tpu.dot_dimension_numbers<[1], [0], [0], [1], [0, 0, 1, 1], [], []>} : vector<2x64xf32>, vector<64x128xf32>, vector<2x128xf32> -> vector<2x128xf32>
    %36 = arith.addf %34, %35 : vector<2x128xf32>
    %cst_40 = arith.constant dense<0.000000e+00> : vector<2x128xf32>
    %37 = tpu.matmul %13, %5, %cst_40 {dimension_numbers = #tpu.dot_dimension_numbers<[1], [0], [0], [1], [0, 0, 1, 1], [], []>} : vector<2x32xf32>, vector<32x128xf32>, vector<2x128xf32> -> vector<2x128xf32>
    %38 = arith.addf %36, %37 : vector<2x128xf32>
    %39 = vector.broadcast %6 : vector<1x128xf32> to vector<2x128xf32>
    %40 = arith.addf %38, %39 : vector<2x128xf32>
    %41 = vector.extract_strided_slice %40 {offsets = [0, 0], sizes = [2, 32], strides = [1, 1]} : vector<2x128xf32> to vector<2x32xf32>
    %42 = arith.negf %41 : vector<2x32xf32>
    %43 = math.exp %42 : vector<2x32xf32>
    %cst_41 = arith.constant 1.000000e+00 : f32
    %44 = vector.broadcast %cst_41 : f32 to vector<2x32xf32>
    %45 = arith.addf %44, %43 : vector<2x32xf32>
    %46 = arith.divf %44, %45 : vector<2x32xf32>
    %47 = vector.extract_strided_slice %40 {offsets = [0, 32], sizes = [2, 32], strides = [1, 1]} : vector<2x128xf32> to vector<2x32xf32>
    %48 = arith.negf %47 : vector<2x32xf32>
    %49 = math.exp %48 : vector<2x32xf32>
    %cst_42 = arith.constant 1.000000e+00 : f32
    %50 = vector.broadcast %cst_42 : f32 to vector<2x32xf32>
    %51 = arith.addf %50, %49 : vector<2x32xf32>
    %52 = arith.divf %50, %51 : vector<2x32xf32>
    %53 = vector.extract_strided_slice %40 {offsets = [0, 64], sizes = [2, 32], strides = [1, 1]} : vector<2x128xf32> to vector<2x32xf32>
    %54 = math.tanh %53 : vector<2x32xf32>
    %55 = vector.extract_strided_slice %40 {offsets = [0, 96], sizes = [2, 32], strides = [1, 1]} : vector<2x128xf32> to vector<2x32xf32>
    %56 = arith.negf %55 : vector<2x32xf32>
    %57 = math.exp %56 : vector<2x32xf32>
    %cst_43 = arith.constant 1.000000e+00 : f32
    %58 = vector.broadcast %cst_43 : f32 to vector<2x32xf32>
    %59 = arith.addf %58, %57 : vector<2x32xf32>
    %60 = arith.divf %58, %59 : vector<2x32xf32>
    %61 = arith.mulf %52, %14 : vector<2x32xf32>
    %62 = arith.mulf %46, %54 : vector<2x32xf32>
    %63 = arith.addf %61, %62 : vector<2x32xf32>
    %64 = math.tanh %63 : vector<2x32xf32>
    %65 = arith.mulf %60, %64 : vector<2x32xf32>
    %cst_44 = arith.constant dense<0.000000e+00> : vector<2x128xf32>
    %66 = tpu.matmul %65, %7, %cst_44 {dimension_numbers = #tpu.dot_dimension_numbers<[1], [0], [0], [1], [0, 0, 1, 1], [], []>} : vector<2x32xf32>, vector<32x128xf32>, vector<2x128xf32> -> vector<2x128xf32>
    %cst_45 = arith.constant dense<0.000000e+00> : vector<2x128xf32>
    %67 = tpu.matmul %15, %8, %cst_45 {dimension_numbers = #tpu.dot_dimension_numbers<[1], [0], [0], [1], [0, 0, 1, 1], [], []>} : vector<2x32xf32>, vector<32x128xf32>, vector<2x128xf32> -> vector<2x128xf32>
    %68 = arith.addf %66, %67 : vector<2x128xf32>
    %69 = vector.broadcast %9 : vector<1x128xf32> to vector<2x128xf32>
    %70 = arith.addf %68, %69 : vector<2x128xf32>
    %71 = vector.extract_strided_slice %70 {offsets = [0, 0], sizes = [2, 32], strides = [1, 1]} : vector<2x128xf32> to vector<2x32xf32>
    %72 = arith.negf %71 : vector<2x32xf32>
    %73 = math.exp %72 : vector<2x32xf32>
    %cst_46 = arith.constant 1.000000e+00 : f32
    %74 = vector.broadcast %cst_46 : f32 to vector<2x32xf32>
    %75 = arith.addf %74, %73 : vector<2x32xf32>
    %76 = arith.divf %74, %75 : vector<2x32xf32>
    %77 = vector.extract_strided_slice %70 {offsets = [0, 32], sizes = [2, 32], strides = [1, 1]} : vector<2x128xf32> to vector<2x32xf32>
    %78 = arith.negf %77 : vector<2x32xf32>
    %79 = math.exp %78 : vector<2x32xf32>
    %cst_47 = arith.constant 1.000000e+00 : f32
    %80 = vector.broadcast %cst_47 : f32 to vector<2x32xf32>
    %81 = arith.addf %80, %79 : vector<2x32xf32>
    %82 = arith.divf %80, %81 : vector<2x32xf32>
    %83 = vector.extract_strided_slice %70 {offsets = [0, 64], sizes = [2, 32], strides = [1, 1]} : vector<2x128xf32> to vector<2x32xf32>
    %84 = math.tanh %83 : vector<2x32xf32>
    %85 = vector.extract_strided_slice %70 {offsets = [0, 96], sizes = [2, 32], strides = [1, 1]} : vector<2x128xf32> to vector<2x32xf32>
    %86 = arith.negf %85 : vector<2x32xf32>
    %87 = math.exp %86 : vector<2x32xf32>
    %cst_48 = arith.constant 1.000000e+00 : f32
    %88 = vector.broadcast %cst_48 : f32 to vector<2x32xf32>
    %89 = arith.addf %88, %87 : vector<2x32xf32>
    %90 = arith.divf %88, %89 : vector<2x32xf32>
    %91 = arith.mulf %82, %16 : vector<2x32xf32>
    %92 = arith.mulf %76, %84 : vector<2x32xf32>
    %93 = arith.addf %91, %92 : vector<2x32xf32>
    %94 = math.tanh %93 : vector<2x32xf32>
    %95 = arith.mulf %90, %94 : vector<2x32xf32>
    %cst_49 = arith.constant dense<0.000000e+00> : vector<2x3xf32>
    %96 = tpu.matmul %95, %10, %cst_49 {dimension_numbers = #tpu.dot_dimension_numbers<[1], [0], [0], [1], [0, 0, 1, 1], [], []>} : vector<2x32xf32>, vector<32x3xf32>, vector<2x3xf32> -> vector<2x3xf32>
    %97 = vector.broadcast %11 : vector<1x3xf32> to vector<2x3xf32>
    %98 = arith.addf %96, %97 : vector<2x3xf32>
    %cst_50 = arith.constant dense<0xFF800000> : vector<2xf32>
    %99 = vector.multi_reduction <maximumf>, %98, %cst_50 [1] : vector<2x3xf32> to vector<2xf32>
    %100 = vector.shape_cast %99 : vector<2xf32> to vector<2x1xf32>
    %101 = vector.broadcast %100 : vector<2x1xf32> to vector<2x3xf32>
    %102 = arith.subf %98, %101 : vector<2x3xf32>
    %103 = math.exp %102 : vector<2x3xf32>
    %cst_51 = arith.constant dense<0.000000e+00> : vector<2xf32>
    %104 = vector.multi_reduction <add>, %103, %cst_51 [1] : vector<2x3xf32> to vector<2xf32>
    %105 = vector.shape_cast %104 : vector<2xf32> to vector<2x1xf32>
    %106 = math.log %105 : vector<2x1xf32>
    %107 = arith.addf %106, %100 : vector<2x1xf32>
    %108 = vector.broadcast %107 : vector<2x1xf32> to vector<2x3xf32>
    %109 = arith.subf %98, %108 : vector<2x3xf32>
    %c0_52 = arith.constant 0 : index
    %c0_53 = arith.constant 0 : index
    %c0_54 = arith.constant 0 : index
    %110 = vector.load %arg17[%c0_52, %c0_53, %c0_54] : memref<8x2x3xf32, #tpu.memory_space<vmem>>, vector<1x2x3xf32>
    %111 = vector.shape_cast %110 : vector<1x2x3xf32> to vector<2x3xf32>
    %112 = vector.shape_cast %109 : vector<2x3xf32> to vector<1x2x3xf32>
    tpu.vector_store %arg17[%c0_52, %c0_53, %c0_54], %112 {strides = array<i32>} : memref<8x2x3xf32, #tpu.memory_space<vmem>>, vector<1x2x3xf32>,
    %113 = tpu.iota {dimensions = array<i32: 1>} : vector<2x3xi32>
    %cst_55 = arith.constant dense<0xFF800000> : vector<2xf32>
    %114 = vector.multi_reduction <maximumf>, %98, %cst_55 [1] : vector<2x3xf32> to vector<2xf32>
    %115 = vector.shape_cast %114 : vector<2xf32> to vector<2x1xf32>
    %116 = vector.broadcast %115 : vector<2x1xf32> to vector<2x3xf32>
    %117 = arith.cmpf oeq, %98, %116 : vector<2x3xf32>
    %c3_i32 = arith.constant 3 : i32
    %118 = vector.broadcast %c3_i32 : i32 to vector<2x3xi32>
    %119 = arith.select %117, %113, %118 : vector<2x3xi1>, vector<2x3xi32>
    %cst_56 = arith.constant dense<2147483647> : vector<2xi32>
    %120 = vector.multi_reduction <minsi>, %119, %cst_56 [1] : vector<2x3xi32> to vector<2xi32>
    %121 = vector.shape_cast %120 : vector<2xi32> to vector<2x1xi32>
    %122 = vector.extract_strided_slice %2 {offsets = [2, 0], sizes = [1, 32], strides = [1, 1]} : vector<3x32xf32> to vector<1x32xf32>
    %123 = vector.shape_cast %122 : vector<1x32xf32> to vector<32xf32>
    %124 = vector.shape_cast %123 : vector<32xf32> to vector<1x32xf32>
    %c1_i32 = arith.constant 1 : i32
    %125 = vector.broadcast %c1_i32 : i32 to vector<2x1xi32>
    %126 = arith.cmpi eq, %121, %125 : vector<2x1xi32>
    %127 = vector.extract_strided_slice %2 {offsets = [1, 0], sizes = [1, 32], strides = [1, 1]} : vector<3x32xf32> to vector<1x32xf32>
    %128 = vector.shape_cast %127 : vector<1x32xf32> to vector<32xf32>
    %129 = vector.shape_cast %128 : vector<32xf32> to vector<1x32xf32>
    %130 = vector.shape_cast %126 : vector<2x1xi1> to vector<2x1xi1>
    %131 = vector.broadcast %130 : vector<2x1xi1> to vector<2x32xi1>
    %132 = vector.shape_cast %129 : vector<1x32xf32> to vector<1x32xf32>
    %133 = vector.broadcast %132 : vector<1x32xf32> to vector<2x32xf32>
    %134 = vector.shape_cast %124 : vector<1x32xf32> to vector<1x32xf32>
    %135 = vector.broadcast %134 : vector<1x32xf32> to vector<2x32xf32>
    %136 = arith.select %131, %133, %135 : vector<2x32xi1>, vector<2x32xf32>
    %c0_i32 = arith.constant 0 : i32
    %137 = vector.broadcast %c0_i32 : i32 to vector<2x1xi32>
    %138 = arith.cmpi eq, %121, %137 : vector<2x1xi32>
    %139 = vector.extract_strided_slice %2 {offsets = [0, 0], sizes = [1, 32], strides = [1, 1]} : vector<3x32xf32> to vector<1x32xf32>
    %140 = vector.shape_cast %139 : vector<1x32xf32> to vector<32xf32>
    %141 = vector.shape_cast %140 : vector<32xf32> to vector<1x32xf32>
    %142 = vector.shape_cast %138 : vector<2x1xi1> to vector<2x1xi1>
    %143 = vector.broadcast %142 : vector<2x1xi1> to vector<2x32xi1>
    %144 = vector.shape_cast %141 : vector<1x32xf32> to vector<1x32xf32>
    %145 = vector.broadcast %144 : vector<1x32xf32> to vector<2x32xf32>
    %146 = arith.select %143, %145, %136 : vector<2x32xi1>, vector<2x32xf32>
    %147 = vector.shape_cast %95 : vector<2x32xf32> to vector<2x1x32xf32>
    %148 = vector.broadcast %147 : vector<2x1x32xf32> to vector<2x8x32xf32>
    %149 = arith.mulf %1, %148 : vector<2x8x32xf32>
    %cst_57 = arith.constant dense<0.000000e+00> : vector<2x8xf32>
    %150 = vector.multi_reduction <add>, %149, %cst_57 [2] : vector<2x8x32xf32> to vector<2x8xf32>
    %cst_58 = arith.constant dense<0xFF800000> : vector<2xf32>
    %151 = vector.multi_reduction <maximumf>, %150, %cst_58 [1] : vector<2x8xf32> to vector<2xf32>
    %152 = vector.shape_cast %151 : vector<2xf32> to vector<2x1xf32>
    %153 = vector.broadcast %152 : vector<2x1xf32> to vector<2x8xf32>
    %154 = arith.subf %150, %153 : vector<2x8xf32>
    %155 = math.exp %154 : vector<2x8xf32>
    %cst_59 = arith.constant dense<0.000000e+00> : vector<2xf32>
    %156 = vector.multi_reduction <add>, %155, %cst_59 [1] : vector<2x8xf32> to vector<2xf32>
    %157 = vector.shape_cast %156 : vector<2xf32> to vector<2x1xf32>
    %158 = vector.broadcast %157 : vector<2x1xf32> to vector<2x8xf32>
    %159 = arith.divf %155, %158 : vector<2x8xf32>
    %160 = vector.shape_cast %159 : vector<2x8xf32> to vector<2x8x1xf32>
    %161 = vector.broadcast %160 : vector<2x8x1xf32> to vector<2x8x64xf32>
    %162 = arith.mulf %161, %0 : vector<2x8x64xf32>
    %cst_60 = arith.constant dense<0.000000e+00> : vector<2x64xf32>
    %163 = vector.multi_reduction <add>, %162, %cst_60 [1] : vector<2x8x64xf32> to vector<2x64xf32>
    %cst_61 = arith.constant dense<0.000000e+00> : vector<2x128xf32>
    %164 = tpu.matmul %146, %3, %cst_61 {dimension_numbers = #tpu.dot_dimension_numbers<[1], [0], [0], [1], [0, 0, 1, 1], [], []>} : vector<2x32xf32>, vector<32x128xf32>, vector<2x128xf32> -> vector<2x128xf32>
    %cst_62 = arith.constant dense<0.000000e+00> : vector<2x128xf32>
    %165 = tpu.matmul %163, %4, %cst_62 {dimension_numbers = #tpu.dot_dimension_numbers<[1], [0], [0], [1], [0, 0, 1, 1], [], []>} : vector<2x64xf32>, vector<64x128xf32>, vector<2x128xf32> -> vector<2x128xf32>
    %166 = arith.addf %164, %165 : vector<2x128xf32>
    %cst_63 = arith.constant dense<0.000000e+00> : vector<2x128xf32>
    %167 = tpu.matmul %65, %5, %cst_63 {dimension_numbers = #tpu.dot_dimension_numbers<[1], [0], [0], [1], [0, 0, 1, 1], [], []>} : vector<2x32xf32>, vector<32x128xf32>, vector<2x128xf32> -> vector<2x128xf32>
    %168 = arith.addf %166, %167 : vector<2x128xf32>
    %169 = vector.broadcast %6 : vector<1x128xf32> to vector<2x128xf32>
    %170 = arith.addf %168, %169 : vector<2x128xf32>
    %171 = vector.extract_strided_slice %170 {offsets = [0, 0], sizes = [2, 32], strides = [1, 1]} : vector<2x128xf32> to vector<2x32xf32>
    %172 = arith.negf %171 : vector<2x32xf32>
    %173 = math.exp %172 : vector<2x32xf32>
    %cst_64 = arith.constant 1.000000e+00 : f32
    %174 = vector.broadcast %cst_64 : f32 to vector<2x32xf32>
    %175 = arith.addf %174, %173 : vector<2x32xf32>
    %176 = arith.divf %174, %175 : vector<2x32xf32>
    %177 = vector.extract_strided_slice %170 {offsets = [0, 32], sizes = [2, 32], strides = [1, 1]} : vector<2x128xf32> to vector<2x32xf32>
    %178 = arith.negf %177 : vector<2x32xf32>
    %179 = math.exp %178 : vector<2x32xf32>
    %cst_65 = arith.constant 1.000000e+00 : f32
    %180 = vector.broadcast %cst_65 : f32 to vector<2x32xf32>
    %181 = arith.addf %180, %179 : vector<2x32xf32>
    %182 = arith.divf %180, %181 : vector<2x32xf32>
    %183 = vector.extract_strided_slice %170 {offsets = [0, 64], sizes = [2, 32], strides = [1, 1]} : vector<2x128xf32> to vector<2x32xf32>
    %184 = math.tanh %183 : vector<2x32xf32>
    %185 = vector.extract_strided_slice %170 {offsets = [0, 96], sizes = [2, 32], strides = [1, 1]} : vector<2x128xf32> to vector<2x32xf32>
    %186 = arith.negf %185 : vector<2x32xf32>
    %187 = math.exp %186 : vector<2x32xf32>
    %cst_66 = arith.constant 1.000000e+00 : f32
    %188 = vector.broadcast %cst_66 : f32 to vector<2x32xf32>
    %189 = arith.addf %188, %187 : vector<2x32xf32>
    %190 = arith.divf %188, %189 : vector<2x32xf32>
    %191 = arith.mulf %182, %63 : vector<2x32xf32>
    %192 = arith.mulf %176, %184 : vector<2x32xf32>
    %193 = arith.addf %191, %192 : vector<2x32xf32>
    %194 = math.tanh %193 : vector<2x32xf32>
    %195 = arith.mulf %190, %194 : vector<2x32xf32>
    %cst_67 = arith.constant dense<0.000000e+00> : vector<2x128xf32>
    %196 = tpu.matmul %195, %7, %cst_67 {dimension_numbers = #tpu.dot_dimension_numbers<[1], [0], [0], [1], [0, 0, 1, 1], [], []>} : vector<2x32xf32>, vector<32x128xf32>, vector<2x128xf32> -> vector<2x128xf32>
    %cst_68 = arith.constant dense<0.000000e+00> : vector<2x128xf32>
    %197 = tpu.matmul %95, %8, %cst_68 {dimension_numbers = #tpu.dot_dimension_numbers<[1], [0], [0], [1], [0, 0, 1, 1], [], []>} : vector<2x32xf32>, vector<32x128xf32>, vector<2x128xf32> -> vector<2x128xf32>
    %198 = arith.addf %196, %197 : vector<2x128xf32>
    %199 = vector.broadcast %9 : vector<1x128xf32> to vector<2x128xf32>
    %200 = arith.addf %198, %199 : vector<2x128xf32>
    %201 = vector.extract_strided_slice %200 {offsets = [0, 0], sizes = [2, 32], strides = [1, 1]} : vector<2x128xf32> to vector<2x32xf32>
    %202 = arith.negf %201 : vector<2x32xf32>
    %203 = math.exp %202 : vector<2x32xf32>
    %cst_69 = arith.constant 1.000000e+00 : f32
    %204 = vector.broadcast %cst_69 : f32 to vector<2x32xf32>
    %205 = arith.addf %204, %203 : vector<2x32xf32>
    %206 = arith.divf %204, %205 : vector<2x32xf32>
    %207 = vector.extract_strided_slice %200 {offsets = [0, 32], sizes = [2, 32], strides = [1, 1]} : vector<2x128xf32> to vector<2x32xf32>
    %208 = arith.negf %207 : vector<2x32xf32>
    %209 = math.exp %208 : vector<2x32xf32>
    %cst_70 = arith.constant 1.000000e+00 : f32
    %210 = vector.broadcast %cst_70 : f32 to vector<2x32xf32>
    %211 = arith.addf %210, %209 : vector<2x32xf32>
    %212 = arith.divf %210, %211 : vector<2x32xf32>
    %213 = vector.extract_strided_slice %200 {offsets = [0, 64], sizes = [2, 32], strides = [1, 1]} : vector<2x128xf32> to vector<2x32xf32>
    %214 = math.tanh %213 : vector<2x32xf32>
    %215 = vector.extract_strided_slice %200 {offsets = [0, 96], sizes = [2, 32], strides = [1, 1]} : vector<2x128xf32> to vector<2x32xf32>
    %216 = arith.negf %215 : vector<2x32xf32>
    %217 = math.exp %216 : vector<2x32xf32>
    %cst_71 = arith.constant 1.000000e+00 : f32
    %218 = vector.broadcast %cst_71 : f32 to vector<2x32xf32>
    %219 = arith.addf %218, %217 : vector<2x32xf32>
    %220 = arith.divf %218, %219 : vector<2x32xf32>
    %221 = arith.mulf %212, %93 : vector<2x32xf32>
    %222 = arith.mulf %206, %214 : vector<2x32xf32>
    %223 = arith.addf %221, %222 : vector<2x32xf32>
    %224 = math.tanh %223 : vector<2x32xf32>
    %225 = arith.mulf %220, %224 : vector<2x32xf32>
    %cst_72 = arith.constant dense<0.000000e+00> : vector<2x3xf32>
    %226 = tpu.matmul %225, %10, %cst_72 {dimension_numbers = #tpu.dot_dimension_numbers<[1], [0], [0], [1], [0, 0, 1, 1], [], []>} : vector<2x32xf32>, vector<32x3xf32>, vector<2x3xf32> -> vector<2x3xf32>
    %227 = vector.broadcast %11 : vector<1x3xf32> to vector<2x3xf32>
    %228 = arith.addf %226, %227 : vector<2x3xf32>
    %cst_73 = arith.constant dense<0xFF800000> : vector<2xf32>
    %229 = vector.multi_reduction <maximumf>, %228, %cst_73 [1] : vector<2x3xf32> to vector<2xf32>
    %230 = vector.shape_cast %229 : vector<2xf32> to vector<2x1xf32>
    %231 = vector.broadcast %230 : vector<2x1xf32> to vector<2x3xf32>
    %232 = arith.subf %228, %231 : vector<2x3xf32>
    %233 = math.exp %232 : vector<2x3xf32>
    %cst_74 = arith.constant dense<0.000000e+00> : vector<2xf32>
    %234 = vector.multi_reduction <add>, %233, %cst_74 [1] : vector<2x3xf32> to vector<2xf32>
    %235 = vector.shape_cast %234 : vector<2xf32> to vector<2x1xf32>
    %236 = math.log %235 : vector<2x1xf32>
    %237 = arith.addf %236, %230 : vector<2x1xf32>
    %238 = vector.broadcast %237 : vector<2x1xf32> to vector<2x3xf32>
    %239 = arith.subf %228, %238 : vector<2x3xf32>
    %c1 = arith.constant 1 : index
    %c0_75 = arith.constant 0 : index
    %c0_76 = arith.constant 0 : index
    %240 = vector.load %arg17[%c1, %c0_75, %c0_76] : memref<8x2x3xf32, #tpu.memory_space<vmem>>, vector<1x2x3xf32>
    %241 = vector.shape_cast %240 : vector<1x2x3xf32> to vector<2x3xf32>
    %242 = vector.shape_cast %239 : vector<2x3xf32> to vector<1x2x3xf32>
    tpu.vector_store %arg17[%c1, %c0_75, %c0_76], %242 {strides = array<i32>} : memref<8x2x3xf32, #tpu.memory_space<vmem>>, vector<1x2x3xf32>,
    %243 = tpu.iota {dimensions = array<i32: 1>} : vector<2x3xi32>
    %cst_77 = arith.constant dense<0xFF800000> : vector<2xf32>
    %244 = vector.multi_reduction <maximumf>, %228, %cst_77 [1] : vector<2x3xf32> to vector<2xf32>
    %245 = vector.shape_cast %244 : vector<2xf32> to vector<2x1xf32>
    %246 = vector.broadcast %245 : vector<2x1xf32> to vector<2x3xf32>
    %247 = arith.cmpf oeq, %228, %246 : vector<2x3xf32>
    %c3_i32_78 = arith.constant 3 : i32
    %248 = vector.broadcast %c3_i32_78 : i32 to vector<2x3xi32>
    %249 = arith.select %247, %243, %248 : vector<2x3xi1>, vector<2x3xi32>
    %cst_79 = arith.constant dense<2147483647> : vector<2xi32>
    %250 = vector.multi_reduction <minsi>, %249, %cst_79 [1] : vector<2x3xi32> to vector<2xi32>
    %251 = vector.shape_cast %250 : vector<2xi32> to vector<2x1xi32>
    %252 = vector.extract_strided_slice %2 {offsets = [2, 0], sizes = [1, 32], strides = [1, 1]} : vector<3x32xf32> to vector<1x32xf32>
    %253 = vector.shape_cast %252 : vector<1x32xf32> to vector<32xf32>
    %254 = vector.shape_cast %253 : vector<32xf32> to vector<1x32xf32>
    %c1_i32_80 = arith.constant 1 : i32
    %255 = vector.broadcast %c1_i32_80 : i32 to vector<2x1xi32>
    %256 = arith.cmpi eq, %251, %255 : vector<2x1xi32>
    %257 = vector.extract_strided_slice %2 {offsets = [1, 0], sizes = [1, 32], strides = [1, 1]} : vector<3x32xf32> to vector<1x32xf32>
    %258 = vector.shape_cast %257 : vector<1x32xf32> to vector<32xf32>
    %259 = vector.shape_cast %258 : vector<32xf32> to vector<1x32xf32>
    %260 = vector.shape_cast %256 : vector<2x1xi1> to vector<2x1xi1>
    %261 = vector.broadcast %260 : vector<2x1xi1> to vector<2x32xi1>
    %262 = vector.shape_cast %259 : vector<1x32xf32> to vector<1x32xf32>
    %263 = vector.broadcast %262 : vector<1x32xf32> to vector<2x32xf32>
    %264 = vector.shape_cast %254 : vector<1x32xf32> to vector<1x32xf32>
    %265 = vector.broadcast %264 : vector<1x32xf32> to vector<2x32xf32>
    %266 = arith.select %261, %263, %265 : vector<2x32xi1>, vector<2x32xf32>
    %c0_i32_81 = arith.constant 0 : i32
    %267 = vector.broadcast %c0_i32_81 : i32 to vector<2x1xi32>
    %268 = arith.cmpi eq, %251, %267 : vector<2x1xi32>
    %269 = vector.extract_strided_slice %2 {offsets = [0, 0], sizes = [1, 32], strides = [1, 1]} : vector<3x32xf32> to vector<1x32xf32>
    %270 = vector.shape_cast %269 : vector<1x32xf32> to vector<32xf32>
    %271 = vector.shape_cast %270 : vector<32xf32> to vector<1x32xf32>
    %272 = vector.shape_cast %268 : vector<2x1xi1> to vector<2x1xi1>
    %273 = vector.broadcast %272 : vector<2x1xi1> to vector<2x32xi1>
    %274 = vector.shape_cast %271 : vector<1x32xf32> to vector<1x32xf32>
    %275 = vector.broadcast %274 : vector<1x32xf32> to vector<2x32xf32>
    %276 = arith.select %273, %275, %266 : vector<2x32xi1>, vector<2x32xf32>
    %277 = vector.shape_cast %225 : vector<2x32xf32> to vector<2x1x32xf32>
    %278 = vector.broadcast %277 : vector<2x1x32xf32> to vector<2x8x32xf32>
    %279 = arith.mulf %1, %278 : vector<2x8x32xf32>
    %cst_82 = arith.constant dense<0.000000e+00> : vector<2x8xf32>
    %280 = vector.multi_reduction <add>, %279, %cst_82 [2] : vector<2x8x32xf32> to vector<2x8xf32>
    %cst_83 = arith.constant dense<0xFF800000> : vector<2xf32>
    %281 = vector.multi_reduction <maximumf>, %280, %cst_83 [1] : vector<2x8xf32> to vector<2xf32>
    %282 = vector.shape_cast %281 : vector<2xf32> to vector<2x1xf32>
    %283 = vector.broadcast %282 : vector<2x1xf32> to vector<2x8xf32>
    %284 = arith.subf %280, %283 : vector<2x8xf32>
    %285 = math.exp %284 : vector<2x8xf32>
    %cst_84 = arith.constant dense<0.000000e+00> : vector<2xf32>
    %286 = vector.multi_reduction <add>, %285, %cst_84 [1] : vector<2x8xf32> to vector<2xf32>
    %287 = vector.shape_cast %286 : vector<2xf32> to vector<2x1xf32>
    %288 = vector.broadcast %287 : vector<2x1xf32> to vector<2x8xf32>
    %289 = arith.divf %285, %288 : vector<2x8xf32>
    %290 = vector.shape_cast %289 : vector<2x8xf32> to vector<2x8x1xf32>
    %291 = vector.broadcast %290 : vector<2x8x1xf32> to vector<2x8x64xf32>
    %292 = arith.mulf %291, %0 : vector<2x8x64xf32>
    %cst_85 = arith.constant dense<0.000000e+00> : vector<2x64xf32>
    %293 = vector.multi_reduction <add>, %292, %cst_85 [1] : vector<2x8x64xf32> to vector<2x64xf32>
    %cst_86 = arith.constant dense<0.000000e+00> : vector<2x128xf32>
    %294 = tpu.matmul %276, %3, %cst_86 {dimension_numbers = #tpu.dot_dimension_numbers<[1], [0], [0], [1], [0, 0, 1, 1], [], []>} : vector<2x32xf32>, vector<32x128xf32>, vector<2x128xf32> -> vector<2x128xf32>
    %cst_87 = arith.constant dense<0.000000e+00> : vector<2x128xf32>
    %295 = tpu.matmul %293, %4, %cst_87 {dimension_numbers = #tpu.dot_dimension_numbers<[1], [0], [0], [1], [0, 0, 1, 1], [], []>} : vector<2x64xf32>, vector<64x128xf32>, vector<2x128xf32> -> vector<2x128xf32>
    %296 = arith.addf %294, %295 : vector<2x128xf32>
    %cst_88 = arith.constant dense<0.000000e+00> : vector<2x128xf32>
    %297 = tpu.matmul %195, %5, %cst_88 {dimension_numbers = #tpu.dot_dimension_numbers<[1], [0], [0], [1], [0, 0, 1, 1], [], []>} : vector<2x32xf32>, vector<32x128xf32>, vector<2x128xf32> -> vector<2x128xf32>
    %298 = arith.addf %296, %297 : vector<2x128xf32>
    %299 = vector.broadcast %6 : vector<1x128xf32> to vector<2x128xf32>
    %300 = arith.addf %298, %299 : vector<2x128xf32>
    %301 = vector.extract_strided_slice %300 {offsets = [0, 0], sizes = [2, 32], strides = [1, 1]} : vector<2x128xf32> to vector<2x32xf32>
    %302 = arith.negf %301 : vector<2x32xf32>
    %303 = math.exp %302 : vector<2x32xf32>
    %cst_89 = arith.constant 1.000000e+00 : f32
    %304 = vector.broadcast %cst_89 : f32 to vector<2x32xf32>
    %305 = arith.addf %304, %303 : vector<2x32xf32>
    %306 = arith.divf %304, %305 : vector<2x32xf32>
    %307 = vector.extract_strided_slice %300 {offsets = [0, 32], sizes = [2, 32], strides = [1, 1]} : vector<2x128xf32> to vector<2x32xf32>
    %308 = arith.negf %307 : vector<2x32xf32>
    %309 = math.exp %308 : vector<2x32xf32>
    %cst_90 = arith.constant 1.000000e+00 : f32
    %310 = vector.broadcast %cst_90 : f32 to vector<2x32xf32>
    %311 = arith.addf %310, %309 : vector<2x32xf32>
    %312 = arith.divf %310, %311 : vector<2x32xf32>
    %313 = vector.extract_strided_slice %300 {offsets = [0, 64], sizes = [2, 32], strides = [1, 1]} : vector<2x128xf32> to vector<2x32xf32>
    %314 = math.tanh %313 : vector<2x32xf32>
    %315 = vector.extract_strided_slice %300 {offsets = [0, 96], sizes = [2, 32], strides = [1, 1]} : vector<2x128xf32> to vector<2x32xf32>
    %316 = arith.negf %315 : vector<2x32xf32>
    %317 = math.exp %316 : vector<2x32xf32>
    %cst_91 = arith.constant 1.000000e+00 : f32
    %318 = vector.broadcast %cst_91 : f32 to vector<2x32xf32>
    %319 = arith.addf %318, %317 : vector<2x32xf32>
    %320 = arith.divf %318, %319 : vector<2x32xf32>
    %321 = arith.mulf %312, %193 : vector<2x32xf32>
    %322 = arith.mulf %306, %314 : vector<2x32xf32>
    %323 = arith.addf %321, %322 : vector<2x32xf32>
    %324 = math.tanh %323 : vector<2x32xf32>
    %325 = arith.mulf %320, %324 : vector<2x32xf32>
    %cst_92 = arith.constant dense<0.000000e+00> : vector<2x128xf32>
    %326 = tpu.matmul %325, %7, %cst_92 {dimension_numbers = #tpu.dot_dimension_numbers<[1], [0], [0], [1], [0, 0, 1, 1], [], []>} : vector<2x32xf32>, vector<32x128xf32>, vector<2x128xf32> -> vector<2x128xf32>
    %cst_93 = arith.constant dense<0.000000e+00> : vector<2x128xf32>
    %327 = tpu.matmul %225, %8, %cst_93 {dimension_numbers = #tpu.dot_dimension_numbers<[1], [0], [0], [1], [0, 0, 1, 1], [], []>} : vector<2x32xf32>, vector<32x128xf32>, vector<2x128xf32> -> vector<2x128xf32>
    %328 = arith.addf %326, %327 : vector<2x128xf32>
    %329 = vector.broadcast %9 : vector<1x128xf32> to vector<2x128xf32>
    %330 = arith.addf %328, %329 : vector<2x128xf32>
    %331 = vector.extract_strided_slice %330 {offsets = [0, 0], sizes = [2, 32], strides = [1, 1]} : vector<2x128xf32> to vector<2x32xf32>
    %332 = arith.negf %331 : vector<2x32xf32>
    %333 = math.exp %332 : vector<2x32xf32>
    %cst_94 = arith.constant 1.000000e+00 : f32
    %334 = vector.broadcast %cst_94 : f32 to vector<2x32xf32>
    %335 = arith.addf %334, %333 : vector<2x32xf32>
    %336 = arith.divf %334, %335 : vector<2x32xf32>
    %337 = vector.extract_strided_slice %330 {offsets = [0, 32], sizes = [2, 32], strides = [1, 1]} : vector<2x128xf32> to vector<2x32xf32>
    %338 = arith.negf %337 : vector<2x32xf32>
    %339 = math.exp %338 : vector<2x32xf32>
    %cst_95 = arith.constant 1.000000e+00 : f32
    %340 = vector.broadcast %cst_95 : f32 to vector<2x32xf32>
    %341 = arith.addf %340, %339 : vector<2x32xf32>
    %342 = arith.divf %340, %341 : vector<2x32xf32>
    %343 = vector.extract_strided_slice %330 {offsets = [0, 64], sizes = [2, 32], strides = [1, 1]} : vector<2x128xf32> to vector<2x32xf32>
    %344 = math.tanh %343 : vector<2x32xf32>
    %345 = vector.extract_strided_slice %330 {offsets = [0, 96], sizes = [2, 32], strides = [1, 1]} : vector<2x128xf32> to vector<2x32xf32>
    %346 = arith.negf %345 : vector<2x32xf32>
    %347 = math.exp %346 : vector<2x32xf32>
    %cst_96 = arith.constant 1.000000e+00 : f32
    %348 = vector.broadcast %cst_96 : f32 to vector<2x32xf32>
    %349 = arith.addf %348, %347 : vector<2x32xf32>
    %350 = arith.divf %348, %349 : vector<2x32xf32>
    %351 = arith.mulf %342, %223 : vector<2x32xf32>
    %352 = arith.mulf %336, %344 : vector<2x32xf32>
    %353 = arith.addf %351, %352 : vector<2x32xf32>
    %354 = math.tanh %353 : vector<2x32xf32>
    %355 = arith.mulf %350, %354 : vector<2x32xf32>
    %cst_97 = arith.constant dense<0.000000e+00> : vector<2x3xf32>
    %356 = tpu.matmul %355, %10, %cst_97 {dimension_numbers = #tpu.dot_dimension_numbers<[1], [0], [0], [1], [0, 0, 1, 1], [], []>} : vector<2x32xf32>, vector<32x3xf32>, vector<2x3xf32> -> vector<2x3xf32>
    %357 = vector.broadcast %11 : vector<1x3xf32> to vector<2x3xf32>
    %358 = arith.addf %356, %357 : vector<2x3xf32>
    %cst_98 = arith.constant dense<0xFF800000> : vector<2xf32>
    %359 = vector.multi_reduction <maximumf>, %358, %cst_98 [1] : vector<2x3xf32> to vector<2xf32>
    %360 = vector.shape_cast %359 : vector<2xf32> to vector<2x1xf32>
    %361 = vector.broadcast %360 : vector<2x1xf32> to vector<2x3xf32>
    %362 = arith.subf %358, %361 : vector<2x3xf32>
    %363 = math.exp %362 : vector<2x3xf32>
    %cst_99 = arith.constant dense<0.000000e+00> : vector<2xf32>
    %364 = vector.multi_reduction <add>, %363, %cst_99 [1] : vector<2x3xf32> to vector<2xf32>
    %365 = vector.shape_cast %364 : vector<2xf32> to vector<2x1xf32>
    %366 = math.log %365 : vector<2x1xf32>
    %367 = arith.addf %366, %360 : vector<2x1xf32>
    %368 = vector.broadcast %367 : vector<2x1xf32> to vector<2x3xf32>
    %369 = arith.subf %358, %368 : vector<2x3xf32>
    %c2 = arith.constant 2 : index
    %c0_100 = arith.constant 0 : index
    %c0_101 = arith.constant 0 : index
    %370 = vector.load %arg17[%c2, %c0_100, %c0_101] : memref<8x2x3xf32, #tpu.memory_space<vmem>>, vector<1x2x3xf32>
    %371 = vector.shape_cast %370 : vector<1x2x3xf32> to vector<2x3xf32>
    %372 = vector.shape_cast %369 : vector<2x3xf32> to vector<1x2x3xf32>
    tpu.vector_store %arg17[%c2, %c0_100, %c0_101], %372 {strides = array<i32>} : memref<8x2x3xf32, #tpu.memory_space<vmem>>, vector<1x2x3xf32>,
    %373 = tpu.iota {dimensions = array<i32: 1>} : vector<2x3xi32>
    %cst_102 = arith.constant dense<0xFF800000> : vector<2xf32>
    %374 = vector.multi_reduction <maximumf>, %358, %cst_102 [1] : vector<2x3xf32> to vector<2xf32>
    %375 = vector.shape_cast %374 : vector<2xf32> to vector<2x1xf32>
    %376 = vector.broadcast %375 : vector<2x1xf32> to vector<2x3xf32>
    %377 = arith.cmpf oeq, %358, %376 : vector<2x3xf32>
    %c3_i32_103 = arith.constant 3 : i32
    %378 = vector.broadcast %c3_i32_103 : i32 to vector<2x3xi32>
    %379 = arith.select %377, %373, %378 : vector<2x3xi1>, vector<2x3xi32>
    %cst_104 = arith.constant dense<2147483647> : vector<2xi32>
    %380 = vector.multi_reduction <minsi>, %379, %cst_104 [1] : vector<2x3xi32> to vector<2xi32>
    %381 = vector.shape_cast %380 : vector<2xi32> to vector<2x1xi32>
    %382 = vector.extract_strided_slice %2 {offsets = [2, 0], sizes = [1, 32], strides = [1, 1]} : vector<3x32xf32> to vector<1x32xf32>
    %383 = vector.shape_cast %382 : vector<1x32xf32> to vector<32xf32>
    %384 = vector.shape_cast %383 : vector<32xf32> to vector<1x32xf32>
    %c1_i32_105 = arith.constant 1 : i32
    %385 = vector.broadcast %c1_i32_105 : i32 to vector<2x1xi32>
    %386 = arith.cmpi eq, %381, %385 : vector<2x1xi32>
    %387 = vector.extract_strided_slice %2 {offsets = [1, 0], sizes = [1, 32], strides = [1, 1]} : vector<3x32xf32> to vector<1x32xf32>
    %388 = vector.shape_cast %387 : vector<1x32xf32> to vector<32xf32>
    %389 = vector.shape_cast %388 : vector<32xf32> to vector<1x32xf32>
    %390 = vector.shape_cast %386 : vector<2x1xi1> to vector<2x1xi1>
    %391 = vector.broadcast %390 : vector<2x1xi1> to vector<2x32xi1>
    %392 = vector.shape_cast %389 : vector<1x32xf32> to vector<1x32xf32>
    %393 = vector.broadcast %392 : vector<1x32xf32> to vector<2x32xf32>
    %394 = vector.shape_cast %384 : vector<1x32xf32> to vector<1x32xf32>
    %395 = vector.broadcast %394 : vector<1x32xf32> to vector<2x32xf32>
    %396 = arith.select %391, %393, %395 : vector<2x32xi1>, vector<2x32xf32>
    %c0_i32_106 = arith.constant 0 : i32
    %397 = vector.broadcast %c0_i32_106 : i32 to vector<2x1xi32>
    %398 = arith.cmpi eq, %381, %397 : vector<2x1xi32>
    %399 = vector.extract_strided_slice %2 {offsets = [0, 0], sizes = [1, 32], strides = [1, 1]} : vector<3x32xf32> to vector<1x32xf32>
    %400 = vector.shape_cast %399 : vector<1x32xf32> to vector<32xf32>
    %401 = vector.shape_cast %400 : vector<32xf32> to vector<1x32xf32>
    %402 = vector.shape_cast %398 : vector<2x1xi1> to vector<2x1xi1>
    %403 = vector.broadcast %402 : vector<2x1xi1> to vector<2x32xi1>
    %404 = vector.shape_cast %401 : vector<1x32xf32> to vector<1x32xf32>
    %405 = vector.broadcast %404 : vector<1x32xf32> to vector<2x32xf32>
    %406 = arith.select %403, %405, %396 : vector<2x32xi1>, vector<2x32xf32>
    %407 = vector.shape_cast %355 : vector<2x32xf32> to vector<2x1x32xf32>
    %408 = vector.broadcast %407 : vector<2x1x32xf32> to vector<2x8x32xf32>
    %409 = arith.mulf %1, %408 : vector<2x8x32xf32>
    %cst_107 = arith.constant dense<0.000000e+00> : vector<2x8xf32>
    %410 = vector.multi_reduction <add>, %409, %cst_107 [2] : vector<2x8x32xf32> to vector<2x8xf32>
    %cst_108 = arith.constant dense<0xFF800000> : vector<2xf32>
    %411 = vector.multi_reduction <maximumf>, %410, %cst_108 [1] : vector<2x8xf32> to vector<2xf32>
    %412 = vector.shape_cast %411 : vector<2xf32> to vector<2x1xf32>
    %413 = vector.broadcast %412 : vector<2x1xf32> to vector<2x8xf32>
    %414 = arith.subf %410, %413 : vector<2x8xf32>
    %415 = math.exp %414 : vector<2x8xf32>
    %cst_109 = arith.constant dense<0.000000e+00> : vector<2xf32>
    %416 = vector.multi_reduction <add>, %415, %cst_109 [1] : vector<2x8xf32> to vector<2xf32>
    %417 = vector.shape_cast %416 : vector<2xf32> to vector<2x1xf32>
    %418 = vector.broadcast %417 : vector<2x1xf32> to vector<2x8xf32>
    %419 = arith.divf %415, %418 : vector<2x8xf32>
    %420 = vector.shape_cast %419 : vector<2x8xf32> to vector<2x8x1xf32>
    %421 = vector.broadcast %420 : vector<2x8x1xf32> to vector<2x8x64xf32>
    %422 = arith.mulf %421, %0 : vector<2x8x64xf32>
    %cst_110 = arith.constant dense<0.000000e+00> : vector<2x64xf32>
    %423 = vector.multi_reduction <add>, %422, %cst_110 [1] : vector<2x8x64xf32> to vector<2x64xf32>
    %cst_111 = arith.constant dense<0.000000e+00> : vector<2x128xf32>
    %424 = tpu.matmul %406, %3, %cst_111 {dimension_numbers = #tpu.dot_dimension_numbers<[1], [0], [0], [1], [0, 0, 1, 1], [], []>} : vector<2x32xf32>, vector<32x128xf32>, vector<2x128xf32> -> vector<2x128xf32>
    %cst_112 = arith.constant dense<0.000000e+00> : vector<2x128xf32>
    %425 = tpu.matmul %423, %4, %cst_112 {dimension_numbers = #tpu.dot_dimension_numbers<[1], [0], [0], [1], [0, 0, 1, 1], [], []>} : vector<2x64xf32>, vector<64x128xf32>, vector<2x128xf32> -> vector<2x128xf32>
    %426 = arith.addf %424, %425 : vector<2x128xf32>
    %cst_113 = arith.constant dense<0.000000e+00> : vector<2x128xf32>
    %427 = tpu.matmul %325, %5, %cst_113 {dimension_numbers = #tpu.dot_dimension_numbers<[1], [0], [0], [1], [0, 0, 1, 1], [], []>} : vector<2x32xf32>, vector<32x128xf32>, vector<2x128xf32> -> vector<2x128xf32>
    %428 = arith.addf %426, %427 : vector<2x128xf32>
    %429 = vector.broadcast %6 : vector<1x128xf32> to vector<2x128xf32>
    %430 = arith.addf %428, %429 : vector<2x128xf32>
    %431 = vector.extract_strided_slice %430 {offsets = [0, 0], sizes = [2, 32], strides = [1, 1]} : vector<2x128xf32> to vector<2x32xf32>
    %432 = arith.negf %431 : vector<2x32xf32>
    %433 = math.exp %432 : vector<2x32xf32>
    %cst_114 = arith.constant 1.000000e+00 : f32
    %434 = vector.broadcast %cst_114 : f32 to vector<2x32xf32>
    %435 = arith.addf %434, %433 : vector<2x32xf32>
    %436 = arith.divf %434, %435 : vector<2x32xf32>
    %437 = vector.extract_strided_slice %430 {offsets = [0, 32], sizes = [2, 32], strides = [1, 1]} : vector<2x128xf32> to vector<2x32xf32>
    %438 = arith.negf %437 : vector<2x32xf32>
    %439 = math.exp %438 : vector<2x32xf32>
    %cst_115 = arith.constant 1.000000e+00 : f32
    %440 = vector.broadcast %cst_115 : f32 to vector<2x32xf32>
    %441 = arith.addf %440, %439 : vector<2x32xf32>
    %442 = arith.divf %440, %441 : vector<2x32xf32>
    %443 = vector.extract_strided_slice %430 {offsets = [0, 64], sizes = [2, 32], strides = [1, 1]} : vector<2x128xf32> to vector<2x32xf32>
    %444 = math.tanh %443 : vector<2x32xf32>
    %445 = vector.extract_strided_slice %430 {offsets = [0, 96], sizes = [2, 32], strides = [1, 1]} : vector<2x128xf32> to vector<2x32xf32>
    %446 = arith.negf %445 : vector<2x32xf32>
    %447 = math.exp %446 : vector<2x32xf32>
    %cst_116 = arith.constant 1.000000e+00 : f32
    %448 = vector.broadcast %cst_116 : f32 to vector<2x32xf32>
    %449 = arith.addf %448, %447 : vector<2x32xf32>
    %450 = arith.divf %448, %449 : vector<2x32xf32>
    %451 = arith.mulf %442, %323 : vector<2x32xf32>
    %452 = arith.mulf %436, %444 : vector<2x32xf32>
    %453 = arith.addf %451, %452 : vector<2x32xf32>
    %454 = math.tanh %453 : vector<2x32xf32>
    %455 = arith.mulf %450, %454 : vector<2x32xf32>
    %cst_117 = arith.constant dense<0.000000e+00> : vector<2x128xf32>
    %456 = tpu.matmul %455, %7, %cst_117 {dimension_numbers = #tpu.dot_dimension_numbers<[1], [0], [0], [1], [0, 0, 1, 1], [], []>} : vector<2x32xf32>, vector<32x128xf32>, vector<2x128xf32> -> vector<2x128xf32>
    %cst_118 = arith.constant dense<0.000000e+00> : vector<2x128xf32>
    %457 = tpu.matmul %355, %8, %cst_118 {dimension_numbers = #tpu.dot_dimension_numbers<[1], [0], [0], [1], [0, 0, 1, 1], [], []>} : vector<2x32xf32>, vector<32x128xf32>, vector<2x128xf32> -> vector<2x128xf32>
    %458 = arith.addf %456, %457 : vector<2x128xf32>
    %459 = vector.broadcast %9 : vector<1x128xf32> to vector<2x128xf32>
    %460 = arith.addf %458, %459 : vector<2x128xf32>
    %461 = vector.extract_strided_slice %460 {offsets = [0, 0], sizes = [2, 32], strides = [1, 1]} : vector<2x128xf32> to vector<2x32xf32>
    %462 = arith.negf %461 : vector<2x32xf32>
    %463 = math.exp %462 : vector<2x32xf32>
    %cst_119 = arith.constant 1.000000e+00 : f32
    %464 = vector.broadcast %cst_119 : f32 to vector<2x32xf32>
    %465 = arith.addf %464, %463 : vector<2x32xf32>
    %466 = arith.divf %464, %465 : vector<2x32xf32>
    %467 = vector.extract_strided_slice %460 {offsets = [0, 32], sizes = [2, 32], strides = [1, 1]} : vector<2x128xf32> to vector<2x32xf32>
    %468 = arith.negf %467 : vector<2x32xf32>
    %469 = math.exp %468 : vector<2x32xf32>
    %cst_120 = arith.constant 1.000000e+00 : f32
    %470 = vector.broadcast %cst_120 : f32 to vector<2x32xf32>
    %471 = arith.addf %470, %469 : vector<2x32xf32>
    %472 = arith.divf %470, %471 : vector<2x32xf32>
    %473 = vector.extract_strided_slice %460 {offsets = [0, 64], sizes = [2, 32], strides = [1, 1]} : vector<2x128xf32> to vector<2x32xf32>
    %474 = math.tanh %473 : vector<2x32xf32>
    %475 = vector.extract_strided_slice %460 {offsets = [0, 96], sizes = [2, 32], strides = [1, 1]} : vector<2x128xf32> to vector<2x32xf32>
    %476 = arith.negf %475 : vector<2x32xf32>
    %477 = math.exp %476 : vector<2x32xf32>
    %cst_121 = arith.constant 1.000000e+00 : f32
    %478 = vector.broadcast %cst_121 : f32 to vector<2x32xf32>
    %479 = arith.addf %478, %477 : vector<2x32xf32>
    %480 = arith.divf %478, %479 : vector<2x32xf32>
    %481 = arith.mulf %472, %353 : vector<2x32xf32>
    %482 = arith.mulf %466, %474 : vector<2x32xf32>
    %483 = arith.addf %481, %482 : vector<2x32xf32>
    %484 = math.tanh %483 : vector<2x32xf32>
    %485 = arith.mulf %480, %484 : vector<2x32xf32>
    %cst_122 = arith.constant dense<0.000000e+00> : vector<2x3xf32>
    %486 = tpu.matmul %485, %10, %cst_122 {dimension_numbers = #tpu.dot_dimension_numbers<[1], [0], [0], [1], [0, 0, 1, 1], [], []>} : vector<2x32xf32>, vector<32x3xf32>, vector<2x3xf32> -> vector<2x3xf32>
    %487 = vector.broadcast %11 : vector<1x3xf32> to vector<2x3xf32>
    %488 = arith.addf %486, %487 : vector<2x3xf32>
    %cst_123 = arith.constant dense<0xFF800000> : vector<2xf32>
    %489 = vector.multi_reduction <maximumf>, %488, %cst_123 [1] : vector<2x3xf32> to vector<2xf32>
    %490 = vector.shape_cast %489 : vector<2xf32> to vector<2x1xf32>
    %491 = vector.broadcast %490 : vector<2x1xf32> to vector<2x3xf32>
    %492 = arith.subf %488, %491 : vector<2x3xf32>
    %493 = math.exp %492 : vector<2x3xf32>
    %cst_124 = arith.constant dense<0.000000e+00> : vector<2xf32>
    %494 = vector.multi_reduction <add>, %493, %cst_124 [1] : vector<2x3xf32> to vector<2xf32>
    %495 = vector.shape_cast %494 : vector<2xf32> to vector<2x1xf32>
    %496 = math.log %495 : vector<2x1xf32>
    %497 = arith.addf %496, %490 : vector<2x1xf32>
    %498 = vector.broadcast %497 : vector<2x1xf32> to vector<2x3xf32>
    %499 = arith.subf %488, %498 : vector<2x3xf32>
    %c3 = arith.constant 3 : index
    %c0_125 = arith.constant 0 : index
    %c0_126 = arith.constant 0 : index
    %500 = vector.load %arg17[%c3, %c0_125, %c0_126] : memref<8x2x3xf32, #tpu.memory_space<vmem>>, vector<1x2x3xf32>
    %501 = vector.shape_cast %500 : vector<1x2x3xf32> to vector<2x3xf32>
    %502 = vector.shape_cast %499 : vector<2x3xf32> to vector<1x2x3xf32>
    tpu.vector_store %arg17[%c3, %c0_125, %c0_126], %502 {strides = array<i32>} : memref<8x2x3xf32, #tpu.memory_space<vmem>>, vector<1x2x3xf32>,
    %503 = tpu.iota {dimensions = array<i32: 1>} : vector<2x3xi32>
    %cst_127 = arith.constant dense<0xFF800000> : vector<2xf32>
    %504 = vector.multi_reduction <maximumf>, %488, %cst_127 [1] : vector<2x3xf32> to vector<2xf32>
    %505 = vector.shape_cast %504 : vector<2xf32> to vector<2x1xf32>
    %506 = vector.broadcast %505 : vector<2x1xf32> to vector<2x3xf32>
    %507 = arith.cmpf oeq, %488, %506 : vector<2x3xf32>
    %c3_i32_128 = arith.constant 3 : i32
    %508 = vector.broadcast %c3_i32_128 : i32 to vector<2x3xi32>
    %509 = arith.select %507, %503, %508 : vector<2x3xi1>, vector<2x3xi32>
    %cst_129 = arith.constant dense<2147483647> : vector<2xi32>
    %510 = vector.multi_reduction <minsi>, %509, %cst_129 [1] : vector<2x3xi32> to vector<2xi32>
    %511 = vector.shape_cast %510 : vector<2xi32> to vector<2x1xi32>
    %512 = vector.extract_strided_slice %2 {offsets = [2, 0], sizes = [1, 32], strides = [1, 1]} : vector<3x32xf32> to vector<1x32xf32>
    %513 = vector.shape_cast %512 : vector<1x32xf32> to vector<32xf32>
    %514 = vector.shape_cast %513 : vector<32xf32> to vector<1x32xf32>
    %c1_i32_130 = arith.constant 1 : i32
    %515 = vector.broadcast %c1_i32_130 : i32 to vector<2x1xi32>
    %516 = arith.cmpi eq, %511, %515 : vector<2x1xi32>
    %517 = vector.extract_strided_slice %2 {offsets = [1, 0], sizes = [1, 32], strides = [1, 1]} : vector<3x32xf32> to vector<1x32xf32>
    %518 = vector.shape_cast %517 : vector<1x32xf32> to vector<32xf32>
    %519 = vector.shape_cast %518 : vector<32xf32> to vector<1x32xf32>
    %520 = vector.shape_cast %516 : vector<2x1xi1> to vector<2x1xi1>
    %521 = vector.broadcast %520 : vector<2x1xi1> to vector<2x32xi1>
    %522 = vector.shape_cast %519 : vector<1x32xf32> to vector<1x32xf32>
    %523 = vector.broadcast %522 : vector<1x32xf32> to vector<2x32xf32>
    %524 = vector.shape_cast %514 : vector<1x32xf32> to vector<1x32xf32>
    %525 = vector.broadcast %524 : vector<1x32xf32> to vector<2x32xf32>
    %526 = arith.select %521, %523, %525 : vector<2x32xi1>, vector<2x32xf32>
    %c0_i32_131 = arith.constant 0 : i32
    %527 = vector.broadcast %c0_i32_131 : i32 to vector<2x1xi32>
    %528 = arith.cmpi eq, %511, %527 : vector<2x1xi32>
    %529 = vector.extract_strided_slice %2 {offsets = [0, 0], sizes = [1, 32], strides = [1, 1]} : vector<3x32xf32> to vector<1x32xf32>
    %530 = vector.shape_cast %529 : vector<1x32xf32> to vector<32xf32>
    %531 = vector.shape_cast %530 : vector<32xf32> to vector<1x32xf32>
    %532 = vector.shape_cast %528 : vector<2x1xi1> to vector<2x1xi1>
    %533 = vector.broadcast %532 : vector<2x1xi1> to vector<2x32xi1>
    %534 = vector.shape_cast %531 : vector<1x32xf32> to vector<1x32xf32>
    %535 = vector.broadcast %534 : vector<1x32xf32> to vector<2x32xf32>
    %536 = arith.select %533, %535, %526 : vector<2x32xi1>, vector<2x32xf32>
    %537 = vector.shape_cast %485 : vector<2x32xf32> to vector<2x1x32xf32>
    %538 = vector.broadcast %537 : vector<2x1x32xf32> to vector<2x8x32xf32>
    %539 = arith.mulf %1, %538 : vector<2x8x32xf32>
    %cst_132 = arith.constant dense<0.000000e+00> : vector<2x8xf32>
    %540 = vector.multi_reduction <add>, %539, %cst_132 [2] : vector<2x8x32xf32> to vector<2x8xf32>
    %cst_133 = arith.constant dense<0xFF800000> : vector<2xf32>
    %541 = vector.multi_reduction <maximumf>, %540, %cst_133 [1] : vector<2x8xf32> to vector<2xf32>
    %542 = vector.shape_cast %541 : vector<2xf32> to vector<2x1xf32>
    %543 = vector.broadcast %542 : vector<2x1xf32> to vector<2x8xf32>
    %544 = arith.subf %540, %543 : vector<2x8xf32>
    %545 = math.exp %544 : vector<2x8xf32>
    %cst_134 = arith.constant dense<0.000000e+00> : vector<2xf32>
    %546 = vector.multi_reduction <add>, %545, %cst_134 [1] : vector<2x8xf32> to vector<2xf32>
    %547 = vector.shape_cast %546 : vector<2xf32> to vector<2x1xf32>
    %548 = vector.broadcast %547 : vector<2x1xf32> to vector<2x8xf32>
    %549 = arith.divf %545, %548 : vector<2x8xf32>
    %550 = vector.shape_cast %549 : vector<2x8xf32> to vector<2x8x1xf32>
    %551 = vector.broadcast %550 : vector<2x8x1xf32> to vector<2x8x64xf32>
    %552 = arith.mulf %551, %0 : vector<2x8x64xf32>
    %cst_135 = arith.constant dense<0.000000e+00> : vector<2x64xf32>
    %553 = vector.multi_reduction <add>, %552, %cst_135 [1] : vector<2x8x64xf32> to vector<2x64xf32>
    %cst_136 = arith.constant dense<0.000000e+00> : vector<2x128xf32>
    %554 = tpu.matmul %536, %3, %cst_136 {dimension_numbers = #tpu.dot_dimension_numbers<[1], [0], [0], [1], [0, 0, 1, 1], [], []>} : vector<2x32xf32>, vector<32x128xf32>, vector<2x128xf32> -> vector<2x128xf32>
    %cst_137 = arith.constant dense<0.000000e+00> : vector<2x128xf32>
    %555 = tpu.matmul %553, %4, %cst_137 {dimension_numbers = #tpu.dot_dimension_numbers<[1], [0], [0], [1], [0, 0, 1, 1], [], []>} : vector<2x64xf32>, vector<64x128xf32>, vector<2x128xf32> -> vector<2x128xf32>
    %556 = arith.addf %554, %555 : vector<2x128xf32>
    %cst_138 = arith.constant dense<0.000000e+00> : vector<2x128xf32>
    %557 = tpu.matmul %455, %5, %cst_138 {dimension_numbers = #tpu.dot_dimension_numbers<[1], [0], [0], [1], [0, 0, 1, 1], [], []>} : vector<2x32xf32>, vector<32x128xf32>, vector<2x128xf32> -> vector<2x128xf32>
    %558 = arith.addf %556, %557 : vector<2x128xf32>
    %559 = vector.broadcast %6 : vector<1x128xf32> to vector<2x128xf32>
    %560 = arith.addf %558, %559 : vector<2x128xf32>
    %561 = vector.extract_strided_slice %560 {offsets = [0, 0], sizes = [2, 32], strides = [1, 1]} : vector<2x128xf32> to vector<2x32xf32>
    %562 = arith.negf %561 : vector<2x32xf32>
    %563 = math.exp %562 : vector<2x32xf32>
    %cst_139 = arith.constant 1.000000e+00 : f32
    %564 = vector.broadcast %cst_139 : f32 to vector<2x32xf32>
    %565 = arith.addf %564, %563 : vector<2x32xf32>
    %566 = arith.divf %564, %565 : vector<2x32xf32>
    %567 = vector.extract_strided_slice %560 {offsets = [0, 32], sizes = [2, 32], strides = [1, 1]} : vector<2x128xf32> to vector<2x32xf32>
    %568 = arith.negf %567 : vector<2x32xf32>
    %569 = math.exp %568 : vector<2x32xf32>
    %cst_140 = arith.constant 1.000000e+00 : f32
    %570 = vector.broadcast %cst_140 : f32 to vector<2x32xf32>
    %571 = arith.addf %570, %569 : vector<2x32xf32>
    %572 = arith.divf %570, %571 : vector<2x32xf32>
    %573 = vector.extract_strided_slice %560 {offsets = [0, 64], sizes = [2, 32], strides = [1, 1]} : vector<2x128xf32> to vector<2x32xf32>
    %574 = math.tanh %573 : vector<2x32xf32>
    %575 = vector.extract_strided_slice %560 {offsets = [0, 96], sizes = [2, 32], strides = [1, 1]} : vector<2x128xf32> to vector<2x32xf32>
    %576 = arith.negf %575 : vector<2x32xf32>
    %577 = math.exp %576 : vector<2x32xf32>
    %cst_141 = arith.constant 1.000000e+00 : f32
    %578 = vector.broadcast %cst_141 : f32 to vector<2x32xf32>
    %579 = arith.addf %578, %577 : vector<2x32xf32>
    %580 = arith.divf %578, %579 : vector<2x32xf32>
    %581 = arith.mulf %572, %453 : vector<2x32xf32>
    %582 = arith.mulf %566, %574 : vector<2x32xf32>
    %583 = arith.addf %581, %582 : vector<2x32xf32>
    %584 = math.tanh %583 : vector<2x32xf32>
    %585 = arith.mulf %580, %584 : vector<2x32xf32>
    %cst_142 = arith.constant dense<0.000000e+00> : vector<2x128xf32>
    %586 = tpu.matmul %585, %7, %cst_142 {dimension_numbers = #tpu.dot_dimension_numbers<[1], [0], [0], [1], [0, 0, 1, 1], [], []>} : vector<2x32xf32>, vector<32x128xf32>, vector<2x128xf32> -> vector<2x128xf32>
    %cst_143 = arith.constant dense<0.000000e+00> : vector<2x128xf32>
    %587 = tpu.matmul %485, %8, %cst_143 {dimension_numbers = #tpu.dot_dimension_numbers<[1], [0], [0], [1], [0, 0, 1, 1], [], []>} : vector<2x32xf32>, vector<32x128xf32>, vector<2x128xf32> -> vector<2x128xf32>
    %588 = arith.addf %586, %587 : vector<2x128xf32>
    %589 = vector.broadcast %9 : vector<1x128xf32> to vector<2x128xf32>
    %590 = arith.addf %588, %589 : vector<2x128xf32>
    %591 = vector.extract_strided_slice %590 {offsets = [0, 0], sizes = [2, 32], strides = [1, 1]} : vector<2x128xf32> to vector<2x32xf32>
    %592 = arith.negf %591 : vector<2x32xf32>
    %593 = math.exp %592 : vector<2x32xf32>
    %cst_144 = arith.constant 1.000000e+00 : f32
    %594 = vector.broadcast %cst_144 : f32 to vector<2x32xf32>
    %595 = arith.addf %594, %593 : vector<2x32xf32>
    %596 = arith.divf %594, %595 : vector<2x32xf32>
    %597 = vector.extract_strided_slice %590 {offsets = [0, 32], sizes = [2, 32], strides = [1, 1]} : vector<2x128xf32> to vector<2x32xf32>
    %598 = arith.negf %597 : vector<2x32xf32>
    %599 = math.exp %598 : vector<2x32xf32>
    %cst_145 = arith.constant 1.000000e+00 : f32
    %600 = vector.broadcast %cst_145 : f32 to vector<2x32xf32>
    %601 = arith.addf %600, %599 : vector<2x32xf32>
    %602 = arith.divf %600, %601 : vector<2x32xf32>
    %603 = vector.extract_strided_slice %590 {offsets = [0, 64], sizes = [2, 32], strides = [1, 1]} : vector<2x128xf32> to vector<2x32xf32>
    %604 = math.tanh %603 : vector<2x32xf32>
    %605 = vector.extract_strided_slice %590 {offsets = [0, 96], sizes = [2, 32], strides = [1, 1]} : vector<2x128xf32> to vector<2x32xf32>
    %606 = arith.negf %605 : vector<2x32xf32>
    %607 = math.exp %606 : vector<2x32xf32>
    %cst_146 = arith.constant 1.000000e+00 : f32
    %608 = vector.broadcast %cst_146 : f32 to vector<2x32xf32>
    %609 = arith.addf %608, %607 : vector<2x32xf32>
    %610 = arith.divf %608, %609 : vector<2x32xf32>
    %611 = arith.mulf %602, %483 : vector<2x32xf32>
    %612 = arith.mulf %596, %604 : vector<2x32xf32>
    %613 = arith.addf %611, %612 : vector<2x32xf32>
    %614 = math.tanh %613 : vector<2x32xf32>
    %615 = arith.mulf %610, %614 : vector<2x32xf32>
    %cst_147 = arith.constant dense<0.000000e+00> : vector<2x3xf32>
    %616 = tpu.matmul %615, %10, %cst_147 {dimension_numbers = #tpu.dot_dimension_numbers<[1], [0], [0], [1], [0, 0, 1, 1], [], []>} : vector<2x32xf32>, vector<32x3xf32>, vector<2x3xf32> -> vector<2x3xf32>
    %617 = vector.broadcast %11 : vector<1x3xf32> to vector<2x3xf32>
    %618 = arith.addf %616, %617 : vector<2x3xf32>
    %cst_148 = arith.constant dense<0xFF800000> : vector<2xf32>
    %619 = vector.multi_reduction <maximumf>, %618, %cst_148 [1] : vector<2x3xf32> to vector<2xf32>
    %620 = vector.shape_cast %619 : vector<2xf32> to vector<2x1xf32>
    %621 = vector.broadcast %620 : vector<2x1xf32> to vector<2x3xf32>
    %622 = arith.subf %618, %621 : vector<2x3xf32>
    %623 = math.exp %622 : vector<2x3xf32>
    %cst_149 = arith.constant dense<0.000000e+00> : vector<2xf32>
    %624 = vector.multi_reduction <add>, %623, %cst_149 [1] : vector<2x3xf32> to vector<2xf32>
    %625 = vector.shape_cast %624 : vector<2xf32> to vector<2x1xf32>
    %626 = math.log %625 : vector<2x1xf32>
    %627 = arith.addf %626, %620 : vector<2x1xf32>
    %628 = vector.broadcast %627 : vector<2x1xf32> to vector<2x3xf32>
    %629 = arith.subf %618, %628 : vector<2x3xf32>
    %c4 = arith.constant 4 : index
    %c0_150 = arith.constant 0 : index
    %c0_151 = arith.constant 0 : index
    %630 = vector.load %arg17[%c4, %c0_150, %c0_151] : memref<8x2x3xf32, #tpu.memory_space<vmem>>, vector<1x2x3xf32>
    %631 = vector.shape_cast %630 : vector<1x2x3xf32> to vector<2x3xf32>
    %632 = vector.shape_cast %629 : vector<2x3xf32> to vector<1x2x3xf32>
    tpu.vector_store %arg17[%c4, %c0_150, %c0_151], %632 {strides = array<i32>} : memref<8x2x3xf32, #tpu.memory_space<vmem>>, vector<1x2x3xf32>,
    %633 = tpu.iota {dimensions = array<i32: 1>} : vector<2x3xi32>
    %cst_152 = arith.constant dense<0xFF800000> : vector<2xf32>
    %634 = vector.multi_reduction <maximumf>, %618, %cst_152 [1] : vector<2x3xf32> to vector<2xf32>
    %635 = vector.shape_cast %634 : vector<2xf32> to vector<2x1xf32>
    %636 = vector.broadcast %635 : vector<2x1xf32> to vector<2x3xf32>
    %637 = arith.cmpf oeq, %618, %636 : vector<2x3xf32>
    %c3_i32_153 = arith.constant 3 : i32
    %638 = vector.broadcast %c3_i32_153 : i32 to vector<2x3xi32>
    %639 = arith.select %637, %633, %638 : vector<2x3xi1>, vector<2x3xi32>
    %cst_154 = arith.constant dense<2147483647> : vector<2xi32>
    %640 = vector.multi_reduction <minsi>, %639, %cst_154 [1] : vector<2x3xi32> to vector<2xi32>
    %641 = vector.shape_cast %640 : vector<2xi32> to vector<2x1xi32>
    %642 = vector.extract_strided_slice %2 {offsets = [2, 0], sizes = [1, 32], strides = [1, 1]} : vector<3x32xf32> to vector<1x32xf32>
    %643 = vector.shape_cast %642 : vector<1x32xf32> to vector<32xf32>
    %644 = vector.shape_cast %643 : vector<32xf32> to vector<1x32xf32>
    %c1_i32_155 = arith.constant 1 : i32
    %645 = vector.broadcast %c1_i32_155 : i32 to vector<2x1xi32>
    %646 = arith.cmpi eq, %641, %645 : vector<2x1xi32>
    %647 = vector.extract_strided_slice %2 {offsets = [1, 0], sizes = [1, 32], strides = [1, 1]} : vector<3x32xf32> to vector<1x32xf32>
    %648 = vector.shape_cast %647 : vector<1x32xf32> to vector<32xf32>
    %649 = vector.shape_cast %648 : vector<32xf32> to vector<1x32xf32>
    %650 = vector.shape_cast %646 : vector<2x1xi1> to vector<2x1xi1>
    %651 = vector.broadcast %650 : vector<2x1xi1> to vector<2x32xi1>
    %652 = vector.shape_cast %649 : vector<1x32xf32> to vector<1x32xf32>
    %653 = vector.broadcast %652 : vector<1x32xf32> to vector<2x32xf32>
    %654 = vector.shape_cast %644 : vector<1x32xf32> to vector<1x32xf32>
    %655 = vector.broadcast %654 : vector<1x32xf32> to vector<2x32xf32>
    %656 = arith.select %651, %653, %655 : vector<2x32xi1>, vector<2x32xf32>
    %c0_i32_156 = arith.constant 0 : i32
    %657 = vector.broadcast %c0_i32_156 : i32 to vector<2x1xi32>
    %658 = arith.cmpi eq, %641, %657 : vector<2x1xi32>
    %659 = vector.extract_strided_slice %2 {offsets = [0, 0], sizes = [1, 32], strides = [1, 1]} : vector<3x32xf32> to vector<1x32xf32>
    %660 = vector.shape_cast %659 : vector<1x32xf32> to vector<32xf32>
    %661 = vector.shape_cast %660 : vector<32xf32> to vector<1x32xf32>
    %662 = vector.shape_cast %658 : vector<2x1xi1> to vector<2x1xi1>
    %663 = vector.broadcast %662 : vector<2x1xi1> to vector<2x32xi1>
    %664 = vector.shape_cast %661 : vector<1x32xf32> to vector<1x32xf32>
    %665 = vector.broadcast %664 : vector<1x32xf32> to vector<2x32xf32>
    %666 = arith.select %663, %665, %656 : vector<2x32xi1>, vector<2x32xf32>
    %667 = vector.shape_cast %615 : vector<2x32xf32> to vector<2x1x32xf32>
    %668 = vector.broadcast %667 : vector<2x1x32xf32> to vector<2x8x32xf32>
    %669 = arith.mulf %1, %668 : vector<2x8x32xf32>
    %cst_157 = arith.constant dense<0.000000e+00> : vector<2x8xf32>
    %670 = vector.multi_reduction <add>, %669, %cst_157 [2] : vector<2x8x32xf32> to vector<2x8xf32>
    %cst_158 = arith.constant dense<0xFF800000> : vector<2xf32>
    %671 = vector.multi_reduction <maximumf>, %670, %cst_158 [1] : vector<2x8xf32> to vector<2xf32>
    %672 = vector.shape_cast %671 : vector<2xf32> to vector<2x1xf32>
    %673 = vector.broadcast %672 : vector<2x1xf32> to vector<2x8xf32>
    %674 = arith.subf %670, %673 : vector<2x8xf32>
    %675 = math.exp %674 : vector<2x8xf32>
    %cst_159 = arith.constant dense<0.000000e+00> : vector<2xf32>
    %676 = vector.multi_reduction <add>, %675, %cst_159 [1] : vector<2x8xf32> to vector<2xf32>
    %677 = vector.shape_cast %676 : vector<2xf32> to vector<2x1xf32>
    %678 = vector.broadcast %677 : vector<2x1xf32> to vector<2x8xf32>
    %679 = arith.divf %675, %678 : vector<2x8xf32>
    %680 = vector.shape_cast %679 : vector<2x8xf32> to vector<2x8x1xf32>
    %681 = vector.broadcast %680 : vector<2x8x1xf32> to vector<2x8x64xf32>
    %682 = arith.mulf %681, %0 : vector<2x8x64xf32>
    %cst_160 = arith.constant dense<0.000000e+00> : vector<2x64xf32>
    %683 = vector.multi_reduction <add>, %682, %cst_160 [1] : vector<2x8x64xf32> to vector<2x64xf32>
    %cst_161 = arith.constant dense<0.000000e+00> : vector<2x128xf32>
    %684 = tpu.matmul %666, %3, %cst_161 {dimension_numbers = #tpu.dot_dimension_numbers<[1], [0], [0], [1], [0, 0, 1, 1], [], []>} : vector<2x32xf32>, vector<32x128xf32>, vector<2x128xf32> -> vector<2x128xf32>
    %cst_162 = arith.constant dense<0.000000e+00> : vector<2x128xf32>
    %685 = tpu.matmul %683, %4, %cst_162 {dimension_numbers = #tpu.dot_dimension_numbers<[1], [0], [0], [1], [0, 0, 1, 1], [], []>} : vector<2x64xf32>, vector<64x128xf32>, vector<2x128xf32> -> vector<2x128xf32>
    %686 = arith.addf %684, %685 : vector<2x128xf32>
    %cst_163 = arith.constant dense<0.000000e+00> : vector<2x128xf32>
    %687 = tpu.matmul %585, %5, %cst_163 {dimension_numbers = #tpu.dot_dimension_numbers<[1], [0], [0], [1], [0, 0, 1, 1], [], []>} : vector<2x32xf32>, vector<32x128xf32>, vector<2x128xf32> -> vector<2x128xf32>
    %688 = arith.addf %686, %687 : vector<2x128xf32>
    %689 = vector.broadcast %6 : vector<1x128xf32> to vector<2x128xf32>
    %690 = arith.addf %688, %689 : vector<2x128xf32>
    %691 = vector.extract_strided_slice %690 {offsets = [0, 0], sizes = [2, 32], strides = [1, 1]} : vector<2x128xf32> to vector<2x32xf32>
    %692 = arith.negf %691 : vector<2x32xf32>
    %693 = math.exp %692 : vector<2x32xf32>
    %cst_164 = arith.constant 1.000000e+00 : f32
    %694 = vector.broadcast %cst_164 : f32 to vector<2x32xf32>
    %695 = arith.addf %694, %693 : vector<2x32xf32>
    %696 = arith.divf %694, %695 : vector<2x32xf32>
    %697 = vector.extract_strided_slice %690 {offsets = [0, 32], sizes = [2, 32], strides = [1, 1]} : vector<2x128xf32> to vector<2x32xf32>
    %698 = arith.negf %697 : vector<2x32xf32>
    %699 = math.exp %698 : vector<2x32xf32>
    %cst_165 = arith.constant 1.000000e+00 : f32
    %700 = vector.broadcast %cst_165 : f32 to vector<2x32xf32>
    %701 = arith.addf %700, %699 : vector<2x32xf32>
    %702 = arith.divf %700, %701 : vector<2x32xf32>
    %703 = vector.extract_strided_slice %690 {offsets = [0, 64], sizes = [2, 32], strides = [1, 1]} : vector<2x128xf32> to vector<2x32xf32>
    %704 = math.tanh %703 : vector<2x32xf32>
    %705 = vector.extract_strided_slice %690 {offsets = [0, 96], sizes = [2, 32], strides = [1, 1]} : vector<2x128xf32> to vector<2x32xf32>
    %706 = arith.negf %705 : vector<2x32xf32>
    %707 = math.exp %706 : vector<2x32xf32>
    %cst_166 = arith.constant 1.000000e+00 : f32
    %708 = vector.broadcast %cst_166 : f32 to vector<2x32xf32>
    %709 = arith.addf %708, %707 : vector<2x32xf32>
    %710 = arith.divf %708, %709 : vector<2x32xf32>
    %711 = arith.mulf %702, %583 : vector<2x32xf32>
    %712 = arith.mulf %696, %704 : vector<2x32xf32>
    %713 = arith.addf %711, %712 : vector<2x32xf32>
    %714 = math.tanh %713 : vector<2x32xf32>
    %715 = arith.mulf %710, %714 : vector<2x32xf32>
    %cst_167 = arith.constant dense<0.000000e+00> : vector<2x128xf32>
    %716 = tpu.matmul %715, %7, %cst_167 {dimension_numbers = #tpu.dot_dimension_numbers<[1], [0], [0], [1], [0, 0, 1, 1], [], []>} : vector<2x32xf32>, vector<32x128xf32>, vector<2x128xf32> -> vector<2x128xf32>
    %cst_168 = arith.constant dense<0.000000e+00> : vector<2x128xf32>
    %717 = tpu.matmul %615, %8, %cst_168 {dimension_numbers = #tpu.dot_dimension_numbers<[1], [0], [0], [1], [0, 0, 1, 1], [], []>} : vector<2x32xf32>, vector<32x128xf32>, vector<2x128xf32> -> vector<2x128xf32>
    %718 = arith.addf %716, %717 : vector<2x128xf32>
    %719 = vector.broadcast %9 : vector<1x128xf32> to vector<2x128xf32>
    %720 = arith.addf %718, %719 : vector<2x128xf32>
    %721 = vector.extract_strided_slice %720 {offsets = [0, 0], sizes = [2, 32], strides = [1, 1]} : vector<2x128xf32> to vector<2x32xf32>
    %722 = arith.negf %721 : vector<2x32xf32>
    %723 = math.exp %722 : vector<2x32xf32>
    %cst_169 = arith.constant 1.000000e+00 : f32
    %724 = vector.broadcast %cst_169 : f32 to vector<2x32xf32>
    %725 = arith.addf %724, %723 : vector<2x32xf32>
    %726 = arith.divf %724, %725 : vector<2x32xf32>
    %727 = vector.extract_strided_slice %720 {offsets = [0, 32], sizes = [2, 32], strides = [1, 1]} : vector<2x128xf32> to vector<2x32xf32>
    %728 = arith.negf %727 : vector<2x32xf32>
    %729 = math.exp %728 : vector<2x32xf32>
    %cst_170 = arith.constant 1.000000e+00 : f32
    %730 = vector.broadcast %cst_170 : f32 to vector<2x32xf32>
    %731 = arith.addf %730, %729 : vector<2x32xf32>
    %732 = arith.divf %730, %731 : vector<2x32xf32>
    %733 = vector.extract_strided_slice %720 {offsets = [0, 64], sizes = [2, 32], strides = [1, 1]} : vector<2x128xf32> to vector<2x32xf32>
    %734 = math.tanh %733 : vector<2x32xf32>
    %735 = vector.extract_strided_slice %720 {offsets = [0, 96], sizes = [2, 32], strides = [1, 1]} : vector<2x128xf32> to vector<2x32xf32>
    %736 = arith.negf %735 : vector<2x32xf32>
    %737 = math.exp %736 : vector<2x32xf32>
    %cst_171 = arith.constant 1.000000e+00 : f32
    %738 = vector.broadcast %cst_171 : f32 to vector<2x32xf32>
    %739 = arith.addf %738, %737 : vector<2x32xf32>
    %740 = arith.divf %738, %739 : vector<2x32xf32>
    %741 = arith.mulf %732, %613 : vector<2x32xf32>
    %742 = arith.mulf %726, %734 : vector<2x32xf32>
    %743 = arith.addf %741, %742 : vector<2x32xf32>
    %744 = math.tanh %743 : vector<2x32xf32>
    %745 = arith.mulf %740, %744 : vector<2x32xf32>
    %cst_172 = arith.constant dense<0.000000e+00> : vector<2x3xf32>
    %746 = tpu.matmul %745, %10, %cst_172 {dimension_numbers = #tpu.dot_dimension_numbers<[1], [0], [0], [1], [0, 0, 1, 1], [], []>} : vector<2x32xf32>, vector<32x3xf32>, vector<2x3xf32> -> vector<2x3xf32>
    %747 = vector.broadcast %11 : vector<1x3xf32> to vector<2x3xf32>
    %748 = arith.addf %746, %747 : vector<2x3xf32>
    %cst_173 = arith.constant dense<0xFF800000> : vector<2xf32>
    %749 = vector.multi_reduction <maximumf>, %748, %cst_173 [1] : vector<2x3xf32> to vector<2xf32>
    %750 = vector.shape_cast %749 : vector<2xf32> to vector<2x1xf32>
    %751 = vector.broadcast %750 : vector<2x1xf32> to vector<2x3xf32>
    %752 = arith.subf %748, %751 : vector<2x3xf32>
    %753 = math.exp %752 : vector<2x3xf32>
    %cst_174 = arith.constant dense<0.000000e+00> : vector<2xf32>
    %754 = vector.multi_reduction <add>, %753, %cst_174 [1] : vector<2x3xf32> to vector<2xf32>
    %755 = vector.shape_cast %754 : vector<2xf32> to vector<2x1xf32>
    %756 = math.log %755 : vector<2x1xf32>
    %757 = arith.addf %756, %750 : vector<2x1xf32>
    %758 = vector.broadcast %757 : vector<2x1xf32> to vector<2x3xf32>
    %759 = arith.subf %748, %758 : vector<2x3xf32>
    %c5 = arith.constant 5 : index
    %c0_175 = arith.constant 0 : index
    %c0_176 = arith.constant 0 : index
    %760 = vector.load %arg17[%c5, %c0_175, %c0_176] : memref<8x2x3xf32, #tpu.memory_space<vmem>>, vector<1x2x3xf32>
    %761 = vector.shape_cast %760 : vector<1x2x3xf32> to vector<2x3xf32>
    %762 = vector.shape_cast %759 : vector<2x3xf32> to vector<1x2x3xf32>
    tpu.vector_store %arg17[%c5, %c0_175, %c0_176], %762 {strides = array<i32>} : memref<8x2x3xf32, #tpu.memory_space<vmem>>, vector<1x2x3xf32>,
    %763 = tpu.iota {dimensions = array<i32: 1>} : vector<2x3xi32>
    %cst_177 = arith.constant dense<0xFF800000> : vector<2xf32>
    %764 = vector.multi_reduction <maximumf>, %748, %cst_177 [1] : vector<2x3xf32> to vector<2xf32>
    %765 = vector.shape_cast %764 : vector<2xf32> to vector<2x1xf32>
    %766 = vector.broadcast %765 : vector<2x1xf32> to vector<2x3xf32>
    %767 = arith.cmpf oeq, %748, %766 : vector<2x3xf32>
    %c3_i32_178 = arith.constant 3 : i32
    %768 = vector.broadcast %c3_i32_178 : i32 to vector<2x3xi32>
    %769 = arith.select %767, %763, %768 : vector<2x3xi1>, vector<2x3xi32>
    %cst_179 = arith.constant dense<2147483647> : vector<2xi32>
    %770 = vector.multi_reduction <minsi>, %769, %cst_179 [1] : vector<2x3xi32> to vector<2xi32>
    %771 = vector.shape_cast %770 : vector<2xi32> to vector<2x1xi32>
    %772 = vector.extract_strided_slice %2 {offsets = [2, 0], sizes = [1, 32], strides = [1, 1]} : vector<3x32xf32> to vector<1x32xf32>
    %773 = vector.shape_cast %772 : vector<1x32xf32> to vector<32xf32>
    %774 = vector.shape_cast %773 : vector<32xf32> to vector<1x32xf32>
    %c1_i32_180 = arith.constant 1 : i32
    %775 = vector.broadcast %c1_i32_180 : i32 to vector<2x1xi32>
    %776 = arith.cmpi eq, %771, %775 : vector<2x1xi32>
    %777 = vector.extract_strided_slice %2 {offsets = [1, 0], sizes = [1, 32], strides = [1, 1]} : vector<3x32xf32> to vector<1x32xf32>
    %778 = vector.shape_cast %777 : vector<1x32xf32> to vector<32xf32>
    %779 = vector.shape_cast %778 : vector<32xf32> to vector<1x32xf32>
    %780 = vector.shape_cast %776 : vector<2x1xi1> to vector<2x1xi1>
    %781 = vector.broadcast %780 : vector<2x1xi1> to vector<2x32xi1>
    %782 = vector.shape_cast %779 : vector<1x32xf32> to vector<1x32xf32>
    %783 = vector.broadcast %782 : vector<1x32xf32> to vector<2x32xf32>
    %784 = vector.shape_cast %774 : vector<1x32xf32> to vector<1x32xf32>
    %785 = vector.broadcast %784 : vector<1x32xf32> to vector<2x32xf32>
    %786 = arith.select %781, %783, %785 : vector<2x32xi1>, vector<2x32xf32>
    %c0_i32_181 = arith.constant 0 : i32
    %787 = vector.broadcast %c0_i32_181 : i32 to vector<2x1xi32>
    %788 = arith.cmpi eq, %771, %787 : vector<2x1xi32>
    %789 = vector.extract_strided_slice %2 {offsets = [0, 0], sizes = [1, 32], strides = [1, 1]} : vector<3x32xf32> to vector<1x32xf32>
    %790 = vector.shape_cast %789 : vector<1x32xf32> to vector<32xf32>
    %791 = vector.shape_cast %790 : vector<32xf32> to vector<1x32xf32>
    %792 = vector.shape_cast %788 : vector<2x1xi1> to vector<2x1xi1>
    %793 = vector.broadcast %792 : vector<2x1xi1> to vector<2x32xi1>
    %794 = vector.shape_cast %791 : vector<1x32xf32> to vector<1x32xf32>
    %795 = vector.broadcast %794 : vector<1x32xf32> to vector<2x32xf32>
    %796 = arith.select %793, %795, %786 : vector<2x32xi1>, vector<2x32xf32>
    %797 = vector.shape_cast %745 : vector<2x32xf32> to vector<2x1x32xf32>
    %798 = vector.broadcast %797 : vector<2x1x32xf32> to vector<2x8x32xf32>
    %799 = arith.mulf %1, %798 : vector<2x8x32xf32>
    %cst_182 = arith.constant dense<0.000000e+00> : vector<2x8xf32>
    %800 = vector.multi_reduction <add>, %799, %cst_182 [2] : vector<2x8x32xf32> to vector<2x8xf32>
    %cst_183 = arith.constant dense<0xFF800000> : vector<2xf32>
    %801 = vector.multi_reduction <maximumf>, %800, %cst_183 [1] : vector<2x8xf32> to vector<2xf32>
    %802 = vector.shape_cast %801 : vector<2xf32> to vector<2x1xf32>
    %803 = vector.broadcast %802 : vector<2x1xf32> to vector<2x8xf32>
    %804 = arith.subf %800, %803 : vector<2x8xf32>
    %805 = math.exp %804 : vector<2x8xf32>
    %cst_184 = arith.constant dense<0.000000e+00> : vector<2xf32>
    %806 = vector.multi_reduction <add>, %805, %cst_184 [1] : vector<2x8xf32> to vector<2xf32>
    %807 = vector.shape_cast %806 : vector<2xf32> to vector<2x1xf32>
    %808 = vector.broadcast %807 : vector<2x1xf32> to vector<2x8xf32>
    %809 = arith.divf %805, %808 : vector<2x8xf32>
    %810 = vector.shape_cast %809 : vector<2x8xf32> to vector<2x8x1xf32>
    %811 = vector.broadcast %810 : vector<2x8x1xf32> to vector<2x8x64xf32>
    %812 = arith.mulf %811, %0 : vector<2x8x64xf32>
    %cst_185 = arith.constant dense<0.000000e+00> : vector<2x64xf32>
    %813 = vector.multi_reduction <add>, %812, %cst_185 [1] : vector<2x8x64xf32> to vector<2x64xf32>
    %cst_186 = arith.constant dense<0.000000e+00> : vector<2x128xf32>
    %814 = tpu.matmul %796, %3, %cst_186 {dimension_numbers = #tpu.dot_dimension_numbers<[1], [0], [0], [1], [0, 0, 1, 1], [], []>} : vector<2x32xf32>, vector<32x128xf32>, vector<2x128xf32> -> vector<2x128xf32>
    %cst_187 = arith.constant dense<0.000000e+00> : vector<2x128xf32>
    %815 = tpu.matmul %813, %4, %cst_187 {dimension_numbers = #tpu.dot_dimension_numbers<[1], [0], [0], [1], [0, 0, 1, 1], [], []>} : vector<2x64xf32>, vector<64x128xf32>, vector<2x128xf32> -> vector<2x128xf32>
    %816 = arith.addf %814, %815 : vector<2x128xf32>
    %cst_188 = arith.constant dense<0.000000e+00> : vector<2x128xf32>
    %817 = tpu.matmul %715, %5, %cst_188 {dimension_numbers = #tpu.dot_dimension_numbers<[1], [0], [0], [1], [0, 0, 1, 1], [], []>} : vector<2x32xf32>, vector<32x128xf32>, vector<2x128xf32> -> vector<2x128xf32>
    %818 = arith.addf %816, %817 : vector<2x128xf32>
    %819 = vector.broadcast %6 : vector<1x128xf32> to vector<2x128xf32>
    %820 = arith.addf %818, %819 : vector<2x128xf32>
    %821 = vector.extract_strided_slice %820 {offsets = [0, 0], sizes = [2, 32], strides = [1, 1]} : vector<2x128xf32> to vector<2x32xf32>
    %822 = arith.negf %821 : vector<2x32xf32>
    %823 = math.exp %822 : vector<2x32xf32>
    %cst_189 = arith.constant 1.000000e+00 : f32
    %824 = vector.broadcast %cst_189 : f32 to vector<2x32xf32>
    %825 = arith.addf %824, %823 : vector<2x32xf32>
    %826 = arith.divf %824, %825 : vector<2x32xf32>
    %827 = vector.extract_strided_slice %820 {offsets = [0, 32], sizes = [2, 32], strides = [1, 1]} : vector<2x128xf32> to vector<2x32xf32>
    %828 = arith.negf %827 : vector<2x32xf32>
    %829 = math.exp %828 : vector<2x32xf32>
    %cst_190 = arith.constant 1.000000e+00 : f32
    %830 = vector.broadcast %cst_190 : f32 to vector<2x32xf32>
    %831 = arith.addf %830, %829 : vector<2x32xf32>
    %832 = arith.divf %830, %831 : vector<2x32xf32>
    %833 = vector.extract_strided_slice %820 {offsets = [0, 64], sizes = [2, 32], strides = [1, 1]} : vector<2x128xf32> to vector<2x32xf32>
    %834 = math.tanh %833 : vector<2x32xf32>
    %835 = vector.extract_strided_slice %820 {offsets = [0, 96], sizes = [2, 32], strides = [1, 1]} : vector<2x128xf32> to vector<2x32xf32>
    %836 = arith.negf %835 : vector<2x32xf32>
    %837 = math.exp %836 : vector<2x32xf32>
    %cst_191 = arith.constant 1.000000e+00 : f32
    %838 = vector.broadcast %cst_191 : f32 to vector<2x32xf32>
    %839 = arith.addf %838, %837 : vector<2x32xf32>
    %840 = arith.divf %838, %839 : vector<2x32xf32>
    %841 = arith.mulf %832, %713 : vector<2x32xf32>
    %842 = arith.mulf %826, %834 : vector<2x32xf32>
    %843 = arith.addf %841, %842 : vector<2x32xf32>
    %844 = math.tanh %843 : vector<2x32xf32>
    %845 = arith.mulf %840, %844 : vector<2x32xf32>
    %cst_192 = arith.constant dense<0.000000e+00> : vector<2x128xf32>
    %846 = tpu.matmul %845, %7, %cst_192 {dimension_numbers = #tpu.dot_dimension_numbers<[1], [0], [0], [1], [0, 0, 1, 1], [], []>} : vector<2x32xf32>, vector<32x128xf32>, vector<2x128xf32> -> vector<2x128xf32>
    %cst_193 = arith.constant dense<0.000000e+00> : vector<2x128xf32>
    %847 = tpu.matmul %745, %8, %cst_193 {dimension_numbers = #tpu.dot_dimension_numbers<[1], [0], [0], [1], [0, 0, 1, 1], [], []>} : vector<2x32xf32>, vector<32x128xf32>, vector<2x128xf32> -> vector<2x128xf32>
    %848 = arith.addf %846, %847 : vector<2x128xf32>
    %849 = vector.broadcast %9 : vector<1x128xf32> to vector<2x128xf32>
    %850 = arith.addf %848, %849 : vector<2x128xf32>
    %851 = vector.extract_strided_slice %850 {offsets = [0, 0], sizes = [2, 32], strides = [1, 1]} : vector<2x128xf32> to vector<2x32xf32>
    %852 = arith.negf %851 : vector<2x32xf32>
    %853 = math.exp %852 : vector<2x32xf32>
    %cst_194 = arith.constant 1.000000e+00 : f32
    %854 = vector.broadcast %cst_194 : f32 to vector<2x32xf32>
    %855 = arith.addf %854, %853 : vector<2x32xf32>
    %856 = arith.divf %854, %855 : vector<2x32xf32>
    %857 = vector.extract_strided_slice %850 {offsets = [0, 32], sizes = [2, 32], strides = [1, 1]} : vector<2x128xf32> to vector<2x32xf32>
    %858 = arith.negf %857 : vector<2x32xf32>
    %859 = math.exp %858 : vector<2x32xf32>
    %cst_195 = arith.constant 1.000000e+00 : f32
    %860 = vector.broadcast %cst_195 : f32 to vector<2x32xf32>
    %861 = arith.addf %860, %859 : vector<2x32xf32>
    %862 = arith.divf %860, %861 : vector<2x32xf32>
    %863 = vector.extract_strided_slice %850 {offsets = [0, 64], sizes = [2, 32], strides = [1, 1]} : vector<2x128xf32> to vector<2x32xf32>
    %864 = math.tanh %863 : vector<2x32xf32>
    %865 = vector.extract_strided_slice %850 {offsets = [0, 96], sizes = [2, 32], strides = [1, 1]} : vector<2x128xf32> to vector<2x32xf32>
    %866 = arith.negf %865 : vector<2x32xf32>
    %867 = math.exp %866 : vector<2x32xf32>
    %cst_196 = arith.constant 1.000000e+00 : f32
    %868 = vector.broadcast %cst_196 : f32 to vector<2x32xf32>
    %869 = arith.addf %868, %867 : vector<2x32xf32>
    %870 = arith.divf %868, %869 : vector<2x32xf32>
    %871 = arith.mulf %862, %743 : vector<2x32xf32>
    %872 = arith.mulf %856, %864 : vector<2x32xf32>
    %873 = arith.addf %871, %872 : vector<2x32xf32>
    %874 = math.tanh %873 : vector<2x32xf32>
    %875 = arith.mulf %870, %874 : vector<2x32xf32>
    %cst_197 = arith.constant dense<0.000000e+00> : vector<2x3xf32>
    %876 = tpu.matmul %875, %10, %cst_197 {dimension_numbers = #tpu.dot_dimension_numbers<[1], [0], [0], [1], [0, 0, 1, 1], [], []>} : vector<2x32xf32>, vector<32x3xf32>, vector<2x3xf32> -> vector<2x3xf32>
    %877 = vector.broadcast %11 : vector<1x3xf32> to vector<2x3xf32>
    %878 = arith.addf %876, %877 : vector<2x3xf32>
    %cst_198 = arith.constant dense<0xFF800000> : vector<2xf32>
    %879 = vector.multi_reduction <maximumf>, %878, %cst_198 [1] : vector<2x3xf32> to vector<2xf32>
    %880 = vector.shape_cast %879 : vector<2xf32> to vector<2x1xf32>
    %881 = vector.broadcast %880 : vector<2x1xf32> to vector<2x3xf32>
    %882 = arith.subf %878, %881 : vector<2x3xf32>
    %883 = math.exp %882 : vector<2x3xf32>
    %cst_199 = arith.constant dense<0.000000e+00> : vector<2xf32>
    %884 = vector.multi_reduction <add>, %883, %cst_199 [1] : vector<2x3xf32> to vector<2xf32>
    %885 = vector.shape_cast %884 : vector<2xf32> to vector<2x1xf32>
    %886 = math.log %885 : vector<2x1xf32>
    %887 = arith.addf %886, %880 : vector<2x1xf32>
    %888 = vector.broadcast %887 : vector<2x1xf32> to vector<2x3xf32>
    %889 = arith.subf %878, %888 : vector<2x3xf32>
    %c6 = arith.constant 6 : index
    %c0_200 = arith.constant 0 : index
    %c0_201 = arith.constant 0 : index
    %890 = vector.load %arg17[%c6, %c0_200, %c0_201] : memref<8x2x3xf32, #tpu.memory_space<vmem>>, vector<1x2x3xf32>
    %891 = vector.shape_cast %890 : vector<1x2x3xf32> to vector<2x3xf32>
    %892 = vector.shape_cast %889 : vector<2x3xf32> to vector<1x2x3xf32>
    tpu.vector_store %arg17[%c6, %c0_200, %c0_201], %892 {strides = array<i32>} : memref<8x2x3xf32, #tpu.memory_space<vmem>>, vector<1x2x3xf32>,
    %893 = tpu.iota {dimensions = array<i32: 1>} : vector<2x3xi32>
    %cst_202 = arith.constant dense<0xFF800000> : vector<2xf32>
    %894 = vector.multi_reduction <maximumf>, %878, %cst_202 [1] : vector<2x3xf32> to vector<2xf32>
    %895 = vector.shape_cast %894 : vector<2xf32> to vector<2x1xf32>
    %896 = vector.broadcast %895 : vector<2x1xf32> to vector<2x3xf32>
    %897 = arith.cmpf oeq, %878, %896 : vector<2x3xf32>
    %c3_i32_203 = arith.constant 3 : i32
    %898 = vector.broadcast %c3_i32_203 : i32 to vector<2x3xi32>
    %899 = arith.select %897, %893, %898 : vector<2x3xi1>, vector<2x3xi32>
    %cst_204 = arith.constant dense<2147483647> : vector<2xi32>
    %900 = vector.multi_reduction <minsi>, %899, %cst_204 [1] : vector<2x3xi32> to vector<2xi32>
    %901 = vector.shape_cast %900 : vector<2xi32> to vector<2x1xi32>
    %902 = vector.extract_strided_slice %2 {offsets = [2, 0], sizes = [1, 32], strides = [1, 1]} : vector<3x32xf32> to vector<1x32xf32>
    %903 = vector.shape_cast %902 : vector<1x32xf32> to vector<32xf32>
    %904 = vector.shape_cast %903 : vector<32xf32> to vector<1x32xf32>
    %c1_i32_205 = arith.constant 1 : i32
    %905 = vector.broadcast %c1_i32_205 : i32 to vector<2x1xi32>
    %906 = arith.cmpi eq, %901, %905 : vector<2x1xi32>
    %907 = vector.extract_strided_slice %2 {offsets = [1, 0], sizes = [1, 32], strides = [1, 1]} : vector<3x32xf32> to vector<1x32xf32>
    %908 = vector.shape_cast %907 : vector<1x32xf32> to vector<32xf32>
    %909 = vector.shape_cast %908 : vector<32xf32> to vector<1x32xf32>
    %910 = vector.shape_cast %906 : vector<2x1xi1> to vector<2x1xi1>
    %911 = vector.broadcast %910 : vector<2x1xi1> to vector<2x32xi1>
    %912 = vector.shape_cast %909 : vector<1x32xf32> to vector<1x32xf32>
    %913 = vector.broadcast %912 : vector<1x32xf32> to vector<2x32xf32>
    %914 = vector.shape_cast %904 : vector<1x32xf32> to vector<1x32xf32>
    %915 = vector.broadcast %914 : vector<1x32xf32> to vector<2x32xf32>
    %916 = arith.select %911, %913, %915 : vector<2x32xi1>, vector<2x32xf32>
    %c0_i32_206 = arith.constant 0 : i32
    %917 = vector.broadcast %c0_i32_206 : i32 to vector<2x1xi32>
    %918 = arith.cmpi eq, %901, %917 : vector<2x1xi32>
    %919 = vector.extract_strided_slice %2 {offsets = [0, 0], sizes = [1, 32], strides = [1, 1]} : vector<3x32xf32> to vector<1x32xf32>
    %920 = vector.shape_cast %919 : vector<1x32xf32> to vector<32xf32>
    %921 = vector.shape_cast %920 : vector<32xf32> to vector<1x32xf32>
    %922 = vector.shape_cast %918 : vector<2x1xi1> to vector<2x1xi1>
    %923 = vector.broadcast %922 : vector<2x1xi1> to vector<2x32xi1>
    %924 = vector.shape_cast %921 : vector<1x32xf32> to vector<1x32xf32>
    %925 = vector.broadcast %924 : vector<1x32xf32> to vector<2x32xf32>
    %926 = arith.select %923, %925, %916 : vector<2x32xi1>, vector<2x32xf32>
    %927 = vector.shape_cast %875 : vector<2x32xf32> to vector<2x1x32xf32>
    %928 = vector.broadcast %927 : vector<2x1x32xf32> to vector<2x8x32xf32>
    %929 = arith.mulf %1, %928 : vector<2x8x32xf32>
    %cst_207 = arith.constant dense<0.000000e+00> : vector<2x8xf32>
    %930 = vector.multi_reduction <add>, %929, %cst_207 [2] : vector<2x8x32xf32> to vector<2x8xf32>
    %cst_208 = arith.constant dense<0xFF800000> : vector<2xf32>
    %931 = vector.multi_reduction <maximumf>, %930, %cst_208 [1] : vector<2x8xf32> to vector<2xf32>
    %932 = vector.shape_cast %931 : vector<2xf32> to vector<2x1xf32>
    %933 = vector.broadcast %932 : vector<2x1xf32> to vector<2x8xf32>
    %934 = arith.subf %930, %933 : vector<2x8xf32>
    %935 = math.exp %934 : vector<2x8xf32>
    %cst_209 = arith.constant dense<0.000000e+00> : vector<2xf32>
    %936 = vector.multi_reduction <add>, %935, %cst_209 [1] : vector<2x8xf32> to vector<2xf32>
    %937 = vector.shape_cast %936 : vector<2xf32> to vector<2x1xf32>
    %938 = vector.broadcast %937 : vector<2x1xf32> to vector<2x8xf32>
    %939 = arith.divf %935, %938 : vector<2x8xf32>
    %940 = vector.shape_cast %939 : vector<2x8xf32> to vector<2x8x1xf32>
    %941 = vector.broadcast %940 : vector<2x8x1xf32> to vector<2x8x64xf32>
    %942 = arith.mulf %941, %0 : vector<2x8x64xf32>
    %cst_210 = arith.constant dense<0.000000e+00> : vector<2x64xf32>
    %943 = vector.multi_reduction <add>, %942, %cst_210 [1] : vector<2x8x64xf32> to vector<2x64xf32>
    %cst_211 = arith.constant dense<0.000000e+00> : vector<2x128xf32>
    %944 = tpu.matmul %926, %3, %cst_211 {dimension_numbers = #tpu.dot_dimension_numbers<[1], [0], [0], [1], [0, 0, 1, 1], [], []>} : vector<2x32xf32>, vector<32x128xf32>, vector<2x128xf32> -> vector<2x128xf32>
    %cst_212 = arith.constant dense<0.000000e+00> : vector<2x128xf32>
    %945 = tpu.matmul %943, %4, %cst_212 {dimension_numbers = #tpu.dot_dimension_numbers<[1], [0], [0], [1], [0, 0, 1, 1], [], []>} : vector<2x64xf32>, vector<64x128xf32>, vector<2x128xf32> -> vector<2x128xf32>
    %946 = arith.addf %944, %945 : vector<2x128xf32>
    %cst_213 = arith.constant dense<0.000000e+00> : vector<2x128xf32>
    %947 = tpu.matmul %845, %5, %cst_213 {dimension_numbers = #tpu.dot_dimension_numbers<[1], [0], [0], [1], [0, 0, 1, 1], [], []>} : vector<2x32xf32>, vector<32x128xf32>, vector<2x128xf32> -> vector<2x128xf32>
    %948 = arith.addf %946, %947 : vector<2x128xf32>
    %949 = vector.broadcast %6 : vector<1x128xf32> to vector<2x128xf32>
    %950 = arith.addf %948, %949 : vector<2x128xf32>
    %951 = vector.extract_strided_slice %950 {offsets = [0, 0], sizes = [2, 32], strides = [1, 1]} : vector<2x128xf32> to vector<2x32xf32>
    %952 = arith.negf %951 : vector<2x32xf32>
    %953 = math.exp %952 : vector<2x32xf32>
    %cst_214 = arith.constant 1.000000e+00 : f32
    %954 = vector.broadcast %cst_214 : f32 to vector<2x32xf32>
    %955 = arith.addf %954, %953 : vector<2x32xf32>
    %956 = arith.divf %954, %955 : vector<2x32xf32>
    %957 = vector.extract_strided_slice %950 {offsets = [0, 32], sizes = [2, 32], strides = [1, 1]} : vector<2x128xf32> to vector<2x32xf32>
    %958 = arith.negf %957 : vector<2x32xf32>
    %959 = math.exp %958 : vector<2x32xf32>
    %cst_215 = arith.constant 1.000000e+00 : f32
    %960 = vector.broadcast %cst_215 : f32 to vector<2x32xf32>
    %961 = arith.addf %960, %959 : vector<2x32xf32>
    %962 = arith.divf %960, %961 : vector<2x32xf32>
    %963 = vector.extract_strided_slice %950 {offsets = [0, 64], sizes = [2, 32], strides = [1, 1]} : vector<2x128xf32> to vector<2x32xf32>
    %964 = math.tanh %963 : vector<2x32xf32>
    %965 = vector.extract_strided_slice %950 {offsets = [0, 96], sizes = [2, 32], strides = [1, 1]} : vector<2x128xf32> to vector<2x32xf32>
    %966 = arith.negf %965 : vector<2x32xf32>
    %967 = math.exp %966 : vector<2x32xf32>
    %cst_216 = arith.constant 1.000000e+00 : f32
    %968 = vector.broadcast %cst_216 : f32 to vector<2x32xf32>
    %969 = arith.addf %968, %967 : vector<2x32xf32>
    %970 = arith.divf %968, %969 : vector<2x32xf32>
    %971 = arith.mulf %962, %843 : vector<2x32xf32>
    %972 = arith.mulf %956, %964 : vector<2x32xf32>
    %973 = arith.addf %971, %972 : vector<2x32xf32>
    %974 = math.tanh %973 : vector<2x32xf32>
    %975 = arith.mulf %970, %974 : vector<2x32xf32>
    %cst_217 = arith.constant dense<0.000000e+00> : vector<2x128xf32>
    %976 = tpu.matmul %975, %7, %cst_217 {dimension_numbers = #tpu.dot_dimension_numbers<[1], [0], [0], [1], [0, 0, 1, 1], [], []>} : vector<2x32xf32>, vector<32x128xf32>, vector<2x128xf32> -> vector<2x128xf32>
    %cst_218 = arith.constant dense<0.000000e+00> : vector<2x128xf32>
    %977 = tpu.matmul %875, %8, %cst_218 {dimension_numbers = #tpu.dot_dimension_numbers<[1], [0], [0], [1], [0, 0, 1, 1], [], []>} : vector<2x32xf32>, vector<32x128xf32>, vector<2x128xf32> -> vector<2x128xf32>
    %978 = arith.addf %976, %977 : vector<2x128xf32>
    %979 = vector.broadcast %9 : vector<1x128xf32> to vector<2x128xf32>
    %980 = arith.addf %978, %979 : vector<2x128xf32>
    %981 = vector.extract_strided_slice %980 {offsets = [0, 0], sizes = [2, 32], strides = [1, 1]} : vector<2x128xf32> to vector<2x32xf32>
    %982 = arith.negf %981 : vector<2x32xf32>
    %983 = math.exp %982 : vector<2x32xf32>
    %cst_219 = arith.constant 1.000000e+00 : f32
    %984 = vector.broadcast %cst_219 : f32 to vector<2x32xf32>
    %985 = arith.addf %984, %983 : vector<2x32xf32>
    %986 = arith.divf %984, %985 : vector<2x32xf32>
    %987 = vector.extract_strided_slice %980 {offsets = [0, 32], sizes = [2, 32], strides = [1, 1]} : vector<2x128xf32> to vector<2x32xf32>
    %988 = arith.negf %987 : vector<2x32xf32>
    %989 = math.exp %988 : vector<2x32xf32>
    %cst_220 = arith.constant 1.000000e+00 : f32
    %990 = vector.broadcast %cst_220 : f32 to vector<2x32xf32>
    %991 = arith.addf %990, %989 : vector<2x32xf32>
    %992 = arith.divf %990, %991 : vector<2x32xf32>
    %993 = vector.extract_strided_slice %980 {offsets = [0, 64], sizes = [2, 32], strides = [1, 1]} : vector<2x128xf32> to vector<2x32xf32>
    %994 = math.tanh %993 : vector<2x32xf32>
    %995 = vector.extract_strided_slice %980 {offsets = [0, 96], sizes = [2, 32], strides = [1, 1]} : vector<2x128xf32> to vector<2x32xf32>
    %996 = arith.negf %995 : vector<2x32xf32>
    %997 = math.exp %996 : vector<2x32xf32>
    %cst_221 = arith.constant 1.000000e+00 : f32
    %998 = vector.broadcast %cst_221 : f32 to vector<2x32xf32>
    %999 = arith.addf %998, %997 : vector<2x32xf32>
    %1000 = arith.divf %998, %999 : vector<2x32xf32>
    %1001 = arith.mulf %992, %873 : vector<2x32xf32>
    %1002 = arith.mulf %986, %994 : vector<2x32xf32>
    %1003 = arith.addf %1001, %1002 : vector<2x32xf32>
    %1004 = math.tanh %1003 : vector<2x32xf32>
    %1005 = arith.mulf %1000, %1004 : vector<2x32xf32>
    %cst_222 = arith.constant dense<0.000000e+00> : vector<2x3xf32>
    %1006 = tpu.matmul %1005, %10, %cst_222 {dimension_numbers = #tpu.dot_dimension_numbers<[1], [0], [0], [1], [0, 0, 1, 1], [], []>} : vector<2x32xf32>, vector<32x3xf32>, vector<2x3xf32> -> vector<2x3xf32>
    %1007 = vector.broadcast %11 : vector<1x3xf32> to vector<2x3xf32>
    %1008 = arith.addf %1006, %1007 : vector<2x3xf32>
    %cst_223 = arith.constant dense<0xFF800000> : vector<2xf32>
    %1009 = vector.multi_reduction <maximumf>, %1008, %cst_223 [1] : vector<2x3xf32> to vector<2xf32>
    %1010 = vector.shape_cast %1009 : vector<2xf32> to vector<2x1xf32>
    %1011 = vector.broadcast %1010 : vector<2x1xf32> to vector<2x3xf32>
    %1012 = arith.subf %1008, %1011 : vector<2x3xf32>
    %1013 = math.exp %1012 : vector<2x3xf32>
    %cst_224 = arith.constant dense<0.000000e+00> : vector<2xf32>
    %1014 = vector.multi_reduction <add>, %1013, %cst_224 [1] : vector<2x3xf32> to vector<2xf32>
    %1015 = vector.shape_cast %1014 : vector<2xf32> to vector<2x1xf32>
    %1016 = math.log %1015 : vector<2x1xf32>
    %1017 = arith.addf %1016, %1010 : vector<2x1xf32>
    %1018 = vector.broadcast %1017 : vector<2x1xf32> to vector<2x3xf32>
    %1019 = arith.subf %1008, %1018 : vector<2x3xf32>
    %c7 = arith.constant 7 : index
    %c0_225 = arith.constant 0 : index
    %c0_226 = arith.constant 0 : index
    %1020 = vector.load %arg17[%c7, %c0_225, %c0_226] : memref<8x2x3xf32, #tpu.memory_space<vmem>>, vector<1x2x3xf32>
    %1021 = vector.shape_cast %1020 : vector<1x2x3xf32> to vector<2x3xf32>
    %1022 = vector.shape_cast %1019 : vector<2x3xf32> to vector<1x2x3xf32>
    tpu.vector_store %arg17[%c7, %c0_225, %c0_226], %1022 {strides = array<i32>} : memref<8x2x3xf32, #tpu.memory_space<vmem>>, vector<1x2x3xf32>,
    return
  }
}

</mosaic_0001>

<bundles_post_ra>
// kernel: decoder_forward.1
= control target key start
LH: loop header
LB: loop body
LE: loop exit
PB: predicated region body
PF: predicated region fallthrough
CT: control target
= control target key end

     0   :  { %v101_v0 = vlaneseq  ;;  %v6979_v1 = vmov 1966171168   ;;  %vm132_vm0 = vcmask 261120   ;;  %vm151_vm1 = vcmask 1041409   ;;  %s6985_s27 = smov 64   ;;  %s8293_s15 = inlined_call_operand.vmem [shape: f32[2,32], index: 15, kind: input, shape index: {}]   ;;  %s8294_s1 = inlined_call_operand.vmem [shape: f32[2,8,32], index: 1, kind: input, shape index: {}]   ;;  %s8295_s5 = inlined_call_operand.vmem [shape: f32[64,128], index: 5, kind: input, shape index: {}]   ;;  %s8296_s4 = inlined_call_operand.vmem [shape: f32[32,128], index: 4, kind: input, shape index: {}]   ;;  %s8297_s6 = inlined_call_operand.vmem [shape: f32[32,128], index: 6, kind: input, shape index: {}]   ;;  %s8298_s3 = inlined_call_operand.vmem [shape: f32[2,32], index: 3, kind: input, shape index: {}]   ;;  %s8299_s13 = inlined_call_operand.vmem [shape: f32[2,32], index: 13, kind: input, shape index: {}]   ;;  %s8300_s14 = inlined_call_operand.vmem [shape: f32[2,32], index: 14, kind: input, shape index: {}]   ;;  %s8301_s0 = inlined_call_operand.vmem [shape: f32[2,8,64], index: 0, kind: input, shape index: {}]   ;;  %s8302_s7 = inlined_call_operand.vmem [shape: f32[1,128], index: 7, kind: input, shape index: {}]   ;;  %s8303_s9 = inlined_call_operand.vmem [shape: f32[32,128], index: 9, kind: input, shape index: {}]   ;;  %s8304_s8 = inlined_call_operand.vmem [shape: f32[32,128], index: 8, kind: input, shape index: {}]   ;;  %s8305_s16 = inlined_call_operand.vmem [shape: f32[2,32], index: 16, kind: input, shape index: {}]   ;;  %s8306_s10 = inlined_call_operand.vmem [shape: f32[1,128], index: 10, kind: input, shape index: {}]   ;;  %s8307_s11 = inlined_call_operand.vmem [shape: f32[32,3], index: 11, kind: input, shape index: {}]   ;;  %s8308_s12 = inlined_call_operand.vmem [shape: f32[1,3], index: 12, kind: input, shape index: {}]   ;;  %s8309_s2 = inlined_call_operand.vmem [shape: f32[3,32], index: 2, kind: input, shape index: {}]   ;;  %s8310_s17 = inlined_call_operand.vmem [shape: f32[8,2,3], index: 17, kind: output, shape index: {}]  }
   0x1   :  { %8312 = sst [smem:[#allocation2_spill]] %s8293_s15  ;;  %v99_v2 = vunpack.c.l.s4 %v6979_v1  ;;  %vm154_vm2 = vcmask 58368   ;;  %v6980_v28 = vmov 0   ;;  %v65_v52 = vld [vmem:[%s8295_s5] sm:$0xff]  ;;  %v66_v53 = vld [vmem:[%s8295_s5 + $0x8] sm:$0xff]  ;;  %v6981_v57 = vmov 0.0|0.0  }
   0x2   :  { %8313 = sst [smem:[#allocation3_spill]] %s8294_s1  ;;  %v7076_v3 = vshrl.u32 %v101_v0, 7  ;;  %s8314_s26 = sld [smem:[#allocation2_spill]]  ;;  %v7109_v20 = vand.u32 127, %v101_v0  ;;  %6740 = vset.pattern.permute.xlu0 %v6980_v28  ;;  %6739 = vset.pattern.permute.xlu1 %v6980_v28  ;;  %v7136_v54 = vpack.c.bf16 %v66_v53, %v65_v52  ;;  %v61_v55 = vld [vmem:[%s8296_s4] sm:$0xff]  ;;  %v62_v56 = vld [vmem:[%s8296_s4 + $0x8] sm:$0xff] }
   0x3   :  { %v100_v4 = vunpack.c.0.s8 %v99_v2  ;;  %s8315_s29 = sld [smem:[#allocation3_spill]]  ;;  %6396 = vmatprep.subr.bf16.mxu0 %v6981_v57  ;;  %6408 = vmatprep.subr.bf16.mxu1 %v6981_v57  ;;  %v7146_v58 = vpack.c.bf16 %v62_v56, %v61_v55  ;;  %v67_v59 = vld [vmem:[%s8295_s5 + $0x10] sm:$0xff]  ;;  %v68_v60 = vld [vmem:[%s8295_s5 + $0x18] sm:$0xff]  ;;  %v69_v1 = vld [vmem:[%s8295_s5 + $0x20] sm:$0xff]  ;;  %vm6982_vm3 = vmmov 0   ;;  %vm223_vm4 = vcmask 523264  }
   0x4   :  { %v7089_v8 = vsub.s32 0, %v7076_v3  ;;  %v7113_v22 = vsub.s32 %v7109_v20, %v7076_v3  ;;  %v7120_v29 = vsub.s32 1, %v7076_v3  ;;  %6398 = vmatpush3.bf16.msra.mxu0 %v7136_v54  ;;  %v7157_v61 = vpack.c.bf16 %v68_v60, %v67_v59  ;;  %v63_v62 = vld [vmem:[%s8296_s4 + $0x10] sm:$0xff]  ;;  %v64_v63 = vld [vmem:[%s8296_s4 + $0x18] sm:$0xff]  ;;  %v70_v2 = vld [vmem:[%s8295_s5 + $0x28] sm:$0xff]  ;;  %s6984_s4 = smov 32  }
   0x5   :  { %v7084_v6 = vsub.s32 %v100_v4, %v7076_v3  ;;  %6410 = vmatpush3.bf16.msra.mxu1 %v7146_v58  ;;  %6399 = vmatprep.subr.bf16.mxu0 %v6981_v57  ;;  %v7166_v0 = vpack.c.bf16 %v64_v63, %v63_v62  ;;  %v7177_v4 = vpack.c.bf16 %v70_v2, %v69_v1  ;;  %v7241_v28 = vld [vmem:[%s8301_s0 + $0x8] sm:$0xff]  ;;  %v7253_v55 = vld [vmem:[%s8302_s7] ss:$0 sm:$0xff]  ;;  %vm758_vm5 = vcmask 17408  }
   0x6   :  { %6411 = vmatprep.subr.bf16.mxu1 %v6981_v57 }
   0x8   :  { %v7081_v5 = vld [vmem:[%s8314_s26] sm:$0x3]  ;;  %6401 = vmatpush3.bf16.msra.mxu0 %v7157_v61 }
   0x9   :  { %v104_v7 = vrot.slane %v7081_v5, %v7084_v6  ;;  %v7095_v11 = vld [vmem:[%s8315_s29] sm:$0xff]  ;;  %v7102_v14 = vld [vmem:[%s8315_s29 + $0x8] sm:$0xff]  ;;  %6413 = vmatpush3.bf16.msra.mxu1 %v7166_v0  ;;  %6402 = vmatprep.subr.bf16.mxu0 %v6981_v57 }
   0xa   :  { %6414 = vmatprep.subr.bf16.mxu1 %v6981_v57 }
   0xb   :  { %v112_v9 = vrot.slane %v104_v7, %v7084_v6  ;;  %v105_v10 = vcombine.high %v104_v7, %v104_v7  ;;  %v73_v7 = vld [vmem:[%s8297_s6] sm:$0xff] }
   0xc   :  { %6404 = vmatpush3.bf16.msra.mxu0 %v7177_v4 }
   0xd   :  { %v123_v12 = vrot.slane %v112_v9, %v7089_v8  ;;  %v119_v13 = vrot.slane %v105_v10, %v7084_v6  ;;  %v74_v9 = vld [vmem:[%s8297_s6 + $0x8] sm:$0xff]  ;;  %6405 = vmatprep.subr.bf16.mxu0 %v6981_v57 }
   0xe   :  { %v7186_v10 = vpack.c.bf16 %v74_v9, %v73_v7 }
   0xf   :  { %v130_v15 = vmul.f32 %v123_v12, %v7095_v11  ;;  %v127_v16 = vrot.slane %v119_v13, %v7089_v8  ;;  %v6983_v12 = vmov 0.0   ;;  %v92_v13 = vld [vmem:[%s8298_s3] sm:$0x3] }
  0x10   :  { %5831 = vmatprep.mubr.msk.f32.mxu1 %vm6982_vm3, %v6983_v12  ;;  %5820 = vmatprep.mubr.msk.f32.mxu0 %vm6982_vm3, %v6983_v12 }
  0x11   :  { %v133_v17 = vsel %vm132_vm0, %v130_v15, 0.0  ;;  %v131_v18 = vmul.f32 %v127_v16, %v7102_v14  ;;  %5832 = vmatmul.mubr.msk.f32.vlgmr.msra.gmra.mrb[0].mxu1 %vm132_vm0, %v92_v13  ;;  %v71_v15 = vld [vmem:[%s8295_s5 + $0x30] sm:$0xff]  ;;  %v72_v16 = vld [vmem:[%s8295_s5 + $0x38] sm:$0xff] }
  0x12   :  { %134 = vadd.xlane.f32.xlu0 %v133_v17  ;;  %v75_v17 = vld [vmem:[%s8297_s6 + $0x10] sm:$0xff]  ;;  %6416 = vmatpush3.bf16.msra.mxu1 %v7186_v10 }
  0x13   :  { %v136_v19 = vsel %vm132_vm0, %v131_v18, 0.0  ;;  %v7206_v18 = vpack.c.bf16 %v72_v16, %v71_v15  ;;  %6417 = vmatprep.subr.bf16.mxu1 %v6981_v57  ;;  %5842 = vmatprep.mubr.msk.f32.mxu1 %vm6982_vm3, %v6983_v12 }
  0x15   :  { %6407 = vmatpush3.bf16.msra.mxu0 %v7206_v18 }
  0x16   :  { %137 = vadd.xlane.f32.xlu0 %v136_v19  ;;  %v76_v19 = vld [vmem:[%s8297_s6 + $0x18] sm:$0xff]  ;;  %6420 = vmatprep.subr.bf16.mxu0 %v6981_v57 }
  0x9f   :  { %v135_v21 = vpop.xlane.xlu0 %134 }
  0xa0   :  { %v146_v24 = vrot.slane %v135_v21, %v7113_v22 }
  0xa3   :  { %v138_v23 = vpop.xlane.xlu0 %137 }
  0xa4   :  { %v150_v25 = vrot.slane %v138_v23, %v7113_v22 }
  0xa6   :  { %v152_v26 = vsel %vm151_vm1, %v150_v25, %v146_v24  ;;  %v94_v24 = vld [vmem:[%s8300_s14] sm:$0x3] }
  0xa7   :  { %v155_v27 = vsel %vm154_vm2, %v152_v26, -inf  ;;  %v7235_v25 = vld [vmem:[%s8301_s0] sm:$0xff] }
  0xa8   :  { %156 = vmax.xlane.f32.xlu1 %v155_v27 }
 0x135   :  { %v157_v30 = vpop.xlane.xlu1 %156 }
 0x136   :  { %v162_v31 = vrot.slane %v157_v30, %v7089_v8  ;;  %v166_v32 = vrot.slane %v157_v30, %v7120_v29 }
 0x138   :  { %v169_v33 = vsub.f32 %v135_v21, %v162_v31  ;;  %v170_v34 = vsub.f32 %v138_v23, %v166_v32  ;;  %v7214_v21 = vpack.c.bf16 %v76_v19, %v75_v17  ;;  %v93_v23 = vld [vmem:[%s8299_s13] sm:$0x3] }
 0x139   :  { %v82_v19 = vld [vmem:[%s8303_s9] sm:$0xff] }
 0x13a   :  { %v171_v35 = vmul.f32 1.442695, %v169_v33  ;;  %v173_v36 = vmul.f32 1.442695, %v170_v34  ;;  %6419 = vmatpush3.bf16.msra.mxu1 %v7214_v21 }
 0x13b   :  { %6426 = vmatprep.subr.bf16.mxu1 %v6981_v57 }
 0x13c   :  { %6741 = vpow2.f32 %v171_v35 }
 0x13d   :  { %6743 = vpow2.f32 %v173_v36  ;;  %5843 = vmatmul.mubr.msk.f32.vlgmr.msra.gmra.mrb[2].mxu1 %vm132_vm0, %v93_v23  ;;  %v83_v23 = vld [vmem:[%s8303_s9 + $0x8] sm:$0xff] }
 0x13e   :  { %5864 = vmatprep.mubr.msk.f32.mxu1 %vm6982_vm3, %v6983_v12 }
 0x146   :  { %v6742_v37 = vpop.eup %6741 }
 0x147   :  { %v6744_v38 = vpop.eup %6743  ;;  %178 = vperm.xlu1 %6739, %v6742_v37  }
 0x148   :  { %181 = vperm.xlu0 %6740, %v6744_v38  }
 0x1c6   :  { %v179_v39 = vpop.permute.xlu1 %178 }
 0x1c7   :  { %v182_v40 = vpop.permute.xlu0 %181  ;;  %v186_v41 = vrot.slane %v179_v39, %v7113_v22 }
 0x1c8   :  { %v190_v42 = vrot.slane %v182_v40, %v7113_v22 }
 0x1ca   :  { %v191_v43 = vsel %vm151_vm1, %v190_v42, %v186_v41 }
 0x1cb   :  { %v193_v44 = vsel %vm154_vm2, %v191_v43, 0.0 }
 0x1cc   :  { %194 = vadd.xlane.f32.xlu1 %v193_v44 }
 0x259   :  { %v195_v45 = vpop.xlane.xlu1 %194 }
 0x25a   :  { %v200_v46 = vrot.slane %v195_v45, %v7089_v8  ;;  %v204_v47 = vrot.slane %v195_v45, %v7120_v29 }
 0x25c   :  { %6745 = vrcp.f32 %v200_v46 }
 0x25d   :  { %6747 = vrcp.f32 %v204_v47  ;;  %v382_v47 = vpop.f32.mrb[0].mxu1 }
 0x266   :  { %v6746_v48 = vpop.eup %6745 }
 0x267   :  { %v208_v49 = vmul.f32 %v6746_v48, %v6742_v37  ;;  %v6748_v50 = vpop.eup %6747  ;;  %v5833_v48 = vpop.f32.mrb[1].mxu1 }
 0x268   :  { %v210_v51 = vmul.f32 %v6748_v50, %v6744_v38 }
 0x269   :  { %213 = vperm.xlu0 %6740, %v208_v49   ;;  %v455_v49 = vpop.f32.mrb[2].mxu1 }
 0x26a   :  { %v5844_v50 = vpop.f32.mrb[3].mxu1 }
 0x26d   :  { %218 = vperm.xlu0 %6740, %v210_v51  }
 0x271   :  { %475 = vrot.lane.b32.xlu0 %v94_v24, %s6984_s4  ;;  %v78_v24 = vld [vmem:[%s8304_s8] sm:$0xff] }
 0x2e8   :  { %v214_v26 = vpop.permute.xlu0 %213 }
 0x2e9   :  { %v221_v27 = vmul.f32 %v214_v26, %v7235_v25  ;;  %v7270_v26 = vpack.c.bf16 %v83_v23, %v82_v19 }
 0x2eb   :  { %v224_v30 = vsel %vm223_vm4, %v221_v27, 0.0  ;;  %v79_v27 = vld [vmem:[%s8304_s8 + $0x8] sm:$0xff] }
 0x2ec   :  { %v225_v31 = vrot.slane %v224_v30, 4  ;;  %v219_v32 = vpop.permute.xlu0 %218 }
 0x2ed   :  { %v222_v33 = vmul.f32 %v219_v32, %v7241_v28  ;;  %v7281_v32 = vpack.c.bf16 %v79_v27, %v78_v24 }
 0x2ee   :  { %v226_v34 = vadd.f32 %v225_v31, %v224_v30  ;;  %v84_v30 = vld [vmem:[%s8303_s9 + $0x10] sm:$0xff]  ;;  %v85_v31 = vld [vmem:[%s8303_s9 + $0x18] sm:$0xff] }
 0x2ef   :  { %v231_v35 = vsel %vm223_vm4, %v222_v33, 0.0  ;;  %v80_v33 = vld [vmem:[%s8304_s8 + $0x10] sm:$0xff]  ;;  %6428 = vmatpush3.bf16.msra.mxu1 %v7281_v32 }
 0x2f0   :  { %v227_v36 = vrot.slane %v226_v34, 2  ;;  %v232_v37 = vrot.slane %v231_v35, 4  ;;  %v476_v13 = vpop.permute.xlu0 %475  ;;  %6429 = vmatprep.subr.bf16.mxu1 %v6981_v57 }
 0x2f2   :  { %v228_v38 = vadd.f32 %v227_v36, %v226_v34  ;;  %v233_v39 = vadd.f32 %v232_v37, %v231_v35  ;;  %v81_v34 = vld [vmem:[%s8304_s8 + $0x18] sm:$0xff]  ;;  %v7290_v35 = vpack.c.bf16 %v85_v31, %v84_v30 }
 0x2f3   :  { %v7294_v36 = vpack.c.bf16 %v81_v34, %v80_v33 }
 0x2f4   :  { %v234_v40 = vrot.slane %v233_v39, 2  ;;  %v229_v41 = vrot.slane %v228_v38, 1 }
 0x2f5   :  { %6431 = vmatpush3.bf16.msra.mxu1 %v7294_v36 }
 0x2f6   :  { %v235_v42 = vadd.f32 %v234_v40, %v233_v39  ;;  %v230_v44 = vadd.f32 %v229_v41, %v228_v38  ;;  %6438 = vmatprep.subr.bf16.mxu1 %v6981_v57  ;;  %v96_v40 = vld [vmem:[%s8305_s16] sm:$0x3] }
 0x2f8   :  { %v236_v43 = vrot.slane %v235_v42, 1 }
 0x2fa   :  { %v237_v45 = vadd.f32 %v236_v43, %v235_v42 }
 0x2fc   :  { %v240_v46 = vsel %vm151_vm1, %v237_v45, %v230_v44 }
 0x2fd   :  { %5821 = vmatmul.mubr.msk.f32.vlgmr.msra.gmra.mrb[0].mxu0 %vm223_vm4, %v240_v46 }
 0x2fe   :  { %5853 = vmatprep.mubr.msk.f32.mxu0 %vm6982_vm3, %v6983_v12  ;;  %6422 = vmatpush3.bf16.msra.mxu0 %v7270_v26 }
 0x2ff   :  { %6423 = vmatprep.subr.bf16.mxu0 %v6981_v57 }
 0x302   :  { %6425 = vmatpush3.bf16.msra.mxu0 %v7290_v35 }
 0x303   :  { %6432 = vmatprep.subr.bf16.mxu0 %v6981_v57 }
 0x305   :  { %5854 = vmatmul.mubr.msk.f32.vlgmr.msra.gmra.mrb[2].mxu0 %vm132_vm0, %v7081_v5  ;;  %v7328_v5 = vld [vmem:[%s8306_s10] ss:$0 sm:$0xff] }
 0x306   :  { %5875 = vmatprep.mubr.msk.f32.mxu0 %vm6982_vm3, %v6983_v12 }
 0x3d0   :  { %v309_v51 = vpop.f32.mrb[0].mxu0 }
 0x3d1   :  { %v383_v52 = vadd.f32 %v382_v47, %v309_v51  ;;  %v5822_v53 = vpop.f32.mrb[1].mxu0 }
 0x3d3   :  { %v459_v56 = vadd.f32 %v455_v49, %v383_v52 }
 0x3d5   :  { %v466_v59 = vadd.f32 %v7253_v55, %v459_v56 }
 0x3d7   :  { %6749 = vtanh.f32 %v466_v59  ;;  %v5462_v62 = vmul.f32 -1.442695, %v466_v59 }
 0x3d8   :  { %v563_v41 = vpop.f32.mrb[2].mxu0 }
 0x3d9   :  { %6751 = vpow2.f32 %v5462_v62  ;;  %v5855_v42 = vpop.f32.mrb[3].mxu0 }
 0x3e1   :  { %v6750_v60 = vpop.eup %6749 }
 0x3e2   :  { %480 = vrot.lane.b32.xlu1 %v6750_v60, %s6985_s27 }
 0x3e3   :  { %v6752_v63 = vpop.eup %6751 }
 0x3e4   :  { %v470_v1 = vadd.f32 1.0, %v6752_v63 }
 0x3e6   :  { %6753 = vrcp.f32 %v470_v1  ;;  %v87_v1 = vld [vmem:[%s8307_s11] sm:$0xff] }
 0x3f0   :  { %v6754_v2 = vpop.eup %6753 }
 0x3f1   :  { %v478_v15 = vmul.f32 %v6754_v2, %v476_v13 }
 0x454   :  { %v481_v7 = vpop.permute.xlu1 %480 }
 0x455   :  { %v483_v9 = vmul.f32 %v6754_v2, %v481_v7  ;;  %v89_v7 = vld [vmem:[%s8307_s11 + $0x10] sm:$0xff] }
 0x457   :  { %485 = vrot.lane.b32.xlu0 %v483_v9, %s6984_s4 }
 0x4c9   :  { %v486_v16 = vpop.permute.xlu0 %485 }
 0x4ca   :  { %v7258_v17 = vadd.f32 %v486_v16, %v478_v15  ;;  %v90_v15 = vld [vmem:[%s8307_s11 + $0x18] sm:$0xff] }
 0x4cb   :  { %v7352_v16 = vpack.c.bf16 %v90_v15, %v89_v7 }
 0x4cc   :  { %6755 = vtanh.f32 %v7258_v17 }
 0x4d6   :  { %v6756_v37 = vpop.eup %6755 }
 0x4d7   :  { %491 = vrot.lane.b32.xlu0 %v6756_v37, %s6985_s27 }
 0x549   :  { %v492_v38 = vpop.permute.xlu0 %491 }
 0x54a   :  { %v494_v39 = vmul.f32 %v6754_v2, %v492_v38  ;;  %v88_v2 = vld [vmem:[%s8307_s11 + $0x8] sm:$0xff] }
 0x54b   :  { %v7345_v13 = vpack.c.bf16 %v88_v2, %v87_v1 }
 0x54c   :  { %568 = vrot.lane.b32.xlu0 %v494_v39, %s6984_s4 }
 0x54d   :  { %6434 = vmatpush3.bf16.msra.mxu0 %v7345_v13 }
 0x54e   :  { %6435 = vmatprep.subr.bf16.mxu0 %v6981_v57 }
 0x550   :  { %657 = vrot.lane.b32.xlu0 %v96_v40, %s6984_s4 }
 0x551   :  { %6437 = vmatpush3.bf16.msra.mxu0 %v7352_v16 }
 0x552   :  { %6450 = vmatprep.subr.bf16.mxu0 %v6981_v57 }
 0x5be   :  { %v7311_v43 = vpop.permute.xlu0 %568 }
 0x5bf   :  { %5865 = vmatmul.mubr.msk.f32.vlgmr.msra.gmra.mrb[4].mxu1 %vm132_vm0, %v7311_v43 }
 0x5c0   :  { %6440 = vmatpush3.bf16.msra.mxu1 %v7136_v54  ;;  %5894 = vmatprep.mubr.msk.f32.mxu1 %vm6982_vm3, %v6983_v12 }
 0x5c1   :  { %6441 = vmatprep.subr.bf16.mxu1 %v6981_v57 }
 0x5c2   :  { %v658_v59 = vpop.permute.xlu0 %657 }
 0x5c4   :  { %6443 = vmatpush3.bf16.msra.mxu1 %v7157_v61 }
 0x5c5   :  { %6444 = vmatprep.subr.bf16.mxu1 %v6981_v57 }
 0x5c8   :  { %6446 = vmatpush3.bf16.msra.mxu1 %v7177_v4 }
 0x5c9   :  { %6447 = vmatprep.subr.bf16.mxu1 %v6981_v57 }
 0x5cc   :  { %6449 = vmatpush3.bf16.msra.mxu1 %v7206_v18 }
 0x5cd   :  { %6462 = vmatprep.subr.bf16.mxu1 %v6981_v57 }
 0x692   :  { %v638_v44 = vpop.f32.mrb[4].mxu1 }
 0x693   :  { %v639_v45 = vadd.f32 %v638_v44, %v563_v41  ;;  %v5866_v46 = vpop.f32.mrb[5].mxu1 }
 0x695   :  { %v648_v47 = vadd.f32 %v7328_v5, %v639_v45 }
 0x697   :  { %6757 = vtanh.f32 %v648_v47  ;;  %v5466_v49 = vmul.f32 -1.442695, %v648_v47 }
 0x699   :  { %6759 = vpow2.f32 %v5466_v49 }
 0x6a1   :  { %v6758_v48 = vpop.eup %6757 }
 0x6a2   :  { %662 = vrot.lane.b32.xlu1 %v6758_v48, %s6985_s27 }
 0x6a3   :  { %v6760_v50 = vpop.eup %6759 }
 0x6a4   :  { %v652_v51 = vadd.f32 1.0, %v6760_v50 }
 0x6a6   :  { %6761 = vrcp.f32 %v652_v51  ;;  %v7386_v51 = vld [vmem:[%s8308_s12] ss:$0 sm:$0xff] }
 0x6b0   :  { %v6762_v52 = vpop.eup %6761 }
 0x6b1   :  { %v660_v60 = vmul.f32 %v6762_v52, %v658_v59 }
 0x714   :  { %v663_v53 = vpop.permute.xlu1 %662 }
 0x715   :  { %v665_v56 = vmul.f32 %v6762_v52, %v663_v53 }
 0x717   :  { %667 = vrot.lane.b32.xlu1 %v665_v56, %s6984_s4 }
 0x789   :  { %v668_v62 = vpop.permute.xlu1 %667 }
 0x78a   :  { %v7333_v63 = vadd.f32 %v668_v62, %v660_v60 }
 0x78c   :  { %6763 = vtanh.f32 %v7333_v63 }
 0x796   :  { %v6764_v9 = vpop.eup %6763 }
 0x797   :  { %673 = vrot.lane.b32.xlu0 %v6764_v9, %s6985_s27 }
 0x809   :  { %v674_v19 = vpop.permute.xlu0 %673 }
 0x80a   :  { %v676_v23 = vmul.f32 %v6762_v52, %v674_v19 }
 0x80c   :  { %v816_v24 = vrot.slane %v676_v23, %v7084_v6  ;;  %684 = vrot.lane.b32.xlu1 %v676_v23, %s6984_s4 }
 0x80e   :  { %v817_v27 = vcombine.high %v816_v24, %v816_v24  ;;  %v824_v30 = vrot.slane %v816_v24, %v7084_v6 }
 0x810   :  { %v835_v31 = vrot.slane %v824_v30, %v7089_v8  ;;  %v831_v33 = vrot.slane %v817_v27, %v7084_v6 }
 0x812   :  { %840 = vrot.lane.b32.xlu0 %v835_v31, %s6984_s4  ;;  %v839_v34 = vrot.slane %v831_v33, %v7089_v8 }
 0x814   :  { %842 = vrot.lane.b32.xlu1 %v839_v34, %s6984_s4 }
 0x87e   :  { %v7365_v37 = vpop.permute.xlu1 %684 }
 0x87f   :  { %5876 = vmatmul.mubr.msk.f32.vlgmr.msra.gmra.mrb[4].mxu0 %vm132_vm0, %v7365_v37 }
 0x880   :  { %6452 = vmatpush3.bf16.msra.mxu0 %v7146_v58  ;;  %5905 = vmatprep.mubr.msk.f32.mxu0 %vm6982_vm3, %v6983_v12 }
 0x881   :  { %6453 = vmatprep.subr.bf16.mxu0 %v6981_v57 }
 0x884   :  { %v841_v38 = vpop.permute.xlu0 %840  ;;  %6455 = vmatpush3.bf16.msra.mxu0 %v7166_v0 }
 0x885   :  { %v846_v39 = vmul.f32 %v841_v38, %v7095_v11  ;;  %6456 = vmatprep.subr.bf16.mxu0 %v6981_v57 }
 0x886   :  { %v843_v40 = vpop.permute.xlu1 %842 }
 0x887   :  { %v847_v41 = vmul.f32 %v843_v40, %v7102_v14  ;;  %v848_v42 = vsel %vm132_vm0, %v846_v39, 0.0 }
 0x888   :  { %849 = vadd.xlane.f32.xlu0 %v848_v42 }
 0x889   :  { %v851_v44 = vsel %vm132_vm0, %v847_v41, 0.0 }
 0x88a   :  { %852 = vadd.xlane.f32.xlu1 %v851_v44 }
 0x915   :  { %v850_v45 = vpop.xlane.xlu0 %849 }
 0x916   :  { %v859_v47 = vrot.slane %v850_v45, %v7113_v22 }
 0x917   :  { %v853_v46 = vpop.xlane.xlu1 %852 }
 0x918   :  { %v863_v48 = vrot.slane %v853_v46, %v7113_v22 }
 0x91a   :  { %v864_v49 = vsel %vm151_vm1, %v863_v48, %v859_v47 }
 0x91b   :  { %v866_v50 = vsel %vm154_vm2, %v864_v49, -inf }
 0x91c   :  { %867 = vmax.xlane.f32.xlu0 %v866_v50 }
 0x952   :  { %v754_v52 = vpop.f32.mrb[4].mxu0 }
 0x953   :  { %v7389_v53 = vadd.f32 %v7386_v51, %v754_v52  ;;  %v5877_v56 = vpop.f32.mrb[5].mxu0 }
 0x955   :  { %v759_v59 = vsel %vm758_vm5, %v7389_v53, -inf }
 0x956   :  { %760 = vmax.xlane.f32.xlu0 %v759_v59 }
 0x9a9   :  { %v868_v60 = vpop.xlane.xlu0 %867 }
 0x9aa   :  { %v873_v62 = vrot.slane %v868_v60, %v7089_v8  ;;  %v877_v1 = vrot.slane %v868_v60, %v7120_v29 }
 0x9ac   :  { %v880_v2 = vsub.f32 %v850_v45, %v873_v62  ;;  %v881_v7 = vsub.f32 %v853_v46, %v877_v1  ;;  %v799_v1 = vsub.s32 2, %v7076_v3 }
 0x9ae   :  { %v882_v9 = vmul.f32 1.442695, %v880_v2  ;;  %v884_v15 = vmul.f32 1.442695, %v881_v7  ;;  %v60_v2 = vld [vmem:[%s8309_s2] sm:$0x7] }
 0x9b0   :  { %6765 = vpow2.f32 %v882_v9 }
 0x9b1   :  { %6767 = vpow2.f32 %v884_v15 }
 0x9ba   :  { %v6766_v19 = vpop.eup %6765 }
 0x9bb   :  { %v6768_v23 = vpop.eup %6767  ;;  %889 = vperm.xlu1 %6739, %v6766_v19  }
 0x9bc   :  { %892 = vperm.xlu0 %6740, %v6768_v23  }
 0x9e3   :  { %v7395_v24 = vpop.xlane.xlu0 %760 }
 0x9e4   :  { %vm773_vm6 = vcmp.eq.f32.partialorder %v7389_v53, %v7395_v24 }
 0x9e5   :  { %v774_v27 = vsel %vm773_vm6, %v7109_v20, 3 }
 0x9e6   :  { %v775_v30 = vsel %vm758_vm5, %v774_v27, 2147483647  ;;  %v7412_v27 = vrot.slane %v60_v2, %v7120_v29 }
 0x9e7   :  { %v777_v31 = vshra.s32 %v775_v30, 16  ;;  %v776_v44 = vand.u32 65535, %v775_v30  ;;  %v7414_v30 = vrot.slane %v60_v2, %v799_v1 }
 0x9e9   :  { %v779_v33 = vcvt.s32.f32 %v777_v31  ;;  %v778_v46 = vcvt.s32.f32 %v776_v44 }
 0x9eb   :  { %780 = vmin.xlane.f32.xlu0 %v779_v33 }
 0xa3a   :  { %v890_v34 = vpop.permute.xlu1 %889 }
 0xa3b   :  { %v897_v38 = vrot.slane %v890_v34, %v7113_v22  ;;  %v893_v39 = vpop.permute.xlu0 %892 }
 0xa3c   :  { %v901_v40 = vrot.slane %v893_v39, %v7113_v22 }
 0xa3e   :  { %v902_v41 = vsel %vm151_vm1, %v901_v40, %v897_v38 }
 0xa3f   :  { %v904_v42 = vsel %vm154_vm2, %v902_v41, 0.0 }
 0xa40   :  { %905 = vadd.xlane.f32.xlu1 %v904_v42 }
 0xa78   :  { %v781_v45 = vpop.xlane.xlu0 %780 }
 0xa79   :  { %vm782_vm7 = vcmp.eq.f32.partialorder %v779_v33, %v781_v45  ;;  %v787_v62 = vcvt.f32.s32 %v781_v45 }
 0xa7a   :  { %v783_v47 = vsel %vm782_vm7, %v778_v46, inf }
 0xa7b   :  { %784 = vmin.xlane.f32.xlu1 %v783_v47  ;;  %v788_v9 = vshll.u32 %v787_v62, 16 }
 0xacd   :  { %v906_v48 = vpop.xlane.xlu1 %905 }
 0xace   :  { %v911_v49 = vrot.slane %v906_v48, %v7089_v8  ;;  %v915_v50 = vrot.slane %v906_v48, %v7120_v29 }
 0xad0   :  { %6769 = vrcp.f32 %v911_v49 }
 0xad1   :  { %6771 = vrcp.f32 %v915_v50 }
 0xada   :  { %v6770_v52 = vpop.eup %6769 }
 0xadb   :  { %v6772_v56 = vpop.eup %6771  ;;  %v919_v59 = vmul.f32 %v6770_v52, %v6766_v19  ;;  %v7417_v19 = vrot.slane %v60_v2, %v7089_v8 }
 0xadc   :  { %v921_v60 = vmul.f32 %v6772_v56, %v6768_v23 }
 0xadd   :  { %924 = vperm.xlu0 %6740, %v919_v59  }
 0xade   :  { %929 = vperm.xlu1 %6739, %v921_v60  }
 0xb08   :  { %v785_v7 = vpop.xlane.xlu1 %784 }
 0xb09   :  { %v786_v15 = vcvt.f32.s32 %v785_v7 }
 0xb0b   :  { %v789_v31 = vadd.s32 %v788_v9, %v786_v15 }
 0xb0d   :  { %vm790_vm8 = vcmp.eq.s32.totalorder %v789_v31, 1  ;;  %vm802_vm9 = vcmp.eq.s32.totalorder %v789_v31, 0 }
 0xb0e   :  { %v801_v3 = vsel %vm790_vm8, %v7412_v27, %v7414_v30 }
 0xb0f   :  { %v809_v23 = vsel %vm802_vm9, %v7417_v19, %v801_v3 }
 0xb10   :  { %5906 = vmatmul.mubr.msk.f32.vlgmr.msra.gmra.mrb[6].mxu0 %vm132_vm0, %v809_v23 }
 0xb11   :  { %6458 = vmatpush3.bf16.msra.mxu0 %v7186_v10  ;;  %5916 = vmatprep.mubr.msk.f32.mxu0 %vm6982_vm3, %v6983_v12 }
 0xb12   :  { %6459 = vmatprep.subr.bf16.mxu0 %v6981_v57 }
 0xb15   :  { %6461 = vmatpush3.bf16.msra.mxu0 %v7214_v21 }
 0xb16   :  { %6468 = vmatprep.subr.bf16.mxu0 %v6981_v57 }
 0xb18   :  { %5917 = vmatmul.mubr.msk.f32.vlgmr.msra.gmra.mrb[8].mxu0 %vm132_vm0, %v7311_v43 }
 0xb19   :  { %6470 = vmatpush3.bf16.msra.mxu0 %v7281_v32  ;;  %5938 = vmatprep.mubr.msk.f32.mxu0 %vm6982_vm3, %v6983_v12 }
 0xb1a   :  { %6471 = vmatprep.subr.bf16.mxu0 %v6981_v57 }
 0xb1d   :  { %6473 = vmatpush3.bf16.msra.mxu0 %v7294_v36 }
 0xb1e   :  { %6480 = vmatprep.subr.bf16.mxu0 %v6981_v57 }
 0xb5c   :  { %v925_v33 = vpop.permute.xlu0 %924 }
 0xb5d   :  { %v930_v34 = vpop.permute.xlu1 %929  ;;  %v932_v38 = vmul.f32 %v925_v33, %v7235_v25 }
 0xb5e   :  { %v933_v39 = vmul.f32 %v930_v34, %v7241_v28 }
 0xb5f   :  { %v934_v40 = vsel %vm223_vm4, %v932_v38, 0.0 }
 0xb60   :  { %v941_v43 = vsel %vm223_vm4, %v933_v39, 0.0  ;;  %v935_v41 = vrot.slane %v934_v40, 4 }
 0xb61   :  { %v942_v42 = vrot.slane %v941_v43, 4 }
 0xb62   :  { %v936_v44 = vadd.f32 %v935_v41, %v934_v40 }
 0xb63   :  { %v943_v45 = vadd.f32 %v942_v42, %v941_v43 }
 0xb64   :  { %v937_v46 = vrot.slane %v936_v44, 2 }
 0xb65   :  { %v944_v47 = vrot.slane %v943_v45, 2 }
 0xb66   :  { %v938_v48 = vadd.f32 %v937_v46, %v936_v44 }
 0xb67   :  { %v945_v49 = vadd.f32 %v944_v47, %v943_v45 }
 0xb68   :  { %v939_v50 = vrot.slane %v938_v48, 1 }
 0xb69   :  { %v946_v52 = vrot.slane %v945_v49, 1 }
 0xb6a   :  { %v940_v56 = vadd.f32 %v939_v50, %v938_v48 }
 0xb6b   :  { %v947_v59 = vadd.f32 %v946_v52, %v945_v49 }
 0xb6d   :  { %v950_v60 = vsel %vm151_vm1, %v947_v59, %v940_v56 }
 0xb6e   :  { %5895 = vmatmul.mubr.msk.f32.vlgmr.msra.gmra.mrb[6].mxu1 %vm223_vm4, %v950_v60 }
 0xb6f   :  { %6464 = vmatpush3.bf16.msra.mxu1 %v7270_v26  ;;  %5927 = vmatprep.mubr.msk.f32.mxu1 %vm6982_vm3, %v6983_v12 }
 0xb70   :  { %6465 = vmatprep.subr.bf16.mxu1 %v6981_v57 }
 0xb73   :  { %6467 = vmatpush3.bf16.msra.mxu1 %v7290_v35 }
 0xb74   :  { %6474 = vmatprep.subr.bf16.mxu1 %v6981_v57 }
 0xb76   :  { %5928 = vmatmul.mubr.msk.f32.vlgmr.msra.gmra.mrb[8].mxu1 %vm132_vm0, %v7365_v37 }
 0xb77   :  { %6476 = vmatpush3.bf16.msra.mxu1 %v7345_v13  ;;  %5949 = vmatprep.mubr.msk.f32.mxu1 %vm6982_vm3, %v6983_v12 }
 0xb78   :  { %6477 = vmatprep.subr.bf16.mxu1 %v6981_v57 }
 0xb7b   :  { %6479 = vmatpush3.bf16.msra.mxu1 %v7352_v16 }
 0xb7c   :  { %6492 = vmatprep.subr.bf16.mxu1 %v6981_v57 }
 0xbe3   :  { %v1092_v62 = vpop.f32.mrb[6].mxu0 }
 0xbe4   :  { %v5907_v1 = vpop.f32.mrb[7].mxu0 }
 0xbeb   :  { %v1162_v2 = vpop.f32.mrb[8].mxu0 }
 0xbec   :  { %v5918_v7 = vpop.f32.mrb[9].mxu0 }
 0xc41   :  { %v1019_v9 = vpop.f32.mrb[6].mxu1 }
 0xc42   :  { %v1093_v15 = vadd.f32 %v1092_v62, %v1019_v9  ;;  %v5896_v31 = vpop.f32.mrb[7].mxu1 }
 0xc44   :  { %v1166_v3 = vadd.f32 %v1162_v2, %v1093_v15 }
 0xc46   :  { %v1167_v37 = vadd.f32 %v7253_v55, %v1166_v3 }
 0xc48   :  { %6773 = vtanh.f32 %v1167_v37  ;;  %v5472_v38 = vmul.f32 -1.442695, %v1167_v37 }
 0xc49   :  { %v1258_v23 = vpop.f32.mrb[8].mxu1 }
 0xc4a   :  { %v5929_v33 = vpop.f32.mrb[9].mxu1  ;;  %6775 = vpow2.f32 %v5472_v38 }
 0xc52   :  { %v6774_v34 = vpop.eup %6773 }
 0xc53   :  { %1177 = vrot.lane.b32.xlu1 %v6774_v34, %s6985_s27 }
 0xc54   :  { %v6776_v39 = vpop.eup %6775 }
 0xc55   :  { %v1171_v40 = vadd.f32 1.0, %v6776_v39 }
 0xc57   :  { %6777 = vrcp.f32 %v1171_v40 }
 0xc61   :  { %v6778_v43 = vpop.eup %6777 }
 0xc62   :  { %v1175_v44 = vmul.f32 %v6778_v43, %v7258_v17 }
 0xcc5   :  { %v1178_v41 = vpop.permute.xlu1 %1177 }
 0xcc6   :  { %v1180_v42 = vmul.f32 %v6778_v43, %v1178_v41 }
 0xcc8   :  { %1182 = vrot.lane.b32.xlu0 %v1180_v42, %s6984_s4 }
 0xd3a   :  { %v1183_v45 = vpop.permute.xlu0 %1182 }
 0xd3b   :  { %v7461_v46 = vadd.f32 %v1183_v45, %v1175_v44 }
 0xd3d   :  { %6779 = vtanh.f32 %v7461_v46 }
 0xd47   :  { %v6780_v47 = vpop.eup %6779 }
 0xd48   :  { %1188 = vrot.lane.b32.xlu1 %v6780_v47, %s6985_s27 }
 0xdba   :  { %v1189_v48 = vpop.permute.xlu1 %1188 }
 0xdbb   :  { %v1191_v49 = vmul.f32 %v6778_v43, %v1189_v48 }
 0xdbd   :  { %1263 = vrot.lane.b32.xlu0 %v1191_v49, %s6984_s4 }
 0xe2f   :  { %v7466_v50 = vpop.permute.xlu0 %1263 }
 0xe30   :  { %5939 = vmatmul.mubr.msk.f32.vlgmr.msra.gmra.mrb[10].mxu0 %vm132_vm0, %v7466_v50 }
 0xe31   :  { %6482 = vmatpush3.bf16.msra.mxu0 %v7136_v54  ;;  %5968 = vmatprep.mubr.msk.f32.mxu0 %vm6982_vm3, %v6983_v12 }
 0xe32   :  { %6483 = vmatprep.subr.bf16.mxu0 %v6981_v57 }
 0xe35   :  { %6485 = vmatpush3.bf16.msra.mxu0 %v7157_v61 }
 0xe36   :  { %6486 = vmatprep.subr.bf16.mxu0 %v6981_v57 }
 0xe39   :  { %6488 = vmatpush3.bf16.msra.mxu0 %v7177_v4 }
 0xe3a   :  { %6489 = vmatprep.subr.bf16.mxu0 %v6981_v57 }
 0xe3d   :  { %6491 = vmatpush3.bf16.msra.mxu0 %v7206_v18 }
 0xe3e   :  { %6504 = vmatprep.subr.bf16.mxu0 %v6981_v57 }
 0xf03   :  { %v1333_v17 = vpop.f32.mrb[10].mxu0 }
 0xf04   :  { %v1334_v52 = vadd.f32 %v1333_v17, %v1258_v23  ;;  %v5940_v56 = vpop.f32.mrb[11].mxu0 }
 0xf06   :  { %v1337_v59 = vadd.f32 %v7328_v5, %v1334_v52 }
 0xf08   :  { %6781 = vtanh.f32 %v1337_v59  ;;  %v5475_v62 = vmul.f32 -1.442695, %v1337_v59 }
 0xf0a   :  { %6783 = vpow2.f32 %v5475_v62 }
 0xf12   :  { %v6782_v60 = vpop.eup %6781 }
 0xf13   :  { %1347 = vrot.lane.b32.xlu1 %v6782_v60, %s6985_s27 }
 0xf14   :  { %v6784_v1 = vpop.eup %6783 }
 0xf15   :  { %v1341_v2 = vadd.f32 1.0, %v6784_v1 }
 0xf17   :  { %6785 = vrcp.f32 %v1341_v2 }
 0xf21   :  { %v6786_v7 = vpop.eup %6785 }
 0xf22   :  { %v1345_v31 = vmul.f32 %v6786_v7, %v7333_v63 }
 0xf85   :  { %v1348_v9 = vpop.permute.xlu1 %1347 }
 0xf86   :  { %v1350_v15 = vmul.f32 %v6786_v7, %v1348_v9 }
 0xf88   :  { %1352 = vrot.lane.b32.xlu0 %v1350_v15, %s6984_s4 }
 0xffa   :  { %v1353_v3 = vpop.permute.xlu0 %1352 }
 0xffb   :  { %v7484_v37 = vadd.f32 %v1353_v3, %v1345_v31 }
 0xffd   :  { %6787 = vtanh.f32 %v7484_v37 }
0x1007   :  { %v6788_v23 = vpop.eup %6787 }
0x1008   :  { %1358 = vrot.lane.b32.xlu1 %v6788_v23, %s6985_s27 }
0x107a   :  { %v1359_v33 = vpop.permute.xlu1 %1358 }
0x107b   :  { %v1361_v34 = vmul.f32 %v6786_v7, %v1359_v33 }
0x107d   :  { %v1483_v38 = vrot.slane %v1361_v34, %v7084_v6  ;;  %1363 = vrot.lane.b32.xlu0 %v1361_v34, %s6984_s4 }
0x107f   :  { %v1484_v39 = vcombine.high %v1483_v38, %v1483_v38  ;;  %v1491_v40 = vrot.slane %v1483_v38, %v7084_v6 }
0x1081   :  { %v1502_v43 = vrot.slane %v1491_v40, %v7089_v8  ;;  %v1498_v63 = vrot.slane %v1484_v39, %v7084_v6 }
0x1083   :  { %1507 = vrot.lane.b32.xlu1 %v1502_v43, %s6984_s4  ;;  %v1506_v41 = vrot.slane %v1498_v63, %v7089_v8 }
0x1085   :  { %1509 = vrot.lane.b32.xlu0 %v1506_v41, %s6984_s4 }
0x10ef   :  { %v7496_v42 = vpop.permute.xlu0 %1363 }
0x10f0   :  { %5950 = vmatmul.mubr.msk.f32.vlgmr.msra.gmra.mrb[10].mxu1 %vm132_vm0, %v7496_v42 }
0x10f1   :  { %6494 = vmatpush3.bf16.msra.mxu1 %v7146_v58  ;;  %5979 = vmatprep.mubr.msk.f32.mxu1 %vm6982_vm3, %v6983_v12 }
0x10f2   :  { %6495 = vmatprep.subr.bf16.mxu1 %v6981_v57 }
0x10f5   :  { %v1508_v44 = vpop.permute.xlu1 %1507  ;;  %6497 = vmatpush3.bf16.msra.mxu1 %v7166_v0 }
0x10f6   :  { %v1513_v45 = vmul.f32 %v1508_v44, %v7095_v11  ;;  %6498 = vmatprep.subr.bf16.mxu1 %v6981_v57 }
0x10f7   :  { %v1510_v47 = vpop.permute.xlu0 %1509 }
0x10f8   :  { %v1514_v48 = vmul.f32 %v1510_v47, %v7102_v14  ;;  %v1515_v49 = vsel %vm132_vm0, %v1513_v45, 0.0 }
0x10f9   :  { %1516 = vadd.xlane.f32.xlu1 %v1515_v49 }
0x10fa   :  { %v1518_v17 = vsel %vm132_vm0, %v1514_v48, 0.0 }
0x10fb   :  { %1519 = vadd.xlane.f32.xlu0 %v1518_v17 }
0x1186   :  { %v1517_v52 = vpop.xlane.xlu1 %1516 }
0x1187   :  { %v1526_v59 = vrot.slane %v1517_v52, %v7113_v22 }
0x1188   :  { %v1520_v56 = vpop.xlane.xlu0 %1519 }
0x1189   :  { %v1530_v60 = vrot.slane %v1520_v56, %v7113_v22 }
0x118b   :  { %v1531_v62 = vsel %vm151_vm1, %v1530_v60, %v1526_v59 }
0x118c   :  { %v1533_v11 = vsel %vm154_vm2, %v1531_v62, -inf }
0x118d   :  { %1534 = vmax.xlane.f32.xlu0 %v1533_v11 }
0x11c3   :  { %v1433_v1 = vpop.f32.mrb[10].mxu1 }
0x11c4   :  { %v7515_v14 = vadd.f32 %v7386_v51, %v1433_v1  ;;  %v5951_v2 = vpop.f32.mrb[11].mxu1 }
0x11c6   :  { %v1437_v7 = vsel %vm758_vm5, %v7515_v14, -inf }
0x11c7   :  { %1438 = vmax.xlane.f32.xlu1 %v1437_v7 }
0x121a   :  { %v1535_v9 = vpop.xlane.xlu0 %1534 }
0x121b   :  { %v1540_v15 = vrot.slane %v1535_v9, %v7089_v8  ;;  %v1544_v31 = vrot.slane %v1535_v9, %v7120_v29 }
0x121d   :  { %v1547_v3 = vsub.f32 %v1517_v52, %v1540_v15  ;;  %v1548_v23 = vsub.f32 %v1520_v56, %v1544_v31 }
0x121f   :  { %v1549_v33 = vmul.f32 1.442695, %v1547_v3  ;;  %v1551_v34 = vmul.f32 1.442695, %v1548_v23 }
0x1221   :  { %6789 = vpow2.f32 %v1549_v33 }
0x1222   :  { %6791 = vpow2.f32 %v1551_v34 }
0x122b   :  { %v6790_v38 = vpop.eup %6789 }
0x122c   :  { %v6792_v39 = vpop.eup %6791  ;;  %1556 = vperm.xlu0 %6740, %v6790_v38  }
0x122d   :  { %1559 = vperm.xlu1 %6739, %v6792_v39  }
0x1254   :  { %v7521_v40 = vpop.xlane.xlu1 %1438 }
0x1255   :  { %vm1452_vm10 = vcmp.eq.f32.partialorder %v7515_v14, %v7521_v40 }
0x1256   :  { %v1453_v43 = vsel %vm1452_vm10, %v7109_v20, 3 }
0x1257   :  { %v1454_v63 = vsel %vm758_vm5, %v1453_v43, 2147483647 }
0x1258   :  { %v1456_v41 = vshra.s32 %v1454_v63, 16  ;;  %v1455_v56 = vand.u32 65535, %v1454_v63 }
0x125a   :  { %v1458_v44 = vcvt.s32.f32 %v1456_v41  ;;  %v1457_v60 = vcvt.s32.f32 %v1455_v56 }
0x125c   :  { %1459 = vmin.xlane.f32.xlu0 %v1458_v44 }
0x12ab   :  { %v1557_v45 = vpop.permute.xlu0 %1556 }
0x12ac   :  { %v1560_v47 = vpop.permute.xlu1 %1559  ;;  %v1564_v48 = vrot.slane %v1557_v45, %v7113_v22 }
0x12ad   :  { %v1568_v49 = vrot.slane %v1560_v47, %v7113_v22 }
0x12af   :  { %v1569_v17 = vsel %vm151_vm1, %v1568_v49, %v1564_v48 }
0x12b0   :  { %v1571_v52 = vsel %vm154_vm2, %v1569_v17, 0.0 }
0x12b1   :  { %1572 = vadd.xlane.f32.xlu1 %v1571_v52 }
0x12e9   :  { %v1460_v59 = vpop.xlane.xlu0 %1459 }
0x12ea   :  { %vm1461_vm11 = vcmp.eq.f32.partialorder %v1458_v44, %v1460_v59  ;;  %v1466_v3 = vcvt.f32.s32 %v1460_v59 }
0x12eb   :  { %v1462_v62 = vsel %vm1461_vm11, %v1457_v60, inf }
0x12ec   :  { %1463 = vmin.xlane.f32.xlu0 %v1462_v62  ;;  %v1467_v33 = vshll.u32 %v1466_v3, 16 }
0x133e   :  { %v1573_v11 = vpop.xlane.xlu1 %1572 }
0x133f   :  { %v1578_v1 = vrot.slane %v1573_v11, %v7089_v8  ;;  %v1582_v2 = vrot.slane %v1573_v11, %v7120_v29 }
0x1341   :  { %6793 = vrcp.f32 %v1578_v1 }
0x1342   :  { %6795 = vrcp.f32 %v1582_v2 }
0x134b   :  { %v6794_v7 = vpop.eup %6793 }
0x134c   :  { %v6796_v9 = vpop.eup %6795  ;;  %v1586_v15 = vmul.f32 %v6794_v7, %v6790_v38 }
0x134d   :  { %v1588_v31 = vmul.f32 %v6796_v9, %v6792_v39 }
0x134e   :  { %1591 = vperm.xlu1 %6739, %v1586_v15  }
0x134f   :  { %1596 = vperm.xlu0 %6740, %v1588_v31  }
0x1379   :  { %v1464_v23 = vpop.xlane.xlu0 %1463 }
0x137a   :  { %v1465_v34 = vcvt.f32.s32 %v1464_v23 }
0x137c   :  { %v1468_v43 = vadd.s32 %v1467_v33, %v1465_v34 }
0x137e   :  { %vm1469_vm12 = vcmp.eq.s32.totalorder %v1468_v43, 1  ;;  %vm1473_vm13 = vcmp.eq.s32.totalorder %v1468_v43, 0 }
0x137f   :  { %v1472_v63 = vsel %vm1469_vm12, %v7412_v27, %v7414_v30 }
0x1380   :  { %v1476_v41 = vsel %vm1473_vm13, %v7417_v19, %v1472_v63 }
0x1381   :  { %5980 = vmatmul.mubr.msk.f32.vlgmr.msra.gmra.mrb[12].mxu1 %vm132_vm0, %v1476_v41 }
0x1382   :  { %6500 = vmatpush3.bf16.msra.mxu1 %v7186_v10  ;;  %5990 = vmatprep.mubr.msk.f32.mxu1 %vm6982_vm3, %v6983_v12 }
0x1383   :  { %6501 = vmatprep.subr.bf16.mxu1 %v6981_v57 }
0x1386   :  { %6503 = vmatpush3.bf16.msra.mxu1 %v7214_v21 }
0x1387   :  { %6510 = vmatprep.subr.bf16.mxu1 %v6981_v57 }
0x1389   :  { %5991 = vmatmul.mubr.msk.f32.vlgmr.msra.gmra.mrb[14].mxu1 %vm132_vm0, %v7466_v50 }
0x138a   :  { %6512 = vmatpush3.bf16.msra.mxu1 %v7281_v32  ;;  %6012 = vmatprep.mubr.msk.f32.mxu1 %vm6982_vm3, %v6983_v12 }
0x138b   :  { %6513 = vmatprep.subr.bf16.mxu1 %v6981_v57 }
0x138e   :  { %6515 = vmatpush3.bf16.msra.mxu1 %v7294_v36 }
0x138f   :  { %6522 = vmatprep.subr.bf16.mxu1 %v6981_v57 }
0x13cd   :  { %v1592_v38 = vpop.permute.xlu1 %1591 }
0x13ce   :  { %v1599_v39 = vmul.f32 %v1592_v38, %v7235_v25  ;;  %v1597_v44 = vpop.permute.xlu0 %1596 }
0x13cf   :  { %v1600_v45 = vmul.f32 %v1597_v44, %v7241_v28 }
0x13d0   :  { %v1601_v47 = vsel %vm223_vm4, %v1599_v39, 0.0 }
0x13d1   :  { %v1602_v50 = vrot.slane %v1601_v47, 4  ;;  %v1608_v48 = vsel %vm223_vm4, %v1600_v45, 0.0 }
0x13d2   :  { %v1609_v49 = vrot.slane %v1608_v48, 4 }
0x13d3   :  { %v1603_v17 = vadd.f32 %v1602_v50, %v1601_v47 }
0x13d4   :  { %v1610_v52 = vadd.f32 %v1609_v49, %v1608_v48 }
0x13d5   :  { %v1604_v56 = vrot.slane %v1603_v17, 2 }
0x13d6   :  { %v1611_v59 = vrot.slane %v1610_v52, 2 }
0x13d7   :  { %v1605_v60 = vadd.f32 %v1604_v56, %v1603_v17 }
0x13d8   :  { %v1612_v62 = vadd.f32 %v1611_v59, %v1610_v52 }
0x13d9   :  { %v1606_v11 = vrot.slane %v1605_v60, 1 }
0x13da   :  { %v1613_v1 = vrot.slane %v1612_v62, 1 }
0x13db   :  { %v1607_v2 = vadd.f32 %v1606_v11, %v1605_v60 }
0x13dc   :  { %v1614_v7 = vadd.f32 %v1613_v1, %v1612_v62 }
0x13de   :  { %v1617_v25 = vsel %vm151_vm1, %v1614_v7, %v1607_v2 }
0x13df   :  { %5969 = vmatmul.mubr.msk.f32.vlgmr.msra.gmra.mrb[12].mxu0 %vm223_vm4, %v1617_v25 }
0x13e0   :  { %6506 = vmatpush3.bf16.msra.mxu0 %v7270_v26  ;;  %6001 = vmatprep.mubr.msk.f32.mxu0 %vm6982_vm3, %v6983_v12 }
0x13e1   :  { %6507 = vmatprep.subr.bf16.mxu0 %v6981_v57 }
0x13e4   :  { %6509 = vmatpush3.bf16.msra.mxu0 %v7290_v35 }
0x13e5   :  { %6516 = vmatprep.subr.bf16.mxu0 %v6981_v57 }
0x13e7   :  { %6002 = vmatmul.mubr.msk.f32.vlgmr.msra.gmra.mrb[14].mxu0 %vm132_vm0, %v7496_v42 }
0x13e8   :  { %6518 = vmatpush3.bf16.msra.mxu0 %v7345_v13  ;;  %6023 = vmatprep.mubr.msk.f32.mxu0 %vm6982_vm3, %v6983_v12 }
0x13e9   :  { %6519 = vmatprep.subr.bf16.mxu0 %v6981_v57 }
0x13ec   :  { %6521 = vmatpush3.bf16.msra.mxu0 %v7352_v16 }
0x13ed   :  { %6534 = vmatprep.subr.bf16.mxu0 %v6981_v57 }
0x1454   :  { %v1759_v28 = vpop.f32.mrb[12].mxu1 }
0x1455   :  { %v5981_v9 = vpop.f32.mrb[13].mxu1 }
0x145c   :  { %v1829_v15 = vpop.f32.mrb[14].mxu1 }
0x145d   :  { %v5992_v31 = vpop.f32.mrb[15].mxu1 }
0x14b2   :  { %v1686_v3 = vpop.f32.mrb[12].mxu0 }
0x14b3   :  { %v1760_v23 = vadd.f32 %v1759_v28, %v1686_v3  ;;  %v5970_v33 = vpop.f32.mrb[13].mxu0 }
0x14b5   :  { %v1833_v34 = vadd.f32 %v1829_v15, %v1760_v23 }
0x14b7   :  { %v1834_v42 = vadd.f32 %v7253_v55, %v1833_v34 }
0x14b9   :  { %6797 = vtanh.f32 %v1834_v42  ;;  %v5481_v38 = vmul.f32 -1.442695, %v1834_v42 }
0x14ba   :  { %v1925_v43 = vpop.f32.mrb[14].mxu0 }
0x14bb   :  { %v6003_v63 = vpop.f32.mrb[15].mxu0  ;;  %6799 = vpow2.f32 %v5481_v38 }
0x14c3   :  { %v6798_v41 = vpop.eup %6797 }
0x14c4   :  { %1844 = vrot.lane.b32.xlu1 %v6798_v41, %s6985_s27 }
0x14c5   :  { %v6800_v39 = vpop.eup %6799 }
0x14c6   :  { %v1838_v44 = vadd.f32 1.0, %v6800_v39 }
0x14c8   :  { %6801 = vrcp.f32 %v1838_v44 }
0x14d2   :  { %v6802_v45 = vpop.eup %6801 }
0x14d3   :  { %v1842_v48 = vmul.f32 %v6802_v45, %v7461_v46 }
0x1536   :  { %v1845_v47 = vpop.permute.xlu1 %1844 }
0x1537   :  { %v1847_v50 = vmul.f32 %v6802_v45, %v1845_v47 }
0x1539   :  { %1849 = vrot.lane.b32.xlu1 %v1847_v50, %s6984_s4 }
0x15ab   :  { %v1850_v49 = vpop.permute.xlu1 %1849 }
0x15ac   :  { %v7575_v55 = vadd.f32 %v1850_v49, %v1842_v48  ;;  %v7629_v48 = vld [vmem:[%s8315_s29 + $0x8] sm:$0xff] }
0x15ae   :  { %6803 = vtanh.f32 %v7575_v55 }
0x15b8   :  { %v6804_v17 = vpop.eup %6803 }
0x15b9   :  { %1855 = vrot.lane.b32.xlu0 %v6804_v17, %s6985_s27 }
0x162b   :  { %v1856_v52 = vpop.permute.xlu0 %1855 }
0x162c   :  { %v1858_v56 = vmul.f32 %v6802_v45, %v1856_v52  ;;  %v7622_v45 = vld [vmem:[%s8315_s29] sm:$0xff] }
0x162e   :  { %1930 = vrot.lane.b32.xlu1 %v1858_v56, %s6984_s4 }
0x16a0   :  { %v7580_v59 = vpop.permute.xlu1 %1930 }
0x16a1   :  { %6013 = vmatmul.mubr.msk.f32.vlgmr.msra.gmra.mrb[16].mxu1 %vm132_vm0, %v7580_v59 }
0x16a2   :  { %6524 = vmatpush3.bf16.msra.mxu1 %v7136_v54  ;;  %6042 = vmatprep.mubr.msk.f32.mxu1 %vm6982_vm3, %v6983_v12 }
0x16a3   :  { %6525 = vmatprep.subr.bf16.mxu1 %v6981_v57 }
0x16a6   :  { %6527 = vmatpush3.bf16.msra.mxu1 %v7157_v61 }
0x16a7   :  { %6528 = vmatprep.subr.bf16.mxu1 %v6981_v57 }
0x16aa   :  { %6530 = vmatpush3.bf16.msra.mxu1 %v7177_v4 }
0x16ab   :  { %6531 = vmatprep.subr.bf16.mxu1 %v6981_v57 }
0x16ae   :  { %6533 = vmatpush3.bf16.msra.mxu1 %v7206_v18 }
0x16af   :  { %6546 = vmatprep.subr.bf16.mxu1 %v6981_v57 }
0x1774   :  { %v2000_v46 = vpop.f32.mrb[16].mxu1 }
0x1775   :  { %v2001_v60 = vadd.f32 %v2000_v46, %v1925_v43  ;;  %v6014_v62 = vpop.f32.mrb[17].mxu1 }
0x1777   :  { %v2004_v11 = vadd.f32 %v7328_v5, %v2001_v60 }
0x1779   :  { %6805 = vtanh.f32 %v2004_v11  ;;  %v5484_v2 = vmul.f32 -1.442695, %v2004_v11 }
0x177b   :  { %6807 = vpow2.f32 %v5484_v2 }
0x1783   :  { %v6806_v1 = vpop.eup %6805 }
0x1784   :  { %2014 = vrot.lane.b32.xlu0 %v6806_v1, %s6985_s27 }
0x1785   :  { %v6808_v7 = vpop.eup %6807 }
0x1786   :  { %v2008_v25 = vadd.f32 1.0, %v6808_v7 }
0x1788   :  { %6809 = vrcp.f32 %v2008_v25 }
0x1792   :  { %v6810_v28 = vpop.eup %6809 }
0x1793   :  { %v2012_v31 = vmul.f32 %v6810_v28, %v7484_v37 }
0x17f6   :  { %v2015_v9 = vpop.permute.xlu0 %2014 }
0x17f7   :  { %v2017_v15 = vmul.f32 %v6810_v28, %v2015_v9 }
0x17f9   :  { %2019 = vrot.lane.b32.xlu1 %v2017_v15, %s6984_s4 }
0x186b   :  { %v2020_v3 = vpop.permute.xlu1 %2019 }
0x186c   :  { %v7598_v23 = vadd.f32 %v2020_v3, %v2012_v31 }
0x186e   :  { %6811 = vtanh.f32 %v7598_v23 }
0x1878   :  { %v6812_v5 = vpop.eup %6811 }
0x1879   :  { %2025 = vrot.lane.b32.xlu0 %v6812_v5, %s6985_s27 }
0x18eb   :  { %v2026_v33 = vpop.permute.xlu0 %2025 }
0x18ec   :  { %v2028_v34 = vmul.f32 %v6810_v28, %v2026_v33 }
0x18ee   :  { %v2150_v42 = vrot.slane %v2028_v34, %v7084_v6  ;;  %2030 = vrot.lane.b32.xlu1 %v2028_v34, %s6984_s4 }
0x18f0   :  { %v2151_v43 = vcombine.high %v2150_v42, %v2150_v42  ;;  %v2158_v63 = vrot.slane %v2150_v42, %v7084_v6 }
0x18f2   :  { %v2169_v41 = vrot.slane %v2158_v63, %v7089_v8  ;;  %v2165_v37 = vrot.slane %v2151_v43, %v7084_v6 }
0x18f4   :  { %2174 = vrot.lane.b32.xlu0 %v2169_v41, %s6984_s4  ;;  %v2173_v38 = vrot.slane %v2165_v37, %v7089_v8 }
0x18f6   :  { %2176 = vrot.lane.b32.xlu1 %v2173_v38, %s6984_s4 }
0x1960   :  { %v7610_v39 = vpop.permute.xlu1 %2030 }
0x1961   :  { %6024 = vmatmul.mubr.msk.f32.vlgmr.msra.gmra.mrb[16].mxu0 %vm132_vm0, %v7610_v39 }
0x1962   :  { %6536 = vmatpush3.bf16.msra.mxu0 %v7146_v58  ;;  %6053 = vmatprep.mubr.msk.f32.mxu0 %vm6982_vm3, %v6983_v12 }
0x1963   :  { %6537 = vmatprep.subr.bf16.mxu0 %v6981_v57 }
0x1966   :  { %v2175_v44 = vpop.permute.xlu0 %2174  ;;  %6539 = vmatpush3.bf16.msra.mxu0 %v7166_v0 }
0x1967   :  { %v2180_v47 = vmul.f32 %v7622_v45, %v2175_v44  ;;  %6540 = vmatprep.subr.bf16.mxu0 %v6981_v57 }
0x1968   :  { %v2177_v50 = vpop.permute.xlu1 %2176 }
0x1969   :  { %v2181_v49 = vmul.f32 %v7629_v48, %v2177_v50  ;;  %v2182_v17 = vsel %vm132_vm0, %v2180_v47, 0.0 }
0x196a   :  { %2183 = vadd.xlane.f32.xlu0 %v2182_v17 }
0x196b   :  { %v2185_v52 = vsel %vm132_vm0, %v2181_v49, 0.0 }
0x196c   :  { %2186 = vadd.xlane.f32.xlu1 %v2185_v52 }
0x19f7   :  { %v2184_v56 = vpop.xlane.xlu0 %2183 }
0x19f8   :  { %v2193_v60 = vrot.slane %v2184_v56, %v7113_v22 }
0x19f9   :  { %v2187_v46 = vpop.xlane.xlu1 %2186 }
0x19fa   :  { %v2197_v62 = vrot.slane %v2187_v46, %v7113_v22 }
0x19fc   :  { %v2198_v11 = vsel %vm151_vm1, %v2197_v62, %v2193_v60 }
0x19fd   :  { %v2200_v1 = vsel %vm154_vm2, %v2198_v11, -inf }
0x19fe   :  { %2201 = vmax.xlane.f32.xlu0 %v2200_v1 }
0x1a34   :  { %v2100_v2 = vpop.f32.mrb[16].mxu0 }
0x1a35   :  { %v7639_v7 = vadd.f32 %v7386_v51, %v2100_v2  ;;  %v6025_v25 = vpop.f32.mrb[17].mxu0 }
0x1a37   :  { %v2104_v28 = vsel %vm758_vm5, %v7639_v7, -inf }
0x1a38   :  { %2105 = vmax.xlane.f32.xlu0 %v2104_v28 }
0x1a8b   :  { %v2202_v9 = vpop.xlane.xlu0 %2201 }
0x1a8c   :  { %v2207_v15 = vrot.slane %v2202_v9, %v7089_v8  ;;  %v2211_v31 = vrot.slane %v2202_v9, %v7120_v29 }
0x1a8e   :  { %v2214_v3 = vsub.f32 %v2184_v56, %v2207_v15  ;;  %v2215_v5 = vsub.f32 %v2187_v46, %v2211_v31 }
0x1a90   :  { %v2216_v33 = vmul.f32 1.442695, %v2214_v3  ;;  %v2218_v34 = vmul.f32 1.442695, %v2215_v5 }
0x1a92   :  { %6813 = vpow2.f32 %v2216_v33 }
0x1a93   :  { %6815 = vpow2.f32 %v2218_v34 }
0x1a9c   :  { %v6814_v42 = vpop.eup %6813 }
0x1a9d   :  { %v6816_v43 = vpop.eup %6815  ;;  %2223 = vperm.xlu1 %6739, %v6814_v42  }
0x1a9e   :  { %2226 = vperm.xlu0 %6740, %v6816_v43  }
0x1ac5   :  { %v7645_v51 = vpop.xlane.xlu0 %2105 }
0x1ac6   :  { %vm2119_vm14 = vcmp.eq.f32.partialorder %v7639_v7, %v7645_v51 }
0x1ac7   :  { %v2120_v63 = vsel %vm2119_vm14, %v7109_v20, 3 }
0x1ac8   :  { %v2121_v41 = vsel %vm758_vm5, %v2120_v63, 2147483647 }
0x1ac9   :  { %v2123_v37 = vshra.s32 %v2121_v41, 16  ;;  %v2122_v56 = vand.u32 65535, %v2121_v41 }
0x1acb   :  { %v2125_v38 = vcvt.s32.f32 %v2123_v37  ;;  %v2124_v60 = vcvt.s32.f32 %v2122_v56  ;;  %v7678_v37 = vld [vmem:[%s8301_s0] sm:$0xff] }
0x1acd   :  { %2126 = vmin.xlane.f32.xlu0 %v2125_v38 }
0x1b1c   :  { %v2224_v44 = vpop.permute.xlu1 %2223 }
0x1b1d   :  { %v2231_v47 = vrot.slane %v2224_v44, %v7113_v22  ;;  %v2227_v50 = vpop.permute.xlu0 %2226 }
0x1b1e   :  { %v2235_v49 = vrot.slane %v2227_v50, %v7113_v22 }
0x1b20   :  { %v2236_v17 = vsel %vm151_vm1, %v2235_v49, %v2231_v47 }
0x1b21   :  { %v2238_v52 = vsel %vm154_vm2, %v2236_v17, 0.0 }
0x1b22   :  { %2239 = vadd.xlane.f32.xlu1 %v2238_v52 }
0x1b5a   :  { %v2127_v46 = vpop.xlane.xlu0 %2126 }
0x1b5b   :  { %vm2128_vm15 = vcmp.eq.f32.partialorder %v2125_v38, %v2127_v46  ;;  %v2133_v31 = vcvt.f32.s32 %v2127_v46  ;;  %v7684_v38 = vld [vmem:[%s8301_s0 + $0x8] sm:$0xff] }
0x1b5c   :  { %v2129_v62 = vsel %vm2128_vm15, %v2124_v60, inf }
0x1b5d   :  { %2130 = vmin.xlane.f32.xlu1 %v2129_v62  ;;  %v2134_v5 = vshll.u32 %v2133_v31, 16 }
0x1baf   :  { %v2240_v11 = vpop.xlane.xlu1 %2239 }
0x1bb0   :  { %v2245_v1 = vrot.slane %v2240_v11, %v7089_v8  ;;  %v2249_v2 = vrot.slane %v2240_v11, %v7120_v29 }
0x1bb2   :  { %6817 = vrcp.f32 %v2245_v1 }
0x1bb3   :  { %6819 = vrcp.f32 %v2249_v2 }
0x1bbc   :  { %v6818_v25 = vpop.eup %6817 }
0x1bbd   :  { %v6820_v28 = vpop.eup %6819  ;;  %v2253_v9 = vmul.f32 %v6818_v25, %v6814_v42 }
0x1bbe   :  { %v2255_v15 = vmul.f32 %v6820_v28, %v6816_v43 }
0x1bbf   :  { %2258 = vperm.xlu0 %6740, %v2253_v9  }
0x1bc0   :  { %2263 = vperm.xlu1 %6739, %v2255_v15  }
0x1bea   :  { %v2131_v3 = vpop.xlane.xlu1 %2130 }
0x1beb   :  { %v2132_v33 = vcvt.f32.s32 %v2131_v3 }
0x1bed   :  { %v2135_v34 = vadd.s32 %v2134_v5, %v2132_v33 }
0x1bef   :  { %vm2136_vm6 = vcmp.eq.s32.totalorder %v2135_v34, 1  ;;  %vm2140_vm7 = vcmp.eq.s32.totalorder %v2135_v34, 0 }
0x1bf0   :  { %v2139_v63 = vsel %vm2136_vm6, %v7412_v27, %v7414_v30 }
0x1bf1   :  { %v2143_v41 = vsel %vm2140_vm7, %v7417_v19, %v2139_v63 }
0x1bf2   :  { %6054 = vmatmul.mubr.msk.f32.vlgmr.msra.gmra.mrb[18].mxu0 %vm132_vm0, %v2143_v41 }
0x1bf3   :  { %6542 = vmatpush3.bf16.msra.mxu0 %v7186_v10  ;;  %6064 = vmatprep.mubr.msk.f32.mxu0 %vm6982_vm3, %v6983_v12 }
0x1bf4   :  { %6543 = vmatprep.subr.bf16.mxu0 %v6981_v57 }
0x1bf7   :  { %6545 = vmatpush3.bf16.msra.mxu0 %v7214_v21 }
0x1bf8   :  { %6552 = vmatprep.subr.bf16.mxu0 %v6981_v57 }
0x1bfa   :  { %6065 = vmatmul.mubr.msk.f32.vlgmr.msra.gmra.mrb[20].mxu0 %vm132_vm0, %v7580_v59 }
0x1bfb   :  { %6554 = vmatpush3.bf16.msra.mxu0 %v7281_v32  ;;  %6086 = vmatprep.mubr.msk.f32.mxu0 %vm6982_vm3, %v6983_v12 }
0x1bfc   :  { %6555 = vmatprep.subr.bf16.mxu0 %v6981_v57 }
0x1bff   :  { %6557 = vmatpush3.bf16.msra.mxu0 %v7294_v36 }
0x1c00   :  { %6564 = vmatprep.subr.bf16.mxu0 %v6981_v57 }
0x1c3e   :  { %v2259_v42 = vpop.permute.xlu0 %2258 }
0x1c3f   :  { %v2264_v43 = vpop.permute.xlu1 %2263  ;;  %v2266_v59 = vmul.f32 %v7678_v37, %v2259_v42 }
0x1c40   :  { %v2267_v44 = vmul.f32 %v7684_v38, %v2264_v43 }
0x1c41   :  { %v2268_v47 = vsel %vm223_vm4, %v2266_v59, 0.0 }
0x1c42   :  { %v2275_v50 = vsel %vm223_vm4, %v2267_v44, 0.0  ;;  %v2269_v49 = vrot.slane %v2268_v47, 4 }
0x1c43   :  { %v2276_v17 = vrot.slane %v2275_v50, 4 }
0x1c44   :  { %v2270_v52 = vadd.f32 %v2269_v49, %v2268_v47 }
0x1c45   :  { %v2277_v56 = vadd.f32 %v2276_v17, %v2275_v50 }
0x1c46   :  { %v2271_v46 = vrot.slane %v2270_v52, 2 }
0x1c47   :  { %v2278_v60 = vrot.slane %v2277_v56, 2 }
0x1c48   :  { %v2272_v62 = vadd.f32 %v2271_v46, %v2270_v52 }
0x1c49   :  { %v2279_v11 = vadd.f32 %v2278_v60, %v2277_v56 }
0x1c4a   :  { %v2273_v1 = vrot.slane %v2272_v62, 1 }
0x1c4b   :  { %v2280_v2 = vrot.slane %v2279_v11, 1 }
0x1c4c   :  { %v2274_v25 = vadd.f32 %v2273_v1, %v2272_v62 }
0x1c4d   :  { %v2281_v28 = vadd.f32 %v2280_v2, %v2279_v11 }
0x1c4f   :  { %v2284_v9 = vsel %vm151_vm1, %v2281_v28, %v2274_v25 }
0x1c50   :  { %6043 = vmatmul.mubr.msk.f32.vlgmr.msra.gmra.mrb[18].mxu1 %vm223_vm4, %v2284_v9 }
0x1c51   :  { %6548 = vmatpush3.bf16.msra.mxu1 %v7270_v26  ;;  %6075 = vmatprep.mubr.msk.f32.mxu1 %vm6982_vm3, %v6983_v12 }
0x1c52   :  { %6549 = vmatprep.subr.bf16.mxu1 %v6981_v57 }
0x1c55   :  { %6551 = vmatpush3.bf16.msra.mxu1 %v7290_v35 }
0x1c56   :  { %6558 = vmatprep.subr.bf16.mxu1 %v6981_v57 }
0x1c58   :  { %6076 = vmatmul.mubr.msk.f32.vlgmr.msra.gmra.mrb[20].mxu1 %vm132_vm0, %v7610_v39  ;;  %v7708_v39 = vld [vmem:[%s8302_s7] ss:$0 sm:$0xff] }
0x1c59   :  { %6560 = vmatpush3.bf16.msra.mxu1 %v7345_v13  ;;  %6097 = vmatprep.mubr.msk.f32.mxu1 %vm6982_vm3, %v6983_v12 }
0x1c5a   :  { %6561 = vmatprep.subr.bf16.mxu1 %v6981_v57 }
0x1c5d   :  { %6563 = vmatpush3.bf16.msra.mxu1 %v7352_v16 }
0x1c5e   :  { %6576 = vmatprep.subr.bf16.mxu1 %v6981_v57 }
0x1cc5   :  { %v2426_v15 = vpop.f32.mrb[18].mxu0 }
0x1cc6   :  { %v6055_v31 = vpop.f32.mrb[19].mxu0 }
0x1ccd   :  { %v2496_v3 = vpop.f32.mrb[20].mxu0 }
0x1cce   :  { %v6066_v5 = vpop.f32.mrb[21].mxu0 }
0x1d23   :  { %v2353_v33 = vpop.f32.mrb[18].mxu1 }
0x1d24   :  { %v2427_v34 = vadd.f32 %v2426_v15, %v2353_v33  ;;  %v6044_v63 = vpop.f32.mrb[19].mxu1  ;;  %v7736_v15 = vld [vmem:[%s8306_s10] ss:$0 sm:$0xff] }
0x1d26   :  { %v2500_v41 = vadd.f32 %v2496_v3, %v2427_v34 }
0x1d28   :  { %v2501_v42 = vadd.f32 %v7708_v39, %v2500_v41 }
0x1d2a   :  { %6821 = vtanh.f32 %v2501_v42  ;;  %v5490_v47 = vmul.f32 -1.442695, %v2501_v42 }
0x1d2b   :  { %v2592_v43 = vpop.f32.mrb[20].mxu1 }
0x1d2c   :  { %v6077_v59 = vpop.f32.mrb[21].mxu1  ;;  %6823 = vpow2.f32 %v5490_v47 }
0x1d34   :  { %v6822_v44 = vpop.eup %6821 }
0x1d35   :  { %2511 = vrot.lane.b32.xlu1 %v6822_v44, %s6985_s27 }
0x1d36   :  { %v6824_v50 = vpop.eup %6823 }
0x1d37   :  { %v2505_v49 = vadd.f32 1.0, %v6824_v50 }
0x1d39   :  { %6825 = vrcp.f32 %v2505_v49 }
0x1d43   :  { %v6826_v17 = vpop.eup %6825 }
0x1d44   :  { %v2509_v46 = vmul.f32 %v6826_v17, %v7575_v55 }
0x1da7   :  { %v2512_v52 = vpop.permute.xlu1 %2511 }
0x1da8   :  { %v2514_v56 = vmul.f32 %v6826_v17, %v2512_v52 }
0x1daa   :  { %2516 = vrot.lane.b32.xlu0 %v2514_v56, %s6984_s4 }
0x1e1c   :  { %v2517_v60 = vpop.permute.xlu0 %2516 }
0x1e1d   :  { %v7714_v62 = vadd.f32 %v2517_v60, %v2509_v46 }
0x1e1f   :  { %6827 = vtanh.f32 %v7714_v62 }
0x1e29   :  { %v6828_v11 = vpop.eup %6827 }
0x1e2a   :  { %2522 = vrot.lane.b32.xlu1 %v6828_v11, %s6985_s27 }
0x1e9c   :  { %v2523_v1 = vpop.permute.xlu1 %2522 }
0x1e9d   :  { %v2525_v2 = vmul.f32 %v6826_v17, %v2523_v1 }
0x1e9f   :  { %2597 = vrot.lane.b32.xlu0 %v2525_v2, %s6984_s4 }
0x1f11   :  { %v7719_v25 = vpop.permute.xlu0 %2597 }
0x1f12   :  { %6087 = vmatmul.mubr.msk.f32.vlgmr.msra.gmra.mrb[22].mxu0 %vm132_vm0, %v7719_v25 }
0x1f13   :  { %6566 = vmatpush3.bf16.msra.mxu0 %v7136_v54  ;;  %6116 = vmatprep.mubr.msk.f32.mxu0 %vm6982_vm3, %v6983_v12 }
0x1f14   :  { %6567 = vmatprep.subr.bf16.mxu0 %v6981_v57 }
0x1f17   :  { %6569 = vmatpush3.bf16.msra.mxu0 %v7157_v61 }
0x1f18   :  { %6570 = vmatprep.subr.bf16.mxu0 %v6981_v57 }
0x1f1b   :  { %6572 = vmatpush3.bf16.msra.mxu0 %v7177_v4 }
0x1f1c   :  { %6573 = vmatprep.subr.bf16.mxu0 %v6981_v57 }
0x1f1f   :  { %6575 = vmatpush3.bf16.msra.mxu0 %v7206_v18 }
0x1f20   :  { %6588 = vmatprep.subr.bf16.mxu0 %v6981_v57 }
0x1fe5   :  { %v2667_v55 = vpop.f32.mrb[22].mxu0 }
0x1fe6   :  { %v2668_v28 = vadd.f32 %v2667_v55, %v2592_v43  ;;  %v6088_v9 = vpop.f32.mrb[23].mxu0 }
0x1fe8   :  { %v2671_v31 = vadd.f32 %v7736_v15, %v2668_v28 }
0x1fea   :  { %6829 = vtanh.f32 %v2671_v31  ;;  %v5493_v5 = vmul.f32 -1.442695, %v2671_v31 }
0x1fec   :  { %6831 = vpow2.f32 %v5493_v5 }
0x1ff4   :  { %v6830_v3 = vpop.eup %6829 }
0x1ff5   :  { %2681 = vrot.lane.b32.xlu1 %v6830_v3, %s6985_s27 }
0x1ff6   :  { %v6832_v33 = vpop.eup %6831 }
0x1ff7   :  { %v2675_v34 = vadd.f32 1.0, %v6832_v33 }
0x1ff9   :  { %6833 = vrcp.f32 %v2675_v34 }
0x2003   :  { %v6834_v63 = vpop.eup %6833 }
0x2004   :  { %v2679_v43 = vmul.f32 %v6834_v63, %v7598_v23 }
0x2067   :  { %v2682_v41 = vpop.permute.xlu1 %2681 }
0x2068   :  { %v2684_v42 = vmul.f32 %v6834_v63, %v2682_v41 }
0x206a   :  { %2686 = vrot.lane.b32.xlu0 %v2684_v42, %s6984_s4 }
0x20dc   :  { %v2687_v59 = vpop.permute.xlu0 %2686 }
0x20dd   :  { %v7742_v44 = vadd.f32 %v2687_v59, %v2679_v43  ;;  %v7775_v43 = vld [vmem:[%s8308_s12] ss:$0 sm:$0xff] }
0x20df   :  { %6835 = vtanh.f32 %v7742_v44 }
0x20e9   :  { %v6836_v47 = vpop.eup %6835 }
0x20ea   :  { %2692 = vrot.lane.b32.xlu1 %v6836_v47, %s6985_s27 }
0x215c   :  { %v2693_v50 = vpop.permute.xlu1 %2692 }
0x215d   :  { %v2695_v49 = vmul.f32 %v6834_v63, %v2693_v50 }
0x215f   :  { %v2817_v17 = vrot.slane %v2695_v49, %v7084_v6  ;;  %2697 = vrot.lane.b32.xlu0 %v2695_v49, %s6984_s4 }
0x2161   :  { %v2818_v52 = vcombine.high %v2817_v17, %v2817_v17  ;;  %v2825_v56 = vrot.slane %v2817_v17, %v7084_v6 }
0x2163   :  { %v2836_v46 = vrot.slane %v2825_v56, %v7089_v8  ;;  %v2832_v23 = vrot.slane %v2818_v52, %v7084_v6 }
0x2165   :  { %2841 = vrot.lane.b32.xlu1 %v2836_v46, %s6984_s4  ;;  %v2840_v60 = vrot.slane %v2832_v23, %v7089_v8 }
0x2167   :  { %2843 = vrot.lane.b32.xlu0 %v2840_v60, %s6984_s4 }
0x21d1   :  { %v7754_v11 = vpop.permute.xlu0 %2697 }
0x21d2   :  { %6098 = vmatmul.mubr.msk.f32.vlgmr.msra.gmra.mrb[22].mxu1 %vm132_vm0, %v7754_v11 }
0x21d3   :  { %6578 = vmatpush3.bf16.msra.mxu1 %v7146_v58  ;;  %6127 = vmatprep.mubr.msk.f32.mxu1 %vm6982_vm3, %v6983_v12 }
0x21d4   :  { %6579 = vmatprep.subr.bf16.mxu1 %v6981_v57 }
0x21d7   :  { %v2842_v1 = vpop.permute.xlu1 %2841  ;;  %6581 = vmatpush3.bf16.msra.mxu1 %v7166_v0 }
0x21d8   :  { %v2847_v2 = vmul.f32 %v7622_v45, %v2842_v1  ;;  %6582 = vmatprep.subr.bf16.mxu1 %v6981_v57 }
0x21d9   :  { %v2844_v55 = vpop.permute.xlu0 %2843 }
0x21da   :  { %v2848_v28 = vmul.f32 %v7629_v48, %v2844_v55  ;;  %v2849_v9 = vsel %vm132_vm0, %v2847_v2, 0.0 }
0x21db   :  { %2850 = vadd.xlane.f32.xlu1 %v2849_v9 }
0x21dc   :  { %v2852_v31 = vsel %vm132_vm0, %v2848_v28, 0.0 }
0x21dd   :  { %2853 = vadd.xlane.f32.xlu0 %v2852_v31 }
0x2268   :  { %v2851_v3 = vpop.xlane.xlu1 %2850 }
0x2269   :  { %v2860_v33 = vrot.slane %v2851_v3, %v7113_v22 }
0x226a   :  { %v2854_v5 = vpop.xlane.xlu0 %2853 }
0x226b   :  { %v2864_v34 = vrot.slane %v2854_v5, %v7113_v22 }
0x226d   :  { %v2865_v63 = vsel %vm151_vm1, %v2864_v34, %v2860_v33 }
0x226e   :  { %v2867_v41 = vsel %vm154_vm2, %v2865_v63, -inf }
0x226f   :  { %2868 = vmax.xlane.f32.xlu0 %v2867_v41 }
0x22a5   :  { %v2767_v42 = vpop.f32.mrb[22].mxu1 }
0x22a6   :  { %v7778_v59 = vadd.f32 %v7775_v43, %v2767_v42  ;;  %v6099_v47 = vpop.f32.mrb[23].mxu1 }
0x22a8   :  { %v2771_v50 = vsel %vm758_vm5, %v7778_v59, -inf }
0x22a9   :  { %2772 = vmax.xlane.f32.xlu1 %v2771_v50 }
0x22fc   :  { %v2869_v49 = vpop.xlane.xlu0 %2868 }
0x22fd   :  { %v2874_v17 = vrot.slane %v2869_v49, %v7089_v8  ;;  %v2878_v52 = vrot.slane %v2869_v49, %v7120_v29 }
0x22ff   :  { %v2881_v56 = vsub.f32 %v2851_v3, %v2874_v17  ;;  %v2882_v46 = vsub.f32 %v2854_v5, %v2878_v52 }
0x2301   :  { %v2883_v23 = vmul.f32 1.442695, %v2881_v56  ;;  %v2885_v60 = vmul.f32 1.442695, %v2882_v46 }
0x2303   :  { %6837 = vpow2.f32 %v2883_v23 }
0x2304   :  { %6839 = vpow2.f32 %v2885_v60 }
0x230d   :  { %v6838_v1 = vpop.eup %6837 }
0x230e   :  { %v6840_v2 = vpop.eup %6839  ;;  %2890 = vperm.xlu0 %6740, %v6838_v1  }
0x230f   :  { %2893 = vperm.xlu1 %6739, %v6840_v2  }
0x2336   :  { %v7784_v55 = vpop.xlane.xlu1 %2772 }
0x2337   :  { %vm2786_vm8 = vcmp.eq.f32.partialorder %v7778_v59, %v7784_v55 }
0x2338   :  { %v2787_v28 = vsel %vm2786_vm8, %v7109_v20, 3 }
0x2339   :  { %v2788_v9 = vsel %vm758_vm5, %v2787_v28, 2147483647 }
0x233a   :  { %v2790_v31 = vshra.s32 %v2788_v9, 16  ;;  %v2789_v47 = vand.u32 65535, %v2788_v9 }
0x233c   :  { %v2792_v3 = vcvt.s32.f32 %v2790_v31  ;;  %v2791_v49 = vcvt.s32.f32 %v2789_v47 }
0x233e   :  { %2793 = vmin.xlane.f32.xlu0 %v2792_v3 }
0x238d   :  { %v2891_v5 = vpop.permute.xlu0 %2890 }
0x238e   :  { %v2894_v33 = vpop.permute.xlu1 %2893  ;;  %v2898_v34 = vrot.slane %v2891_v5, %v7113_v22 }
0x238f   :  { %v2902_v63 = vrot.slane %v2894_v33, %v7113_v22 }
0x2391   :  { %v2903_v41 = vsel %vm151_vm1, %v2902_v63, %v2898_v34 }
0x2392   :  { %v2905_v42 = vsel %vm154_vm2, %v2903_v41, 0.0 }
0x2393   :  { %2906 = vadd.xlane.f32.xlu1 %v2905_v42 }
0x23cb   :  { %v2794_v50 = vpop.xlane.xlu0 %2793 }
0x23cc   :  { %vm2795_vm9 = vcmp.eq.f32.partialorder %v2792_v3, %v2794_v50  ;;  %v2800_v5 = vcvt.f32.s32 %v2794_v50 }
0x23cd   :  { %v2796_v17 = vsel %vm2795_vm9, %v2791_v49, inf }
0x23ce   :  { %2797 = vmin.xlane.f32.xlu0 %v2796_v17  ;;  %v2801_v33 = vshll.u32 %v2800_v5, 16 }
0x2420   :  { %v2907_v52 = vpop.xlane.xlu1 %2906 }
0x2421   :  { %v2912_v56 = vrot.slane %v2907_v52, %v7089_v8  ;;  %v2916_v46 = vrot.slane %v2907_v52, %v7120_v29 }
0x2423   :  { %6841 = vrcp.f32 %v2912_v56 }
0x2424   :  { %6843 = vrcp.f32 %v2916_v46 }
0x242d   :  { %v6842_v23 = vpop.eup %6841 }
0x242e   :  { %v6844_v60 = vpop.eup %6843  ;;  %v2920_v28 = vmul.f32 %v6842_v23, %v6838_v1 }
0x242f   :  { %v2922_v31 = vmul.f32 %v6844_v60, %v6840_v2 }
0x2430   :  { %2925 = vperm.xlu1 %6739, %v2920_v28  }
0x2431   :  { %2930 = vperm.xlu0 %6740, %v2922_v31  }
0x245b   :  { %v2798_v9 = vpop.xlane.xlu0 %2797 }
0x245c   :  { %v2799_v34 = vcvt.f32.s32 %v2798_v9 }
0x245e   :  { %v2802_v3 = vadd.s32 %v2801_v33, %v2799_v34 }
0x2460   :  { %vm2803_vm10 = vcmp.eq.s32.totalorder %v2802_v3, 1  ;;  %vm2807_vm11 = vcmp.eq.s32.totalorder %v2802_v3, 0 }
0x2461   :  { %v2806_v63 = vsel %vm2803_vm10, %v7412_v27, %v7414_v30 }
0x2462   :  { %v2810_v41 = vsel %vm2807_vm11, %v7417_v19, %v2806_v63 }
0x2463   :  { %6128 = vmatmul.mubr.msk.f32.vlgmr.msra.gmra.mrb[24].mxu1 %vm132_vm0, %v2810_v41 }
0x2464   :  { %6584 = vmatpush3.bf16.msra.mxu1 %v7186_v10  ;;  %6138 = vmatprep.mubr.msk.f32.mxu1 %vm6982_vm3, %v6983_v12 }
0x2465   :  { %6585 = vmatprep.subr.bf16.mxu1 %v6981_v57 }
0x2468   :  { %6587 = vmatpush3.bf16.msra.mxu1 %v7214_v21 }
0x2469   :  { %6594 = vmatprep.subr.bf16.mxu1 %v6981_v57 }
0x246b   :  { %6139 = vmatmul.mubr.msk.f32.vlgmr.msra.gmra.mrb[26].mxu1 %vm132_vm0, %v7719_v25 }
0x246c   :  { %6596 = vmatpush3.bf16.msra.mxu1 %v7281_v32  ;;  %6160 = vmatprep.mubr.msk.f32.mxu1 %vm6982_vm3, %v6983_v12 }
0x246d   :  { %6597 = vmatprep.subr.bf16.mxu1 %v6981_v57 }
0x2470   :  { %6599 = vmatpush3.bf16.msra.mxu1 %v7294_v36 }
0x2471   :  { %6606 = vmatprep.subr.bf16.mxu1 %v6981_v57 }
0x24af   :  { %v2926_v1 = vpop.permute.xlu1 %2925 }
0x24b0   :  { %v2933_v2 = vmul.f32 %v7678_v37, %v2926_v1  ;;  %v2931_v42 = vpop.permute.xlu0 %2930 }
0x24b1   :  { %v2934_v47 = vmul.f32 %v7684_v38, %v2931_v42 }
0x24b2   :  { %v2935_v50 = vsel %vm223_vm4, %v2933_v2, 0.0 }
0x24b3   :  { %v2936_v25 = vrot.slane %v2935_v50, 4  ;;  %v2942_v49 = vsel %vm223_vm4, %v2934_v47, 0.0 }
0x24b4   :  { %v2943_v17 = vrot.slane %v2942_v49, 4 }
0x24b5   :  { %v2937_v52 = vadd.f32 %v2936_v25, %v2935_v50 }
0x24b6   :  { %v2944_v56 = vadd.f32 %v2943_v17, %v2942_v49 }
0x24b7   :  { %v2938_v46 = vrot.slane %v2937_v52, 2 }
0x24b8   :  { %v2945_v23 = vrot.slane %v2944_v56, 2 }
0x24b9   :  { %v2939_v60 = vadd.f32 %v2938_v46, %v2937_v52 }
0x24ba   :  { %v2946_v28 = vadd.f32 %v2945_v23, %v2944_v56 }
0x24bb   :  { %v2940_v31 = vrot.slane %v2939_v60, 1 }
0x24bc   :  { %v2947_v5 = vrot.slane %v2946_v28, 1 }
0x24bd   :  { %v2941_v9 = vadd.f32 %v2940_v31, %v2939_v60 }
0x24be   :  { %v2948_v33 = vadd.f32 %v2947_v5, %v2946_v28 }
0x24c0   :  { %v2951_v34 = vsel %vm151_vm1, %v2948_v33, %v2941_v9 }
0x24c1   :  { %6117 = vmatmul.mubr.msk.f32.vlgmr.msra.gmra.mrb[24].mxu0 %vm223_vm4, %v2951_v34 }
0x24c2   :  { %6590 = vmatpush3.bf16.msra.mxu0 %v7270_v26  ;;  %6149 = vmatprep.mubr.msk.f32.mxu0 %vm6982_vm3, %v6983_v12 }
0x24c3   :  { %6591 = vmatprep.subr.bf16.mxu0 %v6981_v57 }
0x24c6   :  { %6593 = vmatpush3.bf16.msra.mxu0 %v7290_v35 }
0x24c7   :  { %6600 = vmatprep.subr.bf16.mxu0 %v6981_v57 }
0x24c9   :  { %6150 = vmatmul.mubr.msk.f32.vlgmr.msra.gmra.mrb[26].mxu0 %vm132_vm0, %v7754_v11 }
0x24ca   :  { %6602 = vmatpush3.bf16.msra.mxu0 %v7345_v13  ;;  %6171 = vmatprep.mubr.msk.f32.mxu0 %vm6982_vm3, %v6983_v12 }
0x24cb   :  { %6603 = vmatprep.subr.bf16.mxu0 %v6981_v57 }
0x24ce   :  { %6605 = vmatpush3.bf16.msra.mxu0 %v7352_v16 }
0x24cf   :  { %6618 = vmatprep.subr.bf16.mxu0 %v6981_v57 }
0x2536   :  { %v3093_v3 = vpop.f32.mrb[24].mxu1 }
0x2537   :  { %v6129_v63 = vpop.f32.mrb[25].mxu1 }
0x253e   :  { %v3163_v41 = vpop.f32.mrb[26].mxu1 }
0x253f   :  { %v6140_v1 = vpop.f32.mrb[27].mxu1 }
0x2594   :  { %v3020_v2 = vpop.f32.mrb[24].mxu0 }
0x2595   :  { %v3094_v42 = vadd.f32 %v3093_v3, %v3020_v2  ;;  %v6118_v47 = vpop.f32.mrb[25].mxu0 }
0x2597   :  { %v3167_v50 = vadd.f32 %v3163_v41, %v3094_v42 }
0x2599   :  { %v3168_v11 = vadd.f32 %v7708_v39, %v3167_v50 }
0x259b   :  { %6845 = vtanh.f32 %v3168_v11  ;;  %v5499_v52 = vmul.f32 -1.442695, %v3168_v11 }
0x259c   :  { %v3259_v25 = vpop.f32.mrb[26].mxu0 }
0x259d   :  { %v6151_v49 = vpop.f32.mrb[27].mxu0  ;;  %6847 = vpow2.f32 %v5499_v52 }
0x25a5   :  { %v6846_v17 = vpop.eup %6845 }
0x25a6   :  { %3178 = vrot.lane.b32.xlu1 %v6846_v17, %s6985_s27 }
0x25a7   :  { %v6848_v56 = vpop.eup %6847 }
0x25a8   :  { %v3172_v46 = vadd.f32 1.0, %v6848_v56 }
0x25aa   :  { %6849 = vrcp.f32 %v3172_v46 }
0x25b4   :  { %v6850_v23 = vpop.eup %6849 }
0x25b5   :  { %v3176_v31 = vmul.f32 %v6850_v23, %v7714_v62 }
0x2618   :  { %v3179_v60 = vpop.permute.xlu1 %3178 }
0x2619   :  { %v3181_v28 = vmul.f32 %v6850_v23, %v3179_v60 }
0x261b   :  { %3183 = vrot.lane.b32.xlu1 %v3181_v28, %s6984_s4 }
0x268d   :  { %v3184_v5 = vpop.permute.xlu1 %3183 }
0x268e   :  { %v7838_v9 = vadd.f32 %v3184_v5, %v3176_v31 }
0x2690   :  { %6851 = vtanh.f32 %v7838_v9 }
0x269a   :  { %v6852_v33 = vpop.eup %6851 }
0x269b   :  { %3189 = vrot.lane.b32.xlu0 %v6852_v33, %s6985_s27 }
0x270d   :  { %v3190_v34 = vpop.permute.xlu0 %3189 }
0x270e   :  { %v3192_v3 = vmul.f32 %v6850_v23, %v3190_v34 }
0x2710   :  { %3264 = vrot.lane.b32.xlu1 %v3192_v3, %s6984_s4 }
0x2782   :  { %v7843_v63 = vpop.permute.xlu1 %3264 }
0x2783   :  { %6161 = vmatmul.mubr.msk.f32.vlgmr.msra.gmra.mrb[28].mxu1 %vm132_vm0, %v7843_v63 }
0x2784   :  { %6608 = vmatpush3.bf16.msra.mxu1 %v7136_v54  ;;  %6190 = vmatprep.mubr.msk.f32.mxu1 %vm6982_vm3, %v6983_v12 }
0x2785   :  { %6609 = vmatprep.subr.bf16.mxu1 %v6981_v57 }
0x2788   :  { %6611 = vmatpush3.bf16.msra.mxu1 %v7157_v61 }
0x2789   :  { %6612 = vmatprep.subr.bf16.mxu1 %v6981_v57 }
0x278c   :  { %6614 = vmatpush3.bf16.msra.mxu1 %v7177_v4 }
0x278d   :  { %6615 = vmatprep.subr.bf16.mxu1 %v6981_v57 }
0x2790   :  { %6617 = vmatpush3.bf16.msra.mxu1 %v7206_v18 }
0x2791   :  { %6630 = vmatprep.subr.bf16.mxu1 %v6981_v57 }
0x2856   :  { %v3334_v62 = vpop.f32.mrb[28].mxu1 }
0x2857   :  { %v3335_v41 = vadd.f32 %v3334_v62, %v3259_v25  ;;  %v6162_v1 = vpop.f32.mrb[29].mxu1 }
0x2859   :  { %v3338_v2 = vadd.f32 %v7736_v15, %v3335_v41 }
0x285b   :  { %6853 = vtanh.f32 %v3338_v2  ;;  %v5502_v47 = vmul.f32 -1.442695, %v3338_v2 }
0x285d   :  { %6855 = vpow2.f32 %v5502_v47 }
0x2865   :  { %v6854_v42 = vpop.eup %6853 }
0x2866   :  { %3348 = vrot.lane.b32.xlu0 %v6854_v42, %s6985_s27 }
0x2867   :  { %v6856_v50 = vpop.eup %6855 }
0x2868   :  { %v3342_v11 = vadd.f32 1.0, %v6856_v50 }
0x286a   :  { %6857 = vrcp.f32 %v3342_v11 }
0x2874   :  { %v6858_v49 = vpop.eup %6857 }
0x2875   :  { %v3346_v56 = vmul.f32 %v6858_v49, %v7742_v44 }
0x28d8   :  { %v3349_v17 = vpop.permute.xlu0 %3348 }
0x28d9   :  { %v3351_v52 = vmul.f32 %v6858_v49, %v3349_v17 }
0x28db   :  { %3353 = vrot.lane.b32.xlu1 %v3351_v52, %s6984_s4 }
0x294d   :  { %v3354_v25 = vpop.permute.xlu1 %3353 }
0x294e   :  { %v7861_v46 = vadd.f32 %v3354_v25, %v3346_v56 }
0x2950   :  { %6859 = vtanh.f32 %v7861_v46 }
0x295a   :  { %v6860_v23 = vpop.eup %6859 }
0x295b   :  { %3359 = vrot.lane.b32.xlu0 %v6860_v23, %s6985_s27 }
0x29cd   :  { %v3360_v60 = vpop.permute.xlu0 %3359 }
0x29ce   :  { %v3362_v28 = vmul.f32 %v6858_v49, %v3360_v60 }
0x29d0   :  { %v3484_v31 = vrot.slane %v3362_v28, %v7084_v6  ;;  %3364 = vrot.lane.b32.xlu1 %v3362_v28, %s6984_s4 }
0x29d2   :  { %v3485_v5 = vcombine.high %v3484_v31, %v3484_v31  ;;  %v3492_v33 = vrot.slane %v3484_v31, %v7084_v6 }
0x29d4   :  { %v3499_v34 = vrot.slane %v3485_v5, %v7084_v6  ;;  %v3503_v44 = vrot.slane %v3492_v33, %v7089_v8 }
0x29d6   :  { %3508 = vrot.lane.b32.xlu0 %v3503_v44, %s6984_s4  ;;  %v3507_v3 = vrot.slane %v3499_v34, %v7089_v8 }
0x29d8   :  { %3510 = vrot.lane.b32.xlu1 %v3507_v3, %s6984_s4 }
0x2a42   :  { %v7873_v62 = vpop.permute.xlu1 %3364 }
0x2a43   :  { %6172 = vmatmul.mubr.msk.f32.vlgmr.msra.gmra.mrb[28].mxu0 %vm132_vm0, %v7873_v62 }
0x2a44   :  { %6620 = vmatpush3.bf16.msra.mxu0 %v7146_v58  ;;  %6201 = vmatprep.mubr.msk.f32.mxu0 %vm6982_vm3, %v6983_v12 }
0x2a45   :  { %6621 = vmatprep.subr.bf16.mxu0 %v6981_v57 }
0x2a48   :  { %v3509_v41 = vpop.permute.xlu0 %3508  ;;  %6623 = vmatpush3.bf16.msra.mxu0 %v7166_v0 }
0x2a49   :  { %v3514_v1 = vmul.f32 %v7622_v45, %v3509_v41  ;;  %6624 = vmatprep.subr.bf16.mxu0 %v6981_v57 }
0x2a4a   :  { %v3511_v2 = vpop.permute.xlu1 %3510 }
0x2a4b   :  { %v3515_v42 = vmul.f32 %v7629_v48, %v3511_v2  ;;  %v3516_v47 = vsel %vm132_vm0, %v3514_v1, 0.0 }
0x2a4c   :  { %3517 = vadd.xlane.f32.xlu0 %v3516_v47 }
0x2a4d   :  { %v3519_v50 = vsel %vm132_vm0, %v3515_v42, 0.0 }
0x2a4e   :  { %3520 = vadd.xlane.f32.xlu1 %v3519_v50 }
0x2ad9   :  { %v3518_v11 = vpop.xlane.xlu0 %3517 }
0x2ada   :  { %v3527_v17 = vrot.slane %v3518_v11, %v7113_v22 }
0x2adb   :  { %v3521_v49 = vpop.xlane.xlu1 %3520 }
0x2adc   :  { %v3531_v52 = vrot.slane %v3521_v49, %v7113_v22 }
0x2ade   :  { %v3532_v56 = vsel %vm151_vm1, %v3531_v52, %v3527_v17 }
0x2adf   :  { %v3534_v45 = vsel %vm154_vm2, %v3532_v56, -inf }
0x2ae0   :  { %3535 = vmax.xlane.f32.xlu0 %v3534_v45 }
0x2b16   :  { %v3434_v25 = vpop.f32.mrb[28].mxu0 }
0x2b17   :  { %v7892_v48 = vadd.f32 %v7775_v43, %v3434_v25  ;;  %v6173_v23 = vpop.f32.mrb[29].mxu0 }
0x2b19   :  { %v3438_v60 = vsel %vm758_vm5, %v7892_v48, -inf }
0x2b1a   :  { %3439 = vmax.xlane.f32.xlu0 %v3438_v60 }
0x2b6d   :  { %v3536_v28 = vpop.xlane.xlu0 %3535 }
0x2b6e   :  { %v3541_v31 = vrot.slane %v3536_v28, %v7089_v8  ;;  %v3545_v5 = vrot.slane %v3536_v28, %v7120_v29 }
0x2b70   :  { %v3548_v33 = vsub.f32 %v3518_v11, %v3541_v31  ;;  %v3549_v34 = vsub.f32 %v3521_v49, %v3545_v5 }
0x2b72   :  { %v3550_v44 = vmul.f32 1.442695, %v3548_v33  ;;  %v3552_v3 = vmul.f32 1.442695, %v3549_v34 }
0x2b74   :  { %6861 = vpow2.f32 %v3550_v44 }
0x2b75   :  { %6863 = vpow2.f32 %v3552_v3 }
0x2b7e   :  { %v6862_v41 = vpop.eup %6861 }
0x2b7f   :  { %v6864_v1 = vpop.eup %6863  ;;  %3557 = vperm.xlu1 %6739, %v6862_v41  }
0x2b80   :  { %3560 = vperm.xlu0 %6740, %v6864_v1  }
0x2ba7   :  { %v7898_v2 = vpop.xlane.xlu0 %3439 }
0x2ba8   :  { %vm3453_vm12 = vcmp.eq.f32.partialorder %v7892_v48, %v7898_v2 }
0x2ba9   :  { %v3454_v42 = vsel %vm3453_vm12, %v7109_v20, 3 }
0x2baa   :  { %v3455_v47 = vsel %vm758_vm5, %v3454_v42, 2147483647 }
0x2bab   :  { %v3457_v50 = vshra.s32 %v3455_v47, 16  ;;  %v3456_v23 = vand.u32 65535, %v3455_v47 }
0x2bad   :  { %v3459_v11 = vcvt.s32.f32 %v3457_v50  ;;  %v3458_v28 = vcvt.s32.f32 %v3456_v23 }
0x2baf   :  { %3460 = vmin.xlane.f32.xlu0 %v3459_v11 }
0x2bfe   :  { %v3558_v49 = vpop.permute.xlu1 %3557 }
0x2bff   :  { %v3565_v17 = vrot.slane %v3558_v49, %v7113_v22  ;;  %v3561_v52 = vpop.permute.xlu0 %3560 }
0x2c00   :  { %v3569_v56 = vrot.slane %v3561_v52, %v7113_v22 }
0x2c02   :  { %v3570_v45 = vsel %vm151_vm1, %v3569_v56, %v3565_v17 }
0x2c03   :  { %v3572_v25 = vsel %vm154_vm2, %v3570_v45, 0.0 }
0x2c04   :  { %3573 = vadd.xlane.f32.xlu1 %v3572_v25 }
0x2c3c   :  { %v3461_v60 = vpop.xlane.xlu0 %3460 }
0x2c3d   :  { %vm3462_vm13 = vcmp.eq.f32.partialorder %v3459_v11, %v3461_v60  ;;  %v3467_v49 = vcvt.f32.s32 %v3461_v60 }
0x2c3e   :  { %v3463_v31 = vsel %vm3462_vm13, %v3458_v28, inf }
0x2c3f   :  { %3464 = vmin.xlane.f32.xlu1 %v3463_v31  ;;  %v3468_v17 = vshll.u32 %v3467_v49, 16 }
0x2c91   :  { %v3574_v5 = vpop.xlane.xlu1 %3573 }
0x2c92   :  { %v3579_v33 = vrot.slane %v3574_v5, %v7089_v8  ;;  %v3583_v34 = vrot.slane %v3574_v5, %v7120_v29 }
0x2c94   :  { %6865 = vrcp.f32 %v3579_v33 }
0x2c95   :  { %6867 = vrcp.f32 %v3583_v34 }
0x2c9e   :  { %v6866_v44 = vpop.eup %6865 }
0x2c9f   :  { %v6868_v3 = vpop.eup %6867  ;;  %v3587_v42 = vmul.f32 %v6866_v44, %v6862_v41 }
0x2ca0   :  { %v3589_v50 = vmul.f32 %v6868_v3, %v6864_v1 }
0x2ca1   :  { %3592 = vperm.xlu0 %6740, %v3587_v42  }
0x2ca2   :  { %3597 = vperm.xlu1 %6739, %v3589_v50  }
0x2ccc   :  { %v3465_v47 = vpop.xlane.xlu1 %3464 }
0x2ccd   :  { %v3466_v52 = vcvt.f32.s32 %v3465_v47 }
0x2ccf   :  { %v3469_v11 = vadd.s32 %v3468_v17, %v3466_v52 }
0x2cd1   :  { %vm3470_vm14 = vcmp.eq.s32.totalorder %v3469_v11, 1  ;;  %vm3474_vm15 = vcmp.eq.s32.totalorder %v3469_v11, 0 }
0x2cd2   :  { %v3473_v56 = vsel %vm3470_vm14, %v7412_v27, %v7414_v30 }
0x2cd3   :  { %v3477_v45 = vsel %vm3474_vm15, %v7417_v19, %v3473_v56 }
0x2cd4   :  { %6202 = vmatmul.mubr.msk.f32.vlgmr.msra.gmra.mrb[30].mxu0 %vm132_vm0, %v3477_v45 }
0x2cd5   :  { %6626 = vmatpush3.bf16.msra.mxu0 %v7186_v10  ;;  %6212 = vmatprep.mubr.msk.f32.mxu0 %vm6982_vm3, %v6983_v12 }
0x2cd6   :  { %6627 = vmatprep.subr.bf16.mxu0 %v6981_v57 }
0x2cd9   :  { %6629 = vmatpush3.bf16.msra.mxu0 %v7214_v21 }
0x2cda   :  { %6636 = vmatprep.subr.bf16.mxu0 %v6981_v57 }
0x2cdc   :  { %6213 = vmatmul.mubr.msk.f32.vlgmr.msra.gmra.mrb[32].mxu0 %vm132_vm0, %v7843_v63 }
0x2cdd   :  { %6638 = vmatpush3.bf16.msra.mxu0 %v7281_v32  ;;  %6234 = vmatprep.mubr.msk.f32.mxu0 %vm6982_vm3, %v6983_v12 }
0x2cde   :  { %6639 = vmatprep.subr.bf16.mxu0 %v6981_v57 }
0x2ce1   :  { %6641 = vmatpush3.bf16.msra.mxu0 %v7294_v36 }
0x2ce2   :  { %6648 = vmatprep.subr.bf16.mxu0 %v6981_v57 }
0x2d20   :  { %v3593_v41 = vpop.permute.xlu0 %3592 }
0x2d21   :  { %v3598_v1 = vpop.permute.xlu1 %3597  ;;  %v3600_v25 = vmul.f32 %v7678_v37, %v3593_v41 }
0x2d22   :  { %v3601_v23 = vmul.f32 %v7684_v38, %v3598_v1 }
0x2d23   :  { %v3602_v60 = vsel %vm223_vm4, %v3600_v25, 0.0 }
0x2d24   :  { %v3609_v63 = vsel %vm223_vm4, %v3601_v23, 0.0  ;;  %v3603_v28 = vrot.slane %v3602_v60, 4 }
0x2d25   :  { %v3610_v31 = vrot.slane %v3609_v63, 4 }
0x2d26   :  { %v3604_v5 = vadd.f32 %v3603_v28, %v3602_v60 }
0x2d27   :  { %v3611_v33 = vadd.f32 %v3610_v31, %v3609_v63 }
0x2d28   :  { %v3605_v34 = vrot.slane %v3604_v5, 2 }
0x2d29   :  { %v3612_v44 = vrot.slane %v3611_v33, 2 }
0x2d2a   :  { %v3606_v3 = vadd.f32 %v3605_v34, %v3604_v5 }
0x2d2b   :  { %v3613_v42 = vadd.f32 %v3612_v44, %v3611_v33 }
0x2d2c   :  { %v3607_v50 = vrot.slane %v3606_v3, 1 }
0x2d2d   :  { %v3614_v49 = vrot.slane %v3613_v42, 1 }
0x2d2e   :  { %v3608_v47 = vadd.f32 %v3607_v50, %v3606_v3 }
0x2d2f   :  { %v3615_v17 = vadd.f32 %v3614_v49, %v3613_v42 }
0x2d31   :  { %v3618_v37 = vsel %vm151_vm1, %v3615_v17, %v3608_v47 }
0x2d32   :  { %6191 = vmatmul.mubr.msk.f32.vlgmr.msra.gmra.mrb[30].mxu1 %vm223_vm4, %v3618_v37 }
0x2d33   :  { %6632 = vmatpush3.bf16.msra.mxu1 %v7270_v26  ;;  %6223 = vmatprep.mubr.msk.f32.mxu1 %vm6982_vm3, %v6983_v12 }
0x2d34   :  { %6633 = vmatprep.subr.bf16.mxu1 %v6981_v57 }
0x2d37   :  { %6635 = vmatpush3.bf16.msra.mxu1 %v7290_v35 }
0x2d38   :  { %6642 = vmatprep.subr.bf16.mxu1 %v6981_v57 }
0x2d3a   :  { %6224 = vmatmul.mubr.msk.f32.vlgmr.msra.gmra.mrb[32].mxu1 %vm132_vm0, %v7873_v62 }
0x2d3b   :  { %6644 = vmatpush3.bf16.msra.mxu1 %v7345_v13  ;;  %6245 = vmatprep.mubr.msk.f32.mxu1 %vm6982_vm3, %v6983_v12 }
0x2d3c   :  { %6645 = vmatprep.subr.bf16.mxu1 %v6981_v57 }
0x2d3f   :  { %6647 = vmatpush3.bf16.msra.mxu1 %v7352_v16 }
0x2d40   :  { %6660 = vmatprep.subr.bf16.mxu1 %v6981_v57 }
0x2da7   :  { %v3760_v38 = vpop.f32.mrb[30].mxu0 }
0x2da8   :  { %v6203_v52 = vpop.f32.mrb[31].mxu0 }
0x2daf   :  { %v3830_v11 = vpop.f32.mrb[32].mxu0 }
0x2db0   :  { %v6214_v56 = vpop.f32.mrb[33].mxu0 }
0x2e05   :  { %v3687_v45 = vpop.f32.mrb[30].mxu1 }
0x2e06   :  { %v3761_v41 = vadd.f32 %v3760_v38, %v3687_v45  ;;  %v6192_v1 = vpop.f32.mrb[31].mxu1 }
0x2e08   :  { %v3834_v25 = vadd.f32 %v3830_v11, %v3761_v41 }
0x2e0a   :  { %v3835_v62 = vadd.f32 %v7708_v39, %v3834_v25 }
0x2e0c   :  { %6869 = vtanh.f32 %v3835_v62  ;;  %v5508_v28 = vmul.f32 -1.442695, %v3835_v62 }
0x2e0d   :  { %v3926_v23 = vpop.f32.mrb[32].mxu1 }
0x2e0e   :  { %v6225_v60 = vpop.f32.mrb[33].mxu1  ;;  %6871 = vpow2.f32 %v5508_v28 }
0x2e16   :  { %v6870_v63 = vpop.eup %6869 }
0x2e17   :  { %3845 = vrot.lane.b32.xlu1 %v6870_v63, %s6985_s27 }
0x2e18   :  { %v6872_v31 = vpop.eup %6871 }
0x2e19   :  { %v3839_v5 = vadd.f32 1.0, %v6872_v31 }
0x2e1b   :  { %6873 = vrcp.f32 %v3839_v5 }
0x2e25   :  { %v6874_v33 = vpop.eup %6873 }
0x2e26   :  { %v3843_v3 = vmul.f32 %v6874_v33, %v7838_v9 }
0x2e89   :  { %v3846_v34 = vpop.permute.xlu1 %3845 }
0x2e8a   :  { %v3848_v44 = vmul.f32 %v6874_v33, %v3846_v34 }
0x2e8c   :  { %3850 = vrot.lane.b32.xlu0 %v3848_v44, %s6984_s4 }
0x2efe   :  { %v3851_v42 = vpop.permute.xlu0 %3850 }
0x2eff   :  { %v7952_v39 = vadd.f32 %v3851_v42, %v3843_v3 }
0x2f01   :  { %6875 = vtanh.f32 %v7952_v39 }
0x2f0b   :  { %v6876_v50 = vpop.eup %6875 }
0x2f0c   :  { %3856 = vrot.lane.b32.xlu1 %v6876_v50, %s6985_s27 }
0x2f7e   :  { %v3857_v49 = vpop.permute.xlu1 %3856 }
0x2f7f   :  { %v3859_v47 = vmul.f32 %v6874_v33, %v3857_v49  ;;  %v7999_v49 = vld [vmem:[%s8315_s29] sm:$0xff] }
0x2f81   :  { %3931 = vrot.lane.b32.xlu0 %v3859_v47, %s6984_s4 }
0x2ff3   :  { %v7957_v17 = vpop.permute.xlu0 %3931 }
0x2ff4   :  { %6235 = vmatmul.mubr.msk.f32.vlgmr.msra.gmra.mrb[34].mxu0 %vm132_vm0, %v7957_v17 }
0x2ff5   :  { %6650 = vmatpush3.bf16.msra.mxu0 %v7136_v54  ;;  %6264 = vmatprep.mubr.msk.f32.mxu0 %vm6982_vm3, %v6983_v12 }
0x2ff6   :  { %6651 = vmatprep.subr.bf16.mxu0 %v6981_v57 }
0x2ff9   :  { %6653 = vmatpush3.bf16.msra.mxu0 %v7157_v61 }
0x2ffa   :  { %6654 = vmatprep.subr.bf16.mxu0 %v6981_v57 }
0x2ffd   :  { %6656 = vmatpush3.bf16.msra.mxu0 %v7177_v4 }
0x2ffe   :  { %6657 = vmatprep.subr.bf16.mxu0 %v6981_v57 }
0x3001   :  { %6659 = vmatpush3.bf16.msra.mxu0 %v7206_v18 }
0x3002   :  { %6672 = vmatprep.subr.bf16.mxu0 %v6981_v57 }
0x30c7   :  { %v4001_v9 = vpop.f32.mrb[34].mxu0 }
0x30c8   :  { %v4002_v37 = vadd.f32 %v4001_v9, %v3926_v23  ;;  %v6236_v38 = vpop.f32.mrb[35].mxu0 }
0x30ca   :  { %v4005_v52 = vadd.f32 %v7736_v15, %v4002_v37  ;;  %v8006_v37 = vld [vmem:[%s8315_s29 + $0x8] sm:$0xff] }
0x30cc   :  { %6877 = vtanh.f32 %v4005_v52  ;;  %v5511_v56 = vmul.f32 -1.442695, %v4005_v52 }
0x30ce   :  { %6879 = vpow2.f32 %v5511_v56 }
0x30d6   :  { %v6878_v11 = vpop.eup %6877 }
0x30d7   :  { %4015 = vrot.lane.b32.xlu1 %v6878_v11, %s6985_s27 }
0x30d8   :  { %v6880_v45 = vpop.eup %6879 }
0x30d9   :  { %v4009_v41 = vadd.f32 1.0, %v6880_v45 }
0x30db   :  { %6881 = vrcp.f32 %v4009_v41 }
0x30e5   :  { %v6882_v1 = vpop.eup %6881 }
0x30e6   :  { %v4013_v60 = vmul.f32 %v6882_v1, %v7861_v46 }
0x3149   :  { %v4016_v25 = vpop.permute.xlu1 %4015 }
0x314a   :  { %v4018_v62 = vmul.f32 %v6882_v1, %v4016_v25 }
0x314c   :  { %4020 = vrot.lane.b32.xlu0 %v4018_v62, %s6984_s4 }
0x31be   :  { %v4021_v23 = vpop.permute.xlu0 %4020 }
0x31bf   :  { %v7975_v63 = vadd.f32 %v4021_v23, %v4013_v60 }
0x31c1   :  { %6883 = vtanh.f32 %v7975_v63 }
0x31cb   :  { %v6884_v15 = vpop.eup %6883 }
0x31cc   :  { %4026 = vrot.lane.b32.xlu1 %v6884_v15, %s6985_s27 }
0x323e   :  { %v4027_v28 = vpop.permute.xlu1 %4026 }
0x323f   :  { %v4029_v31 = vmul.f32 %v6882_v1, %v4027_v28 }
0x3241   :  { %v4151_v5 = vrot.slane %v4029_v31, %v7084_v6  ;;  %4031 = vrot.lane.b32.xlu0 %v4029_v31, %s6984_s4 }
0x3243   :  { %v4152_v33 = vcombine.high %v4151_v5, %v4151_v5  ;;  %v4159_v34 = vrot.slane %v4151_v5, %v7084_v6 }
0x3245   :  { %v4166_v44 = vrot.slane %v4152_v33, %v7084_v6  ;;  %v4170_v46 = vrot.slane %v4159_v34, %v7089_v8 }
0x3247   :  { %4175 = vrot.lane.b32.xlu1 %v4170_v46, %s6984_s4  ;;  %v4174_v3 = vrot.slane %v4166_v44, %v7089_v8 }
0x3249   :  { %4177 = vrot.lane.b32.xlu0 %v4174_v3, %s6984_s4 }
0x32b3   :  { %v7987_v42 = vpop.permute.xlu0 %4031 }
0x32b4   :  { %6246 = vmatmul.mubr.msk.f32.vlgmr.msra.gmra.mrb[34].mxu1 %vm132_vm0, %v7987_v42 }
0x32b5   :  { %6662 = vmatpush3.bf16.msra.mxu1 %v7146_v58  ;;  %6275 = vmatprep.mubr.msk.f32.mxu1 %vm6982_vm3, %v6983_v12 }
0x32b6   :  { %6663 = vmatprep.subr.bf16.mxu1 %v6981_v57 }
0x32b9   :  { %v4176_v50 = vpop.permute.xlu1 %4175  ;;  %6665 = vmatpush3.bf16.msra.mxu1 %v7166_v0 }
0x32ba   :  { %v4181_v47 = vmul.f32 %v7999_v49, %v4176_v50  ;;  %6666 = vmatprep.subr.bf16.mxu1 %v6981_v57 }
0x32bb   :  { %v4178_v9 = vpop.permute.xlu0 %4177 }
0x32bc   :  { %v4182_v38 = vmul.f32 %v8006_v37, %v4178_v9  ;;  %v4183_v52 = vsel %vm132_vm0, %v4181_v47, 0.0 }
0x32bd   :  { %4184 = vadd.xlane.f32.xlu1 %v4183_v52 }
0x32be   :  { %v4186_v11 = vsel %vm132_vm0, %v4182_v38, 0.0 }
0x32bf   :  { %4187 = vadd.xlane.f32.xlu0 %v4186_v11 }
0x334a   :  { %v4185_v56 = vpop.xlane.xlu1 %4184 }
0x334b   :  { %v4194_v41 = vrot.slane %v4185_v56, %v7113_v22 }
0x334c   :  { %v4188_v45 = vpop.xlane.xlu0 %4187 }
0x334d   :  { %v4198_v1 = vrot.slane %v4188_v45, %v7113_v22 }
0x334f   :  { %v4199_v25 = vsel %vm151_vm1, %v4198_v1, %v4194_v41 }
0x3350   :  { %v4201_v62 = vsel %vm154_vm2, %v4199_v25, -inf }
0x3351   :  { %4202 = vmax.xlane.f32.xlu0 %v4201_v62 }
0x3387   :  { %v4101_v60 = vpop.f32.mrb[34].mxu1 }
0x3388   :  { %v8016_v23 = vadd.f32 %v7775_v43, %v4101_v60  ;;  %v6247_v15 = vpop.f32.mrb[35].mxu1 }
0x338a   :  { %v4105_v28 = vsel %vm758_vm5, %v8016_v23, -inf }
0x338b   :  { %4106 = vmax.xlane.f32.xlu1 %v4105_v28 }
0x33de   :  { %v4203_v31 = vpop.xlane.xlu0 %4202 }
0x33df   :  { %v4208_v5 = vrot.slane %v4203_v31, %v7089_v8  ;;  %v4212_v33 = vrot.slane %v4203_v31, %v7120_v29 }
0x33e1   :  { %v4215_v34 = vsub.f32 %v4185_v56, %v4208_v5  ;;  %v4216_v44 = vsub.f32 %v4188_v45, %v4212_v33 }
0x33e3   :  { %v4217_v46 = vmul.f32 1.442695, %v4215_v34  ;;  %v4219_v3 = vmul.f32 1.442695, %v4216_v44 }
0x33e5   :  { %6885 = vpow2.f32 %v4217_v46 }
0x33e6   :  { %6887 = vpow2.f32 %v4219_v3 }
0x33ef   :  { %v6886_v50 = vpop.eup %6885 }
0x33f0   :  { %v6888_v47 = vpop.eup %6887  ;;  %4224 = vperm.xlu0 %6740, %v6886_v50  }
0x33f1   :  { %4227 = vperm.xlu1 %6739, %v6888_v47  }
0x3418   :  { %v8022_v43 = vpop.xlane.xlu1 %4106 }
0x3419   :  { %vm4120_vm6 = vcmp.eq.f32.partialorder %v8016_v23, %v8022_v43 }
0x341a   :  { %v4121_v9 = vsel %vm4120_vm6, %v7109_v20, 3 }
0x341b   :  { %v4122_v38 = vsel %vm758_vm5, %v4121_v9, 2147483647 }
0x341c   :  { %v4124_v52 = vshra.s32 %v4122_v38, 16  ;;  %v4123_v60 = vand.u32 65535, %v4122_v38 }
0x341e   :  { %v4126_v11 = vcvt.s32.f32 %v4124_v52  ;;  %v4125_v28 = vcvt.s32.f32 %v4123_v60 }
0x3420   :  { %4127 = vmin.xlane.f32.xlu0 %v4126_v11 }
0x346f   :  { %v4225_v56 = vpop.permute.xlu0 %4224 }
0x3470   :  { %v4228_v45 = vpop.permute.xlu1 %4227  ;;  %v4232_v41 = vrot.slane %v4225_v56, %v7113_v22 }
0x3471   :  { %v4236_v1 = vrot.slane %v4228_v45, %v7113_v22 }
0x3473   :  { %v4237_v25 = vsel %vm151_vm1, %v4236_v1, %v4232_v41 }
0x3474   :  { %v4239_v62 = vsel %vm154_vm2, %v4237_v25, 0.0 }
0x3475   :  { %4240 = vadd.xlane.f32.xlu1 %v4239_v62  ;;  %v8061_v62 = vld [vmem:[%s8301_s0 + $0x8] sm:$0xff] }
0x34ad   :  { %v4128_v15 = vpop.xlane.xlu0 %4127 }
0x34ae   :  { %vm4129_vm7 = vcmp.eq.f32.partialorder %v4126_v11, %v4128_v15  ;;  %v4134_v52 = vcvt.f32.s32 %v4128_v15 }
0x34af   :  { %v4130_v31 = vsel %vm4129_vm7, %v4125_v28, inf }
0x34b0   :  { %4131 = vmin.xlane.f32.xlu0 %v4130_v31  ;;  %v4135_v56 = vshll.u32 %v4134_v52, 16 }
0x3502   :  { %v4241_v5 = vpop.xlane.xlu1 %4240 }
0x3503   :  { %v4246_v33 = vrot.slane %v4241_v5, %v7089_v8  ;;  %v4250_v34 = vrot.slane %v4241_v5, %v7120_v29 }
0x3505   :  { %6889 = vrcp.f32 %v4246_v33 }
0x3506   :  { %6891 = vrcp.f32 %v4250_v34 }
0x350f   :  { %v6890_v44 = vpop.eup %6889 }
0x3510   :  { %v6892_v46 = vpop.eup %6891  ;;  %v4254_v3 = vmul.f32 %v6890_v44, %v6886_v50 }
0x3511   :  { %v4256_v9 = vmul.f32 %v6892_v46, %v6888_v47  ;;  %v8055_v47 = vld [vmem:[%s8301_s0] sm:$0xff] }
0x3512   :  { %4259 = vperm.xlu1 %6739, %v4254_v3  }
0x3513   :  { %4264 = vperm.xlu0 %6740, %v4256_v9  }
0x353d   :  { %v4132_v38 = vpop.xlane.xlu0 %4131 }
0x353e   :  { %v4133_v45 = vcvt.f32.s32 %v4132_v38 }
0x3540   :  { %v4136_v11 = vadd.s32 %v4135_v56, %v4133_v45 }
0x3542   :  { %vm4137_vm8 = vcmp.eq.s32.totalorder %v4136_v11, 1  ;;  %vm4141_vm9 = vcmp.eq.s32.totalorder %v4136_v11, 0 }
0x3543   :  { %v4140_v41 = vsel %vm4137_vm8, %v7412_v27, %v7414_v30 }
0x3544   :  { %v4144_v1 = vsel %vm4141_vm9, %v7417_v19, %v4140_v41 }
0x3545   :  { %6276 = vmatmul.mubr.msk.f32.vlgmr.msra.gmra.mrb[36].mxu1 %vm132_vm0, %v4144_v1 }
0x3546   :  { %6668 = vmatpush3.bf16.msra.mxu1 %v7186_v10  ;;  %6286 = vmatprep.mubr.msk.f32.mxu1 %vm6982_vm3, %v6983_v12 }
0x3547   :  { %6669 = vmatprep.subr.bf16.mxu1 %v6981_v57 }
0x354a   :  { %6671 = vmatpush3.bf16.msra.mxu1 %v7214_v21 }
0x354b   :  { %6678 = vmatprep.subr.bf16.mxu1 %v6981_v57 }
0x354d   :  { %6287 = vmatmul.mubr.msk.f32.vlgmr.msra.gmra.mrb[38].mxu1 %vm132_vm0, %v7957_v17 }
0x354e   :  { %6680 = vmatpush3.bf16.msra.mxu1 %v7281_v32  ;;  %6308 = vmatprep.mubr.msk.f32.mxu1 %vm6982_vm3, %v6983_v12 }
0x354f   :  { %6681 = vmatprep.subr.bf16.mxu1 %v6981_v57 }
0x3552   :  { %6683 = vmatpush3.bf16.msra.mxu1 %v7294_v36 }
0x3553   :  { %6690 = vmatprep.subr.bf16.mxu1 %v6981_v57 }
0x3591   :  { %v4260_v50 = vpop.permute.xlu1 %4259 }
0x3592   :  { %v4267_v25 = vmul.f32 %v8055_v47, %v4260_v50  ;;  %v4265_v17 = vpop.permute.xlu0 %4264 }
0x3593   :  { %v4268_v60 = vmul.f32 %v8061_v62, %v4265_v17 }
0x3594   :  { %v4269_v15 = vsel %vm223_vm4, %v4267_v25, 0.0 }
0x3595   :  { %v4270_v28 = vrot.slane %v4269_v15, 4  ;;  %v4276_v31 = vsel %vm223_vm4, %v4268_v60, 0.0 }
0x3596   :  { %v4277_v5 = vrot.slane %v4276_v31, 4 }
0x3597   :  { %v4271_v33 = vadd.f32 %v4270_v28, %v4269_v15 }
0x3598   :  { %v4278_v34 = vadd.f32 %v4277_v5, %v4276_v31 }
0x3599   :  { %v4272_v44 = vrot.slane %v4271_v33, 2 }
0x359a   :  { %v4279_v46 = vrot.slane %v4278_v34, 2 }
0x359b   :  { %v4273_v3 = vadd.f32 %v4272_v44, %v4271_v33 }
0x359c   :  { %v4280_v9 = vadd.f32 %v4279_v46, %v4278_v34 }
0x359d   :  { %v4274_v52 = vrot.slane %v4273_v3, 1 }
0x359e   :  { %v4281_v38 = vrot.slane %v4280_v9, 1 }
0x359f   :  { %v4275_v56 = vadd.f32 %v4274_v52, %v4273_v3 }
0x35a0   :  { %v4282_v45 = vadd.f32 %v4281_v38, %v4280_v9 }
0x35a2   :  { %v4285_v11 = vsel %vm151_vm1, %v4282_v45, %v4275_v56 }
0x35a3   :  { %6265 = vmatmul.mubr.msk.f32.vlgmr.msra.gmra.mrb[36].mxu0 %vm223_vm4, %v4285_v11 }
0x35a4   :  { %6674 = vmatpush3.bf16.msra.mxu0 %v7270_v26  ;;  %6297 = vmatprep.mubr.msk.f32.mxu0 %vm6982_vm3, %v6983_v12 }
0x35a5   :  { %6675 = vmatprep.subr.bf16.mxu0 %v6981_v57 }
0x35a8   :  { %6677 = vmatpush3.bf16.msra.mxu0 %v7290_v35 }
0x35a9   :  { %6684 = vmatprep.subr.bf16.mxu0 %v6981_v57 }
0x35ab   :  { %6298 = vmatmul.mubr.msk.f32.vlgmr.msra.gmra.mrb[38].mxu0 %vm132_vm0, %v7987_v42  ;;  %v8085_v42 = vld [vmem:[%s8302_s7] ss:$0 sm:$0xff] }
0x35ac   :  { %6686 = vmatpush3.bf16.msra.mxu0 %v7345_v13  ;;  %6319 = vmatprep.mubr.msk.f32.mxu0 %vm6982_vm3, %v6983_v12 }
0x35ad   :  { %6687 = vmatprep.subr.bf16.mxu0 %v6981_v57 }
0x35b0   :  { %6689 = vmatpush3.bf16.msra.mxu0 %v7352_v16 }
0x35b1   :  { %6702 = vmatprep.subr.bf16.mxu0 %v6981_v57 }
0x3618   :  { %v4427_v41 = vpop.f32.mrb[36].mxu1 }
0x3619   :  { %v6277_v1 = vpop.f32.mrb[37].mxu1 }
0x3620   :  { %v4497_v50 = vpop.f32.mrb[38].mxu1 }
0x3621   :  { %v6288_v25 = vpop.f32.mrb[39].mxu1 }
0x3676   :  { %v4354_v17 = vpop.f32.mrb[36].mxu0 }
0x3677   :  { %v4428_v60 = vadd.f32 %v4427_v41, %v4354_v17  ;;  %v6266_v15 = vpop.f32.mrb[37].mxu0 }
0x3679   :  { %v4501_v28 = vadd.f32 %v4497_v50, %v4428_v60  ;;  %v8113_v60 = vld [vmem:[%s8306_s10] ss:$0 sm:$0xff] }
0x367b   :  { %v4502_v31 = vadd.f32 %v8085_v42, %v4501_v28 }
0x367d   :  { %6893 = vtanh.f32 %v4502_v31  ;;  %v5517_v44 = vmul.f32 -1.442695, %v4502_v31 }
0x367e   :  { %v4593_v5 = vpop.f32.mrb[38].mxu0 }
0x367f   :  { %v6299_v33 = vpop.f32.mrb[39].mxu0  ;;  %6895 = vpow2.f32 %v5517_v44 }
0x3687   :  { %v6894_v34 = vpop.eup %6893 }
0x3688   :  { %4512 = vrot.lane.b32.xlu1 %v6894_v34, %s6985_s27 }
0x3689   :  { %v6896_v46 = vpop.eup %6895 }
0x368a   :  { %v4506_v3 = vadd.f32 1.0, %v6896_v46 }
0x368c   :  { %6897 = vrcp.f32 %v4506_v3 }
0x3696   :  { %v6898_v9 = vpop.eup %6897 }
0x3697   :  { %v4510_v56 = vmul.f32 %v6898_v9, %v7952_v39 }
0x36fa   :  { %v4513_v52 = vpop.permute.xlu1 %4512 }
0x36fb   :  { %v4515_v38 = vmul.f32 %v6898_v9, %v4513_v52 }
0x36fd   :  { %4517 = vrot.lane.b32.xlu1 %v4515_v38, %s6984_s4 }
0x376f   :  { %v4518_v45 = vpop.permute.xlu1 %4517 }
0x3770   :  { %v8091_v11 = vadd.f32 %v4518_v45, %v4510_v56 }
0x3772   :  { %6899 = vtanh.f32 %v8091_v11 }
0x377c   :  { %v6900_v41 = vpop.eup %6899 }
0x377d   :  { %4523 = vrot.lane.b32.xlu0 %v6900_v41, %s6985_s27 }
0x37ef   :  { %v4524_v1 = vpop.permute.xlu0 %4523 }
0x37f0   :  { %v4526_v50 = vmul.f32 %v6898_v9, %v4524_v1 }
0x37f2   :  { %4598 = vrot.lane.b32.xlu1 %v4526_v50, %s6984_s4 }
0x3864   :  { %v8096_v25 = vpop.permute.xlu1 %4598 }
0x3865   :  { %6309 = vmatmul.mubr.msk.f32.vlgmr.msra.gmra.mrb[40].mxu1 %vm132_vm0, %v8096_v25 }
0x3866   :  { %6692 = vmatpush3.bf16.msra.mxu1 %v7136_v54  ;;  %6338 = vmatprep.mubr.msk.f32.mxu1 %vm6982_vm3, %v6983_v12 }
0x3867   :  { %6693 = vmatprep.subr.bf16.mxu1 %v6981_v57 }
0x386a   :  { %6695 = vmatpush3.bf16.msra.mxu1 %v7157_v61 }
0x386b   :  { %6696 = vmatprep.subr.bf16.mxu1 %v6981_v57 }
0x386e   :  { %6698 = vmatpush3.bf16.msra.mxu1 %v7177_v4 }
0x386f   :  { %6699 = vmatprep.subr.bf16.mxu1 %v6981_v57 }
0x3872   :  { %6701 = vmatpush3.bf16.msra.mxu1 %v7206_v18 }
0x3873   :  { %6714 = vmatprep.subr.bf16.mxu1 %v6981_v57 }
0x3938   :  { %v4668_v39 = vpop.f32.mrb[40].mxu1 }
0x3939   :  { %v4669_v17 = vadd.f32 %v4668_v39, %v4593_v5  ;;  %v6310_v54 = vpop.f32.mrb[41].mxu1 }
0x393b   :  { %v4672_v61 = vadd.f32 %v8113_v60, %v4669_v17 }
0x393d   :  { %6901 = vtanh.f32 %v4672_v61  ;;  %v5520_v4 = vmul.f32 -1.442695, %v4672_v61 }
0x393f   :  { %6903 = vpow2.f32 %v5520_v4 }
0x3947   :  { %v6902_v15 = vpop.eup %6901 }
0x3948   :  { %4682 = vrot.lane.b32.xlu0 %v6902_v15, %s6985_s27 }
0x3949   :  { %v6904_v28 = vpop.eup %6903 }
0x394a   :  { %v4676_v18 = vadd.f32 1.0, %v6904_v28 }
0x394c   :  { %6905 = vrcp.f32 %v4676_v18 }
0x3956   :  { %v6906_v31 = vpop.eup %6905 }
0x3957   :  { %v4680_v34 = vmul.f32 %v6906_v31, %v7975_v63 }
0x39ba   :  { %v4683_v33 = vpop.permute.xlu0 %4682 }
0x39bb   :  { %v4685_v5 = vmul.f32 %v6906_v31, %v4683_v33 }
0x39bd   :  { %4687 = vrot.lane.b32.xlu1 %v4685_v5, %s6984_s4 }
0x3a2f   :  { %v4688_v44 = vpop.permute.xlu1 %4687 }
0x3a30   :  { %v8119_v46 = vadd.f32 %v4688_v44, %v4680_v34 }
0x3a32   :  { %6907 = vtanh.f32 %v8119_v46 }
0x3a3c   :  { %v6908_v3 = vpop.eup %6907 }
0x3a3d   :  { %4693 = vrot.lane.b32.xlu0 %v6908_v3, %s6985_s27 }
0x3aaf   :  { %v4694_v9 = vpop.permute.xlu0 %4693 }
0x3ab0   :  { %v4696_v52 = vmul.f32 %v6906_v31, %v4694_v9 }
0x3ab2   :  { %v4818_v38 = vrot.slane %v4696_v52, %v7084_v6  ;;  %4698 = vrot.lane.b32.xlu1 %v4696_v52, %s6984_s4 }
0x3ab4   :  { %v4819_v56 = vcombine.high %v4818_v38, %v4818_v38  ;;  %v4826_v45 = vrot.slane %v4818_v38, %v7084_v6 }
0x3ab6   :  { %v4833_v41 = vrot.slane %v4819_v56, %v7084_v6  ;;  %v4837_v63 = vrot.slane %v4826_v45, %v7089_v8 }
0x3ab8   :  { %4842 = vrot.lane.b32.xlu0 %v4837_v63, %s6984_s4  ;;  %v4841_v1 = vrot.slane %v4833_v41, %v7089_v8 }
0x3aba   :  { %4844 = vrot.lane.b32.xlu1 %v4841_v1, %s6984_s4 }
0x3b24   :  { %v8131_v50 = vpop.permute.xlu1 %4698 }
0x3b25   :  { %6320 = vmatmul.mubr.msk.f32.vlgmr.msra.gmra.mrb[40].mxu0 %vm132_vm0, %v8131_v50 }
0x3b26   :  { %6704 = vmatpush3.bf16.msra.mxu0 %v7146_v58  ;;  %6349 = vmatprep.mubr.msk.f32.mxu0 %vm6982_vm3, %v6983_v12 }
0x3b27   :  { %6705 = vmatprep.subr.bf16.mxu0 %v6981_v57 }
0x3b2a   :  { %v4843_v6 = vpop.permute.xlu0 %4842  ;;  %6707 = vmatpush3.bf16.msra.mxu0 %v7166_v0 }
0x3b2b   :  { %v4848_v39 = vmul.f32 %v7999_v49, %v4843_v6  ;;  %6708 = vmatprep.subr.bf16.mxu0 %v6981_v57 }
0x3b2c   :  { %v4845_v17 = vpop.permute.xlu1 %4844 }
0x3b2d   :  { %v4849_v54 = vmul.f32 %v8006_v37, %v4845_v17  ;;  %v4850_v61 = vsel %vm132_vm0, %v4848_v39, 0.0  ;;  %v8152_v37 = vld [vmem:[%s8308_s12] ss:$0 sm:$0xff] }
0x3b2e   :  { %4851 = vadd.xlane.f32.xlu0 %v4850_v61 }
0x3b2f   :  { %v4853_v58 = vsel %vm132_vm0, %v4849_v54, 0.0 }
0x3b30   :  { %4854 = vadd.xlane.f32.xlu1 %v4853_v58 }
0x3bbb   :  { %v4852_v15 = vpop.xlane.xlu0 %4851 }
0x3bbc   :  { %v4861_v28 = vrot.slane %v4852_v15, %v7113_v22 }
0x3bbd   :  { %v4855_v4 = vpop.xlane.xlu1 %4854 }
0x3bbe   :  { %v4865_v18 = vrot.slane %v4855_v4, %v7113_v22 }
0x3bc0   :  { %v4866_v0 = vsel %vm151_vm1, %v4865_v18, %v4861_v28 }
0x3bc1   :  { %v4868_v49 = vsel %vm154_vm2, %v4866_v0, -inf }
0x3bc2   :  { %4869 = vmax.xlane.f32.xlu0 %v4868_v49 }
0x3bf8   :  { %v4768_v31 = vpop.f32.mrb[40].mxu0 }
0x3bf9   :  { %v8155_v33 = vadd.f32 %v8152_v37, %v4768_v31  ;;  %v6321_v5 = vpop.f32.mrb[41].mxu0 }
0x3bfb   :  { %v4772_v34 = vsel %vm758_vm5, %v8155_v33, -inf }
0x3bfc   :  { %4773 = vmax.xlane.f32.xlu0 %v4772_v34 }
0x3c4f   :  { %v4870_v44 = vpop.xlane.xlu0 %4869 }
0x3c50   :  { %v4875_v3 = vrot.slane %v4870_v44, %v7089_v8  ;;  %v4879_v9 = vrot.slane %v4870_v44, %v7120_v29 }
0x3c52   :  { %v4882_v52 = vsub.f32 %v4852_v15, %v4875_v3  ;;  %v4883_v38 = vsub.f32 %v4855_v4, %v4879_v9 }
0x3c54   :  { %v4884_v56 = vmul.f32 1.442695, %v4882_v52  ;;  %v4886_v45 = vmul.f32 1.442695, %v4883_v38 }
0x3c56   :  { %6909 = vpow2.f32 %v4884_v56 }
0x3c57   :  { %6911 = vpow2.f32 %v4886_v45 }
0x3c60   :  { %v6910_v41 = vpop.eup %6909 }
0x3c61   :  { %v6912_v63 = vpop.eup %6911  ;;  %4891 = vperm.xlu1 %6739, %v6910_v41  }
0x3c62   :  { %4894 = vperm.xlu0 %6740, %v6912_v63  }
0x3c89   :  { %v8161_v1 = vpop.xlane.xlu0 %4773 }
0x3c8a   :  { %vm4787_vm10 = vcmp.eq.f32.partialorder %v8155_v33, %v8161_v1 }
0x3c8b   :  { %v4788_v6 = vsel %vm4787_vm10, %v7109_v20, 3 }
0x3c8c   :  { %v4789_v39 = vsel %vm758_vm5, %v4788_v6, 2147483647 }
0x3c8d   :  { %v4791_v17 = vshra.s32 %v4789_v39, 16  ;;  %v4790_v0 = vand.u32 65535, %v4789_v39 }
0x3c8f   :  { %v4793_v54 = vcvt.s32.f32 %v4791_v17  ;;  %v4792_v31 = vcvt.s32.f32 %v4790_v0 }
0x3c91   :  { %4794 = vmin.xlane.f32.xlu0 %v4793_v54 }
0x3ce0   :  { %v4892_v61 = vpop.permute.xlu1 %4891 }
0x3ce1   :  { %v4899_v58 = vrot.slane %v4892_v61, %v7113_v22  ;;  %v4895_v15 = vpop.permute.xlu0 %4894 }
0x3ce2   :  { %v4903_v4 = vrot.slane %v4895_v15, %v7113_v22 }
0x3ce4   :  { %v4904_v28 = vsel %vm151_vm1, %v4903_v4, %v4899_v58 }
0x3ce5   :  { %v4906_v18 = vsel %vm154_vm2, %v4904_v28, 0.0 }
0x3ce6   :  { %4907 = vadd.xlane.f32.xlu1 %v4906_v18 }
0x3d1e   :  { %v4795_v49 = vpop.xlane.xlu0 %4794 }
0x3d1f   :  { %vm4796_vm11 = vcmp.eq.f32.partialorder %v4793_v54, %v4795_v49  ;;  %v4801_v38 = vcvt.f32.s32 %v4795_v49 }
0x3d20   :  { %v4797_v20 = vsel %vm4796_vm11, %v4792_v31, inf }
0x3d21   :  { %4798 = vmin.xlane.f32.xlu1 %v4797_v20  ;;  %v4802_v45 = vshll.u32 %v4801_v38, 16 }
0x3d73   :  { %v4908_v5 = vpop.xlane.xlu1 %4907 }
0x3d74   :  { %v4913_v34 = vrot.slane %v4908_v5, %v7089_v8  ;;  %v4917_v44 = vrot.slane %v4908_v5, %v7120_v29 }
0x3d76   :  { %6913 = vrcp.f32 %v4913_v34 }
0x3d77   :  { %6915 = vrcp.f32 %v4917_v44 }
0x3d80   :  { %v6914_v3 = vpop.eup %6913 }
0x3d81   :  { %v6916_v22 = vpop.eup %6915  ;;  %v4921_v9 = vmul.f32 %v6914_v3, %v6910_v41 }
0x3d82   :  { %v4923_v52 = vmul.f32 %v6916_v22, %v6912_v63 }
0x3d83   :  { %4926 = vperm.xlu0 %6740, %v4921_v9  }
0x3d84   :  { %4931 = vperm.xlu1 %6739, %v4923_v52  }
0x3dae   :  { %v4799_v56 = vpop.xlane.xlu1 %4798 }
0x3daf   :  { %v4800_v6 = vcvt.f32.s32 %v4799_v56 }
0x3db1   :  { %v4803_v39 = vadd.s32 %v4802_v45, %v4800_v6 }
0x3db3   :  { %vm4804_vm2 = vcmp.eq.s32.totalorder %v4803_v39, 1  ;;  %vm4808_vm12 = vcmp.eq.s32.totalorder %v4803_v39, 0 }
0x3db4   :  { %v4807_v8 = vsel %vm4804_vm2, %v7412_v27, %v7414_v30 }
0x3db5   :  { %v4811_v29 = vsel %vm4808_vm12, %v7417_v19, %v4807_v8 }
0x3db6   :  { %6350 = vmatmul.mubr.msk.f32.vlgmr.msra.gmra.mrb[42].mxu0 %vm132_vm0, %v4811_v29 }
0x3db7   :  { %6710 = vmatpush3.bf16.msra.mxu0 %v7186_v10  ;;  %6360 = vmatprep.mubr.msk.f32.mxu0 %vm6982_vm3, %v6983_v12 }
0x3db8   :  { %6711 = vmatprep.subr.bf16.mxu0 %v6981_v57 }
0x3dbb   :  { %6713 = vmatpush3.bf16.msra.mxu0 %v7214_v21 }
0x3dbc   :  { %6720 = vmatprep.subr.bf16.mxu0 %v6981_v57 }
0x3dbe   :  { %6361 = vmatmul.mubr.msk.f32.vlgmr.msra.gmra.mrb[44].mxu0 %vm132_vm0, %v8096_v25 }
0x3dbf   :  { %6722 = vmatpush3.bf16.msra.mxu0 %v7281_v32  ;;  %6382 = vmatprep.mubr.msk.f32.mxu0 %vm6982_vm3, %v6983_v12 }
0x3dc0   :  { %6723 = vmatprep.subr.bf16.mxu0 %v6981_v57 }
0x3dc3   :  { %6725 = vmatpush3.bf16.msra.mxu0 %v7294_v36 }
0x3e02   :  { %v4927_v10 = vpop.permute.xlu0 %4926 }
0x3e03   :  { %v4932_v27 = vpop.permute.xlu1 %4931  ;;  %v4934_v30 = vmul.f32 %v8055_v47, %v4927_v10 }
0x3e04   :  { %v4935_v21 = vmul.f32 %v8061_v62, %v4932_v27 }
0x3e05   :  { %v4936_v19 = vsel %vm223_vm4, %v4934_v30, 0.0 }
0x3e06   :  { %v4943_v41 = vsel %vm223_vm4, %v4935_v21, 0.0  ;;  %v4937_v25 = vrot.slane %v4936_v19, 4 }
0x3e07   :  { %v4944_v63 = vrot.slane %v4943_v41, 4 }
0x3e08   :  { %v4938_v32 = vadd.f32 %v4937_v25, %v4936_v19 }
0x3e09   :  { %v4945_v17 = vadd.f32 %v4944_v63, %v4943_v41 }
0x3e0a   :  { %v4939_v54 = vrot.slane %v4938_v32, 2 }
0x3e0b   :  { %v4946_v61 = vrot.slane %v4945_v17, 2 }
0x3e0c   :  { %v4940_v58 = vadd.f32 %v4939_v54, %v4938_v32 }
0x3e0d   :  { %v4947_v15 = vadd.f32 %v4946_v61, %v4945_v17  ;;  %v762_v61 = vsub.f32 %v7389_v53, %v7395_v24 }
0x3e0e   :  { %v4941_v4 = vrot.slane %v4940_v58, 1 }
0x3e0f   :  { %v4948_v36 = vrot.slane %v4947_v15, 1 }
0x3e10   :  { %v4942_v28 = vadd.f32 %v4941_v4, %v4940_v58  ;;  %v763_v58 = vmul.f32 1.442695, %v762_v61 }
0x3e11   :  { %v4949_v18 = vadd.f32 %v4948_v36, %v4947_v15  ;;  %v2107_v15 = vsub.f32 %v7639_v7, %v7645_v51  ;;  %v3441_v36 = vsub.f32 %v7892_v48, %v7898_v2 }
0x3e13   :  { %v4952_v47 = vsel %vm151_vm1, %v4949_v18, %v4942_v28  ;;  %v2108_v4 = vmul.f32 1.442695, %v2107_v15  ;;  %v4775_v28 = vsub.f32 %v8155_v33, %v8161_v1 }
0x3e14   :  { %6339 = vmatmul.mubr.msk.f32.vlgmr.msra.gmra.mrb[42].mxu1 %vm223_vm4, %v4952_v47 }
0x3e15   :  { %6716 = vmatpush3.bf16.msra.mxu1 %v7270_v26  ;;  %6371 = vmatprep.mubr.msk.f32.mxu1 %vm6982_vm3, %v6983_v12  ;;  %v4776_v18 = vmul.f32 1.442695, %v4775_v28 }
0x3e16   :  { %6717 = vmatprep.subr.bf16.mxu1 %v6981_v57 }
0x3e19   :  { %6719 = vmatpush3.bf16.msra.mxu1 %v7290_v35 }
0x3e1a   :  { %6726 = vmatprep.subr.bf16.mxu1 %v6981_v57 }
0x3e1c   :  { %6372 = vmatmul.mubr.msk.f32.vlgmr.msra.gmra.mrb[44].mxu1 %vm132_vm0, %v8131_v50 }
0x3e1d   :  { %6728 = vmatpush3.bf16.msra.mxu1 %v7345_v13  ;;  %6393 = vmatprep.mubr.msk.f32.mxu1 %vm6982_vm3, %v6983_v12 }
0x3e1e   :  { %6729 = vmatprep.subr.bf16.mxu1 %v6981_v57 }
0x3e21   :  { %6731 = vmatpush3.bf16.msra.mxu1 %v7352_v16 }
0x3e89   :  { %v5094_v26 = vpop.f32.mrb[42].mxu0 }
0x3e8a   :  { %v6351_v62 = vpop.f32.mrb[43].mxu0 }
0x3e91   :  { %v5164_v0 = vpop.f32.mrb[44].mxu0 }
0x3e92   :  { %v6362_v49 = vpop.f32.mrb[45].mxu0 }
0x3ee7   :  { %v5021_v31 = vpop.f32.mrb[42].mxu1 }
0x3ee8   :  { %v5095_v35 = vadd.f32 %v5094_v26, %v5021_v31  ;;  %v6340_v20 = vpop.f32.mrb[43].mxu1 }
0x3eea   :  { %v5168_v5 = vadd.f32 %v5164_v0, %v5095_v35 }
0x3eec   :  { %v5169_v34 = vadd.f32 %v8085_v42, %v5168_v5 }
0x3eee   :  { %6917 = vtanh.f32 %v5169_v34  ;;  %v5526_v12 = vmul.f32 -1.442695, %v5169_v34 }
0x3eef   :  { %v5260_v50 = vpop.f32.mrb[44].mxu1 }
0x3ef0   :  { %v6373_v13 = vpop.f32.mrb[45].mxu1  ;;  %6919 = vpow2.f32 %v5526_v12 }
0x3ef8   :  { %v6918_v44 = vpop.eup %6917 }
0x3ef9   :  { %5179 = vrot.lane.b32.xlu1 %v6918_v44, %s6985_s27 }
0x3efa   :  { %v6920_v57 = vpop.eup %6919 }
0x3efb   :  { %v5173_v16 = vadd.f32 1.0, %v6920_v57 }
0x3efd   :  { %6921 = vrcp.f32 %v5173_v16 }
0x3f07   :  { %v6922_v3 = vpop.eup %6921 }
0x3f08   :  { %v5177_v52 = vmul.f32 %v6922_v3, %v8091_v11 }
0x3f6b   :  { %v5180_v22 = vpop.permute.xlu1 %5179 }
0x3f6c   :  { %v5182_v9 = vmul.f32 %v6922_v3, %v5180_v22 }
0x3f6e   :  { %5184 = vrot.lane.b32.xlu0 %v5182_v9, %s6984_s4 }
0x3fe0   :  { %v5185_v38 = vpop.permute.xlu0 %5184 }
0x3fe1   :  { %v5187_v42 = vadd.f32 %v5185_v38, %v5177_v52 }
0x3fe3   :  { %6923 = vtanh.f32 %v5187_v42 }
0x3fed   :  { %v6924_v56 = vpop.eup %6923 }
0x3fee   :  { %5190 = vrot.lane.b32.xlu1 %v6924_v56, %s6985_s27 }
0x4060   :  { %v5191_v45 = vpop.permute.xlu1 %5190 }
0x4061   :  { %v5193_v6 = vmul.f32 %v6922_v3, %v5191_v45 }
0x4063   :  { %5265 = vrot.lane.b32.xlu0 %v5193_v6, %s6984_s4 }
0x40d5   :  { %v5266_v39 = vpop.permute.xlu0 %5265 }
0x40d6   :  { %6383 = vmatmul.mubr.msk.f32.vlgmr.msra.gmra.mrb[46].mxu0 %vm132_vm0, %v5266_v39 }
0x41a9   :  { %v5335_v8 = vpop.f32.mrb[46].mxu0 }
0x41aa   :  { %v5336_v29 = vadd.f32 %v5335_v8, %v5260_v50  ;;  %v6384_v10 = vpop.f32.mrb[47].mxu0 }
0x41ac   :  { %v5339_v27 = vadd.f32 %v8113_v60, %v5336_v29  ;;  %v2774_v29 = vsub.f32 %v7778_v59, %v7784_v55 }
0x41ae   :  { %6925 = vtanh.f32 %v5339_v27  ;;  %v5529_v30 = vmul.f32 -1.442695, %v5339_v27  ;;  %v2775_v10 = vmul.f32 1.442695, %v2774_v29 }
0x41b0   :  { %6927 = vpow2.f32 %v5529_v30 }
0x41b8   :  { %v6926_v11 = vpop.eup %6925 }
0x41b9   :  { %5349 = vrot.lane.b32.xlu1 %v6926_v11, %s6985_s27 }
0x41ba   :  { %v6928_v21 = vpop.eup %6927 }
0x41bb   :  { %v5343_v19 = vadd.f32 1.0, %v6928_v21 }
0x41bd   :  { %6929 = vrcp.f32 %v5343_v19 }
0x41c7   :  { %v6930_v41 = vpop.eup %6929 }
0x41c8   :  { %v5347_v32 = vmul.f32 %v6930_v41, %v8119_v46  ;;  %v3442_v46 = vmul.f32 1.442695, %v3441_v36 }
0x422b   :  { %v5350_v25 = vpop.permute.xlu1 %5349 }
0x422c   :  { %v5352_v63 = vmul.f32 %v6930_v41, %v5350_v25 }
0x422e   :  { %5354 = vrot.lane.b32.xlu0 %v5352_v63, %s6984_s4 }
0x42a0   :  { %v5355_v17 = vpop.permute.xlu0 %5354 }
0x42a1   :  { %v5357_v54 = vadd.f32 %v5355_v17, %v5347_v32 }
0x42a3   :  { %6931 = vtanh.f32 %v5357_v54 }
0x42a4   :  { %6933 = vpow2.f32 %v763_v58 }
0x42a5   :  { %6935 = vpow2.f32 %v2108_v4 }
0x42a6   :  { %6937 = vpow2.f32 %v3442_v46 }
0x42a7   :  { %6939 = vpow2.f32 %v4776_v18 }
0x42ad   :  { %v6932_v60 = vpop.eup %6931 }
0x42ae   :  { %5360 = vrot.lane.b32.xlu1 %v6932_v60, %s6985_s27  ;;  %v6934_v47 = vpop.eup %6933 }
0x42af   :  { %v765_v26 = vsel %vm758_vm5, %v6934_v47, 0.0  ;;  %v6936_v62 = vpop.eup %6935 }
0x42b0   :  { %v2110_v0 = vsel %vm758_vm5, %v6936_v62, 0.0  ;;  %v6938_v49 = vpop.eup %6937 }
0x42b1   :  { %v3444_v31 = vsel %vm758_vm5, %v6938_v49, 0.0  ;;  %v6940_v35 = vpop.eup %6939 }
0x42b2   :  { %v4778_v20 = vsel %vm758_vm5, %v6940_v35, 0.0 }
0x42d2   :  { %766 = vadd.xlane.f32.xlu1 %v765_v26 }
0x42d6   :  { %2111 = vadd.xlane.f32.xlu1 %v2110_v0 }
0x42da   :  { %3445 = vadd.xlane.f32.xlu1 %v3444_v31 }
0x42de   :  { %4779 = vadd.xlane.f32.xlu1 %v4778_v20 }
0x4320   :  { %v5361_v5 = vpop.permute.xlu1 %5360 }
0x4321   :  { %v5363_v34 = vmul.f32 %v6930_v41, %v5361_v5 }
0x4323   :  { %5365 = vrot.lane.b32.xlu0 %v5363_v34, %s6984_s4 }
0x435f   :  { %v767_v50 = vpop.xlane.xlu1 %766 }
0x4360   :  { %6941 = vlog2.f32 %v767_v50 }
0x4363   :  { %v2112_v13 = vpop.xlane.xlu1 %2111 }
0x4364   :  { %6943 = vlog2.f32 %v2112_v13 }
0x4367   :  { %v3446_v44 = vpop.xlane.xlu1 %3445 }
0x4368   :  { %6945 = vlog2.f32 %v3446_v44 }
0x436a   :  { %v6942_v12 = vpop.eup %6941 }
0x436b   :  { %v769_v57 = vmul.f32 0.6931472, %v6942_v12  ;;  %v4780_v16 = vpop.xlane.xlu1 %4779 }
0x436c   :  { %6947 = vlog2.f32 %v4780_v16 }
0x436d   :  { %v770_v3 = vadd.f32 %v769_v57, %v7395_v24 }
0x436e   :  { %v6944_v22 = vpop.eup %6943 }
0x436f   :  { %v771_v9 = vsub.f32 %v7389_v53, %v770_v3  ;;  %v2114_v52 = vmul.f32 0.6931472, %v6944_v22 }
0x4371   :  { %772 = vst.msk [vmem:[%s8310_s17] sm:$0x3] %vm758_vm5, %v771_v9  ;;  %v2115_v38 = vadd.f32 %v2114_v52, %v7645_v51 }
0x4372   :  { %v6946_v42 = vpop.eup %6945 }
0x4373   :  { %v2116_v56 = vsub.f32 %v7639_v7, %v2115_v38  ;;  %v3448_v45 = vmul.f32 0.6931472, %v6946_v42 }
0x4375   :  { %5486 = vst.msk [vmem:[%s8310_s17 + $0x4] sm:$0x3] %vm758_vm5, %v2116_v56  ;;  %v3449_v24 = vadd.f32 %v3448_v45, %v7898_v2 }
0x4376   :  { %v6948_v53 = vpop.eup %6947 }
0x4377   :  { %v3450_v6 = vsub.f32 %v7892_v48, %v3449_v24  ;;  %v4782_v39 = vmul.f32 0.6931472, %v6948_v53  ;;  %v1440_v48 = vsub.f32 %v7515_v14, %v7521_v40 }
0x4379   :  { %5504 = vst.msk [vmem:[%s8310_s17 + $0x8] sm:$0x3] %vm758_vm5, %v3450_v6  ;;  %v4783_v51 = vadd.f32 %v4782_v39, %v8161_v1  ;;  %v1441_v2 = vmul.f32 1.442695, %v1440_v48 }
0x437b   :  { %v4784_v7 = vsub.f32 %v8155_v33, %v4783_v51  ;;  %6949 = vpow2.f32 %v1441_v2  ;;  %v4108_v33 = vsub.f32 %v8016_v23, %v8022_v43 }
0x437c   :  { %6951 = vpow2.f32 %v2775_v10 }
0x437d   :  { %5522 = vst.msk [vmem:[%s8310_s17 + $0xc] sm:$0x3] %vm758_vm5, %v4784_v7  ;;  %v4109_v1 = vmul.f32 1.442695, %v4108_v33 }
0x437f   :  { %6953 = vpow2.f32 %v4109_v1 }
0x4385   :  { %v6950_v19 = vpop.eup %6949 }
0x4386   :  { %v1443_v41 = vsel %vm758_vm5, %v6950_v19, 0.0  ;;  %v6952_v25 = vpop.eup %6951 }
0x4387   :  { %v2777_v63 = vsel %vm758_vm5, %v6952_v25, 0.0 }
0x4389   :  { %v6954_v32 = vpop.eup %6953 }
0x438a   :  { %v4111_v17 = vsel %vm758_vm5, %v6954_v32, 0.0 }
0x4395   :  { %v5366_v8 = vpop.permute.xlu0 %5365 }
0x4396   :  { %6394 = vmatmul.mubr.msk.f32.vlgmr.msra.gmra.mrb[46].mxu1 %vm132_vm0, %v5366_v8 }
0x4469   :  { %v5435_v27 = vpop.f32.mrb[46].mxu1 }
0x446a   :  { %v5436_v11 = vadd.f32 %v8152_v37, %v5435_v27  ;;  %v6395_v30 = vpop.f32.mrb[47].mxu1 }
0x446c   :  { %v5439_v21 = vsel %vm758_vm5, %v5436_v11, -inf }
0x446d   :  { %5440 = vmax.xlane.f32.xlu0 %v5439_v21 }
0x4471   :  { %1444 = vadd.xlane.f32.xlu0 %v1443_v41 }
0x4475   :  { %2778 = vadd.xlane.f32.xlu0 %v2777_v63 }
0x4479   :  { %4112 = vadd.xlane.f32.xlu0 %v4111_v17 }
0x44fa   :  { %v5441_v54 = vpop.xlane.xlu0 %5440 }
0x44fb   :  { %v5442_v60 = vsub.f32 %v5436_v11, %v5441_v54 }
0x44fd   :  { %v5443_v37 = vmul.f32 1.442695, %v5442_v60 }
0x44fe   :  { %v1445_v61 = vpop.xlane.xlu0 %1444 }
0x44ff   :  { %6955 = vpow2.f32 %v5443_v37 }
0x4500   :  { %6957 = vlog2.f32 %v1445_v61 }
0x4502   :  { %v2779_v58 = vpop.xlane.xlu0 %2778 }
0x4503   :  { %6959 = vlog2.f32 %v2779_v58 }
0x4506   :  { %v4113_v15 = vpop.xlane.xlu0 %4112 }
0x4507   :  { %6961 = vlog2.f32 %v4113_v15 }
0x4509   :  { %v6956_v4 = vpop.eup %6955 }
0x450a   :  { %v6958_v36 = vpop.eup %6957  ;;  %v5445_v46 = vsel %vm758_vm5, %v6956_v4, 0.0 }
0x450b   :  { %v1447_v28 = vmul.f32 0.6931472, %v6958_v36  ;;  %5446 = vadd.xlane.f32.xlu0 %v5445_v46 }
0x450d   :  { %v6960_v18 = vpop.eup %6959  ;;  %v1448_v47 = vadd.f32 %v1447_v28, %v7521_v40 }
0x450e   :  { %v2781_v26 = vmul.f32 0.6931472, %v6960_v18 }
0x450f   :  { %v1449_v62 = vsub.f32 %v7515_v14, %v1448_v47 }
0x4510   :  { %v2782_v0 = vadd.f32 %v2781_v26, %v7784_v55 }
0x4511   :  { %v6962_v49 = vpop.eup %6961  ;;  %5477 = vst.msk [vmem:[%s8310_s17 + $0x2] sm:$0x3] %vm758_vm5, %v1449_v62 }
0x4512   :  { %v2783_v31 = vsub.f32 %v7778_v59, %v2782_v0  ;;  %v4115_v35 = vmul.f32 0.6931472, %v6962_v49 }
0x4514   :  { %5495 = vst.msk [vmem:[%s8310_s17 + $0x6] sm:$0x3] %vm758_vm5, %v2783_v31  ;;  %v4116_v40 = vadd.f32 %v4115_v35, %v8022_v43 }
0x4516   :  { %v4117_v14 = vsub.f32 %v8016_v23, %v4116_v40 }
0x4518   :  { %5513 = vst.msk [vmem:[%s8310_s17 + $0xa] sm:$0x3] %vm758_vm5, %v4117_v14 }
0x4598   :  { %v5447_v55 = vpop.xlane.xlu0 %5446 }
0x4599   :  { %6963 = vlog2.f32 %v5447_v55 }
0x45a3   :  { %v6964_v20 = vpop.eup %6963 }
0x45a4   :  { %v5449_v5 = vmul.f32 0.6931472, %v6964_v20 }
0x45a6   :  { %v5450_v59 = vadd.f32 %v5449_v5, %v5441_v54 }
0x45a8   :  { %v5451_v34 = vsub.f32 %v5436_v11, %v5450_v59 }
0x45aa   :  { %5531 = vst.msk [vmem:[%s8310_s17 + $0xe] sm:$0x3] %vm758_vm5, %v5451_v34 }

</bundles_post_ra>
